<compile_context>
chip_gen: v6e
topology: v6e:2x2x1
jax: 0.10.0
libtpu: 0.0.40
codegen_flags: <defaults>
</compile_context>

<pallas_src>
from functools import partial

import numpy as np
import jax
import jax.numpy as jnp
from jax.experimental import pallas as pl
from jax.experimental.pallas import tpu as pltpu

BT_DEFAULT = 8   # images per grid step (keep even so BT*28 is 8-row aligned)


# ------------------------------- kernel --------------------------------------

def _net_kernel(x_ref, m1_ref, b1_ref, m2_ref, b2_ref, r1_ref, c1s_ref,
                m3_ref, b3_ref, r2_ref, c2s_ref,
                w1_ref, fb1_ref, w2_ref, fb2_ref, w3_ref, fb3_ref,
                o_ref):
    f32, bf16 = jnp.float32, jnp.bfloat16
    bt = o_ref.shape[0]

    def conv_relu(a, m_ref, b_ref):
        # a: (R, Win*Cin) f32 slab of bt stacked images.  A 3x3 VALID conv is
        # 3 banded matmuls over row-shifted views; bf16 operands, f32 accum.
        r_out = a.shape[0] - 2
        acc = jnp.dot(a[0:r_out].astype(bf16), m_ref[0],
                      preferred_element_type=f32)
        acc = acc + jnp.dot(a[1:r_out + 1].astype(bf16), m_ref[1],
                            preferred_element_type=f32)
        acc = acc + jnp.dot(a[2:r_out + 2].astype(bf16), m_ref[2],
                            preferred_element_type=f32)
        return jnp.maximum(acc + b_ref[...], 0.0)

    def maxpool(a, rsel_ref, csel_ref, ch):
        # 2x2/2 max-pool on an (R, W*ch) slab.  Row stage: pairwise max of
        # adjacent rows + a 0/1 selection matmul that picks the even rows of
        # every image AND drops cross-image garbage rows (compacts the slab).
        # Column stage: shift by one channel group, max, select even columns.
        r, wc = a.shape
        rm = jnp.maximum(a[0:r - 1, :], a[1:r, :])                  # f32
        rm = jnp.dot(rsel_ref[...], rm.astype(bf16),
                     preferred_element_type=f32)
        cm = jnp.maximum(rm[:, 0:wc - ch], rm[:, ch:wc])            # f32
        return jnp.dot(cm.astype(bf16), csel_ref[...],
                       preferred_element_type=f32)

    x = x_ref[...]                                  # (bt*28, 28)  f32
    a1 = conv_relu(x, m1_ref, b1_ref)               # (bt*28-2, 156)
    a2 = conv_relu(a1, m2_ref, b2_ref)              # (bt*28-4, 144)
    p1 = maxpool(a2, r1_ref, c1s_ref, 6)            # (bt*12, 72)   img i -> rows 12i..12i+11
    a3 = conv_relu(p1, m3_ref, b3_ref)              # (bt*12-2, 160)
    p2 = maxpool(a3, r2_ref, c2s_ref, 16)           # (bt*5, 80)    row bt*h+i = (img i, row h)

    # fc1: torch's CHW flatten is folded into host-permuted weight rows; the
    # 5 pooled rows per image become 5 partial (bt,80)@(80,250) matmuls.
    p2b = p2.astype(bf16)
    h1 = fb1_ref[...]                               # (1, 250) f32, broadcasts to (bt, 250)
    for h in range(5):
        h1 = h1 + jnp.dot(p2b[bt * h:bt * (h + 1), :],
                          w1_ref[h * 80:(h + 1) * 80, :],
                          preferred_element_type=f32)
    h1 = jnp.maximum(h1, 0.0)                       # (bt, 250)
    h2 = jnp.maximum(jnp.dot(h1.astype(bf16), w2_ref[...],
                             preferred_element_type=f32) + fb2_ref[...], 0.0)
    o_ref[...] = jnp.dot(h2.astype(bf16), w3_ref[...],
                         preferred_element_type=f32) + fb3_ref[...]   # (bt, 128)


# --------------------- host-side weight preprocessing -------------------------

def _conv_band(w, w_in):
    """Banded conv matrices. w: (Cout,Cin,3,3) -> (3, w_in*Cin, (w_in-2)*Cout)."""
    w = np.asarray(w, np.float32)
    cout, cin = w.shape[0], w.shape[1]
    w_out = w_in - 2
    m = np.zeros((3, w_in * cin, w_out * cout), np.float32)
    for kh in range(3):
        for kw in range(3):
            tap = w[:, :, kh, kw].T                    # (Cin, Cout)
            for j in range(w_out):
                m[kh, (j + kw) * cin:(j + kw + 1) * cin,
                      j * cout:(j + 1) * cout] = tap
    return m


def _csel(w_in, c):
    """Even-column 0/1 selection matrix for the pool column stage."""
    m = np.zeros(((w_in - 1) * c, (w_in // 2) * c), np.float32)
    for j in range(w_in // 2):
        for ch in range(c):
            m[2 * j * c + ch, j * c + ch] = 1.0
    return m


def _rsel1(bt):
    # conv2 slab has bt*28-4 rows -> pairwise-max slab has bt*28-5 rows.
    # Select row 28*i + 2*j (image i, pooled row j); garbage rows dropped.
    m = np.zeros((bt * 12, bt * 28 - 5), np.float32)
    for i in range(bt):
        for j in range(12):
            m[12 * i + j, 28 * i + 2 * j] = 1.0
    return m


def _rsel2(bt):
    # conv3 slab has bt*12-2 rows -> pairwise-max slab has bt*12-3 rows.
    # Output is h-major (row bt*h + i) so fc1 takes contiguous (bt,80) slices.
    m = np.zeros((bt * 5, bt * 12 - 3), np.float32)
    for h in range(5):
        for i in range(bt):
            m[bt * h + i, 12 * i + 2 * h] = 1.0
    return m


def prepare_params(p, bt=BT_DEFAULT):
    """Turn torch-layout params into kernel-ready matrices (host-side, once)."""
    m1 = _conv_band(p['w1'], 28)                       # (3, 28, 156)
    m2 = _conv_band(p['w2'], 26)                       # (3, 156, 144)
    m3 = _conv_band(p['w3'], 12)                       # (3, 72, 160)
    b1t = np.tile(np.asarray(p['b1'], np.float32), 26)[None, :]   # (1, 156)
    b2t = np.tile(np.asarray(p['b2'], np.float32), 24)[None, :]   # (1, 144)
    b3t = np.tile(np.asarray(p['b3'], np.float32), 10)[None, :]   # (1, 160)

    r1, c1s = _rsel1(bt), _csel(24, 6)                 # (bt*12, bt*28-5), (138, 72)
    r2, c2s = _rsel2(bt), _csel(10, 16)                # (bt*5, bt*12-3),  (144, 80)

    # fc1 rows permuted from torch CHW flatten order to our HWC order.
    fc1w = np.asarray(p['fc1w'], np.float32)           # (250, 400)
    perm = np.empty(400, np.int64)
    for h in range(5):
        for w in range(5):
            for c in range(16):
                perm[h * 80 + w * 16 + c] = c * 25 + h * 5 + w
    w1p = fc1w.T[perm]                                 # (400, 250)
    fb1 = np.asarray(p['fc1b'], np.float32)[None, :]   # (1, 250)
    w2t = np.asarray(p['fc2w'], np.float32).T          # (250, 120)
    fb2 = np.asarray(p['fc2b'], np.float32)[None, :]   # (1, 120)
    w3p = np.zeros((120, 128), np.float32)             # pad output lanes to 128
    w3p[:, :25] = np.asarray(p['fc3w'], np.float32).T
    fb3 = np.zeros((1, 128), np.float32)
    fb3[0, :25] = np.asarray(p['fc3b'], np.float32)

    mm = dict(m1=m1, m2=m2, m3=m3, r1=r1, c1s=c1s, r2=r2, c2s=c2s,
              w1p=w1p, w2t=w2t, w3p=w3p)                       # matmul operands
    add = dict(b1t=b1t, b2t=b2t, b3t=b3t, fb1=fb1, fb2=fb2, fb3=fb3)  # bias terms
    out = {k: jnp.asarray(v, jnp.bfloat16) for k, v in mm.items()}
    out.update({k: jnp.asarray(v, jnp.float32) for k, v in add.items()})
    return out


# ------------------------------ JAX wrapper -----------------------------------

_WEIGHT_ORDER = ['m1', 'b1t', 'm2', 'b2t', 'r1', 'c1s',
                 'm3', 'b3t', 'r2', 'c2s',
                 'w1p', 'fb1', 'w2t', 'fb2', 'w3p', 'fb3']


def _cspec(shape):
    zeros = (0,) * len(shape)
    return pl.BlockSpec(shape, lambda b, _z=zeros: _z)


@partial(jax.jit, static_argnames=('bt',))
def net_forward(x_nchw, kp, bt=BT_DEFAULT):
    B = x_nchw.shape[0]
    b_pad = -(-B // bt) * bt
    x = x_nchw.astype(jnp.float32).reshape(B, 28, 28)       # Cin == 1 -> squeeze
    if b_pad != B:                                           # pad ragged batch
        x = jnp.concatenate(
            [x, jnp.zeros((b_pad - B, 28, 28), jnp.float32)], axis=0)
    x2d = x.reshape(b_pad * 28, 28)                          # image i -> rows 28i..28i+27

    weights = [kp[n] for n in _WEIGHT_ORDER]
    out = pl.pallas_call(
        _net_kernel,
        out_shape=jax.ShapeDtypeStruct((b_pad, 128), jnp.float32),
        grid_spec=pltpu.PrefetchScalarGridSpec(
            num_scalar_prefetch=0,
            grid=(b_pad // bt,),
            in_specs=[pl.BlockSpec((bt * 28, 28), lambda b: (b, 0))]
                     + [_cspec(w.shape) for w in weights],
            out_specs=pl.BlockSpec((bt, 128), lambda b: (b, 0)),
        ),
        compiler_params=pltpu.CompilerParams(
            dimension_semantics=("parallel",)),
    )(x2d, *weights)
    return out[:B, :25]


# --------------------------- params & reference -------------------------------

def init_params(key):
    def uni(k, shape, fan_in):
        bound = 1.0 / (fan_in ** 0.5)
        return jax.random.uniform(k, shape, jnp.float32, -bound, bound)

    ks = jax.random.split(key, 12)
    p = {}
    p['w1'] = uni(ks[0], (6, 1, 3, 3), 1 * 9);   p['b1'] = uni(ks[1], (6,), 1 * 9)
    p['w2'] = uni(ks[2], (6, 6, 3, 3), 6 * 9);   p['b2'] = uni(ks[3], (6,), 6 * 9)
    p['w3'] = uni(ks[4], (16, 6, 3, 3), 6 * 9);  p['b3'] = uni(ks[5], (16,), 6 * 9)
    p['fc1w'] = uni(ks[6], (250, 400), 400);     p['fc1b'] = uni(ks[7], (250,), 400)
    p['fc2w'] = uni(ks[8], (120, 250), 250);     p['fc2b'] = uni(ks[9], (120,), 250)
    p['fc3w'] = uni(ks[10], (25, 120), 120);     p['fc3b'] = uni(ks[11], (25,), 120)
    return p


def reference_forward(x, p):
    """Pure-JAX reference matching the torch module (NCHW)."""
    def conv(x, w, b):
        y = jax.lax.conv_general_dilated(
            x, w, window_strides=(1, 1), padding='VALID',
            dimension_numbers=('NCHW', 'OIHW', 'NCHW'))
        return y + b[None, :, None, None]

    def pool(x):
        return jax.lax.reduce_window(x, -jnp.inf, jax.lax.max,
                                     (1, 1, 2, 2), (1, 1, 2, 2), 'VALID')

    x = jax.nn.relu(conv(x, p['w1'], p['b1']))
    x = pool(jax.nn.relu(conv(x, p['w2'], p['b2'])))
    x = pool(jax.nn.relu(conv(x, p['w3'], p['b3'])))
    x = x.reshape(x.shape[0], -1)
    x = jax.nn.relu(x @ p['fc1w'].T + p['fc1b'])
    x = jax.nn.relu(x @ p['fc2w'].T + p['fc2b'])
    return x @ p['fc3w'].T + p['fc3b']


# ----------------------------------- main --------------------------------------

if __name__ == "__main__":
    key = jax.random.PRNGKey(0)
    kp_key, kx = jax.random.split(key)
    params = init_params(kp_key)

    BT = BT_DEFAULT                                      # 8 images per grid step
    kparams = prepare_params(params, BT)                 # one-time host prep

    B = 16                                               # grid length 2 (even, v7x-friendly)
    x = jax.random.normal(kx, (B, 1, 28, 28), jnp.float32)   # MNIST-like input

    out = net_forward(x, kparams, bt=BT)
    out = jax.block_until_ready(out)
    assert out.shape == (B, 25), out.shape

    ref = reference_forward(x, params)
    err = float(jnp.max(jnp.abs(out - ref)))
    assert err < 5e-2, f"max abs error vs reference too large: {err}"

    print("KERNEL_OK")
</pallas_src>

<mosaic_0001>
module attributes {stable_mosaic.version = 11 : i64} {
  func.func @_net_kernel(%arg0: i32, %arg1: memref<224x28xf32, #tpu.memory_space<vmem>>, %arg2: memref<3x28x156xbf16, #tpu.memory_space<vmem>>, %arg3: memref<1x156xf32, #tpu.memory_space<vmem>>, %arg4: memref<3x156x144xbf16, #tpu.memory_space<vmem>>, %arg5: memref<1x144xf32, #tpu.memory_space<vmem>>, %arg6: memref<96x219xbf16, #tpu.memory_space<vmem>>, %arg7: memref<138x72xbf16, #tpu.memory_space<vmem>>, %arg8: memref<3x72x160xbf16, #tpu.memory_space<vmem>>, %arg9: memref<1x160xf32, #tpu.memory_space<vmem>>, %arg10: memref<40x93xbf16, #tpu.memory_space<vmem>>, %arg11: memref<144x80xbf16, #tpu.memory_space<vmem>>, %arg12: memref<400x250xbf16, #tpu.memory_space<vmem>>, %arg13: memref<1x250xf32, #tpu.memory_space<vmem>>, %arg14: memref<250x120xbf16, #tpu.memory_space<vmem>>, %arg15: memref<1x120xf32, #tpu.memory_space<vmem>>, %arg16: memref<120x128xbf16, #tpu.memory_space<vmem>>, %arg17: memref<1x128xf32, #tpu.memory_space<vmem>>, %arg18: memref<8x128xf32, #tpu.memory_space<vmem>>) attributes {dimension_semantics = [#tpu.dimension_semantics<parallel>], iteration_bounds = array<i64: 2>, scalar_prefetch = 0 : i64, scratch_operands = 0 : i64, tpu.core_type = #tpu.core_type<tc>, window_params = [{transform_indices = @transform_0, window_bounds = array<i64: 224, 28>}, {pipeline_mode = #tpu.pipeline_mode<synchronous>, transform_indices = @transform_1, window_bounds = array<i64: 3, 28, 156>}, {pipeline_mode = #tpu.pipeline_mode<synchronous>, transform_indices = @transform_2, window_bounds = array<i64: 1, 156>}, {pipeline_mode = #tpu.pipeline_mode<synchronous>, transform_indices = @transform_3, window_bounds = array<i64: 3, 156, 144>}, {pipeline_mode = #tpu.pipeline_mode<synchronous>, transform_indices = @transform_4, window_bounds = array<i64: 1, 144>}, {pipeline_mode = #tpu.pipeline_mode<synchronous>, transform_indices = @transform_5, window_bounds = array<i64: 96, 219>}, {pipeline_mode = #tpu.pipeline_mode<synchronous>, transform_indices = @transform_6, window_bounds = array<i64: 138, 72>}, {pipeline_mode = #tpu.pipeline_mode<synchronous>, transform_indices = @transform_7, window_bounds = array<i64: 3, 72, 160>}, {pipeline_mode = #tpu.pipeline_mode<synchronous>, transform_indices = @transform_8, window_bounds = array<i64: 1, 160>}, {pipeline_mode = #tpu.pipeline_mode<synchronous>, transform_indices = @transform_9, window_bounds = array<i64: 40, 93>}, {pipeline_mode = #tpu.pipeline_mode<synchronous>, transform_indices = @transform_10, window_bounds = array<i64: 144, 80>}, {pipeline_mode = #tpu.pipeline_mode<synchronous>, transform_indices = @transform_11, window_bounds = array<i64: 400, 250>}, {pipeline_mode = #tpu.pipeline_mode<synchronous>, transform_indices = @transform_12, window_bounds = array<i64: 1, 250>}, {pipeline_mode = #tpu.pipeline_mode<synchronous>, transform_indices = @transform_13, window_bounds = array<i64: 250, 120>}, {pipeline_mode = #tpu.pipeline_mode<synchronous>, transform_indices = @transform_14, window_bounds = array<i64: 1, 120>}, {pipeline_mode = #tpu.pipeline_mode<synchronous>, transform_indices = @transform_15, window_bounds = array<i64: 120, 128>}, {pipeline_mode = #tpu.pipeline_mode<synchronous>, transform_indices = @transform_16, window_bounds = array<i64: 1, 128>}, {transform_indices = @transform_17, window_bounds = array<i64: 8, 128>}]} {
    %c0 = arith.constant 0 : index
    %c0_0 = arith.constant 0 : index
    %0 = vector.load %arg1[%c0, %c0_0] : memref<224x28xf32, #tpu.memory_space<vmem>>, vector<224x28xf32>
    %1 = vector.extract_strided_slice %0 {offsets = [0, 0], sizes = [222, 28], strides = [1, 1]} : vector<224x28xf32> to vector<222x28xf32>
    %2 = arith.truncf %1 : vector<222x28xf32> to vector<222x28xbf16>
    %c0_1 = arith.constant 0 : index
    %c0_2 = arith.constant 0 : index
    %c0_3 = arith.constant 0 : index
    %3 = vector.load %arg2[%c0_1, %c0_2, %c0_3] : memref<3x28x156xbf16, #tpu.memory_space<vmem>>, vector<1x28x156xbf16>
    %4 = vector.shape_cast %3 : vector<1x28x156xbf16> to vector<28x156xbf16>
    %cst = arith.constant dense<0.000000e+00> : vector<222x156xf32>
    %5 = tpu.matmul %2, %4, %cst {dimension_numbers = #tpu.dot_dimension_numbers<[1], [0], [0], [1], [0, 0, 1, 1], [], []>} : vector<222x28xbf16>, vector<28x156xbf16>, vector<222x156xf32> -> vector<222x156xf32>
    %6 = vector.extract_strided_slice %0 {offsets = [1, 0], sizes = [222, 28], strides = [1, 1]} : vector<224x28xf32> to vector<222x28xf32>
    %7 = arith.truncf %6 : vector<222x28xf32> to vector<222x28xbf16>
    %c1 = arith.constant 1 : index
    %c0_4 = arith.constant 0 : index
    %c0_5 = arith.constant 0 : index
    %8 = vector.load %arg2[%c1, %c0_4, %c0_5] : memref<3x28x156xbf16, #tpu.memory_space<vmem>>, vector<1x28x156xbf16>
    %9 = vector.shape_cast %8 : vector<1x28x156xbf16> to vector<28x156xbf16>
    %cst_6 = arith.constant dense<0.000000e+00> : vector<222x156xf32>
    %10 = tpu.matmul %7, %9, %cst_6 {dimension_numbers = #tpu.dot_dimension_numbers<[1], [0], [0], [1], [0, 0, 1, 1], [], []>} : vector<222x28xbf16>, vector<28x156xbf16>, vector<222x156xf32> -> vector<222x156xf32>
    %11 = arith.addf %5, %10 : vector<222x156xf32>
    %12 = vector.extract_strided_slice %0 {offsets = [2, 0], sizes = [222, 28], strides = [1, 1]} : vector<224x28xf32> to vector<222x28xf32>
    %13 = arith.truncf %12 : vector<222x28xf32> to vector<222x28xbf16>
    %c2 = arith.constant 2 : index
    %c0_7 = arith.constant 0 : index
    %c0_8 = arith.constant 0 : index
    %14 = vector.load %arg2[%c2, %c0_7, %c0_8] : memref<3x28x156xbf16, #tpu.memory_space<vmem>>, vector<1x28x156xbf16>
    %15 = vector.shape_cast %14 : vector<1x28x156xbf16> to vector<28x156xbf16>
    %cst_9 = arith.constant dense<0.000000e+00> : vector<222x156xf32>
    %16 = tpu.matmul %13, %15, %cst_9 {dimension_numbers = #tpu.dot_dimension_numbers<[1], [0], [0], [1], [0, 0, 1, 1], [], []>} : vector<222x28xbf16>, vector<28x156xbf16>, vector<222x156xf32> -> vector<222x156xf32>
    %17 = arith.addf %11, %16 : vector<222x156xf32>
    %c0_10 = arith.constant 0 : index
    %c0_11 = arith.constant 0 : index
    %18 = vector.load %arg3[%c0_10, %c0_11] : memref<1x156xf32, #tpu.memory_space<vmem>>, vector<1x156xf32>
    %19 = vector.broadcast %18 : vector<1x156xf32> to vector<222x156xf32>
    %20 = arith.addf %17, %19 : vector<222x156xf32>
    %cst_12 = arith.constant 0.000000e+00 : f32
    %21 = vector.broadcast %cst_12 : f32 to vector<222x156xf32>
    %22 = arith.maximumf %20, %21 : vector<222x156xf32>
    %23 = vector.extract_strided_slice %22 {offsets = [0, 0], sizes = [220, 156], strides = [1, 1]} : vector<222x156xf32> to vector<220x156xf32>
    %24 = arith.truncf %23 : vector<220x156xf32> to vector<220x156xbf16>
    %c0_13 = arith.constant 0 : index
    %c0_14 = arith.constant 0 : index
    %c0_15 = arith.constant 0 : index
    %25 = vector.load %arg4[%c0_13, %c0_14, %c0_15] : memref<3x156x144xbf16, #tpu.memory_space<vmem>>, vector<1x156x144xbf16>
    %26 = vector.shape_cast %25 : vector<1x156x144xbf16> to vector<156x144xbf16>
    %cst_16 = arith.constant dense<0.000000e+00> : vector<220x144xf32>
    %27 = tpu.matmul %24, %26, %cst_16 {dimension_numbers = #tpu.dot_dimension_numbers<[1], [0], [0], [1], [0, 0, 1, 1], [], []>} : vector<220x156xbf16>, vector<156x144xbf16>, vector<220x144xf32> -> vector<220x144xf32>
    %28 = vector.extract_strided_slice %22 {offsets = [1, 0], sizes = [220, 156], strides = [1, 1]} : vector<222x156xf32> to vector<220x156xf32>
    %29 = arith.truncf %28 : vector<220x156xf32> to vector<220x156xbf16>
    %c1_17 = arith.constant 1 : index
    %c0_18 = arith.constant 0 : index
    %c0_19 = arith.constant 0 : index
    %30 = vector.load %arg4[%c1_17, %c0_18, %c0_19] : memref<3x156x144xbf16, #tpu.memory_space<vmem>>, vector<1x156x144xbf16>
    %31 = vector.shape_cast %30 : vector<1x156x144xbf16> to vector<156x144xbf16>
    %cst_20 = arith.constant dense<0.000000e+00> : vector<220x144xf32>
    %32 = tpu.matmul %29, %31, %cst_20 {dimension_numbers = #tpu.dot_dimension_numbers<[1], [0], [0], [1], [0, 0, 1, 1], [], []>} : vector<220x156xbf16>, vector<156x144xbf16>, vector<220x144xf32> -> vector<220x144xf32>
    %33 = arith.addf %27, %32 : vector<220x144xf32>
    %34 = vector.extract_strided_slice %22 {offsets = [2, 0], sizes = [220, 156], strides = [1, 1]} : vector<222x156xf32> to vector<220x156xf32>
    %35 = arith.truncf %34 : vector<220x156xf32> to vector<220x156xbf16>
    %c2_21 = arith.constant 2 : index
    %c0_22 = arith.constant 0 : index
    %c0_23 = arith.constant 0 : index
    %36 = vector.load %arg4[%c2_21, %c0_22, %c0_23] : memref<3x156x144xbf16, #tpu.memory_space<vmem>>, vector<1x156x144xbf16>
    %37 = vector.shape_cast %36 : vector<1x156x144xbf16> to vector<156x144xbf16>
    %cst_24 = arith.constant dense<0.000000e+00> : vector<220x144xf32>
    %38 = tpu.matmul %35, %37, %cst_24 {dimension_numbers = #tpu.dot_dimension_numbers<[1], [0], [0], [1], [0, 0, 1, 1], [], []>} : vector<220x156xbf16>, vector<156x144xbf16>, vector<220x144xf32> -> vector<220x144xf32>
    %39 = arith.addf %33, %38 : vector<220x144xf32>
    %c0_25 = arith.constant 0 : index
    %c0_26 = arith.constant 0 : index
    %40 = vector.load %arg5[%c0_25, %c0_26] : memref<1x144xf32, #tpu.memory_space<vmem>>, vector<1x144xf32>
    %41 = vector.broadcast %40 : vector<1x144xf32> to vector<220x144xf32>
    %42 = arith.addf %39, %41 : vector<220x144xf32>
    %cst_27 = arith.constant 0.000000e+00 : f32
    %43 = vector.broadcast %cst_27 : f32 to vector<220x144xf32>
    %44 = arith.maximumf %42, %43 : vector<220x144xf32>
    %45 = vector.extract_strided_slice %44 {offsets = [0, 0], sizes = [219, 144], strides = [1, 1]} : vector<220x144xf32> to vector<219x144xf32>
    %46 = vector.extract_strided_slice %44 {offsets = [1, 0], sizes = [219, 144], strides = [1, 1]} : vector<220x144xf32> to vector<219x144xf32>
    %47 = arith.maximumf %45, %46 : vector<219x144xf32>
    %c0_28 = arith.constant 0 : index
    %c0_29 = arith.constant 0 : index
    %48 = vector.load %arg6[%c0_28, %c0_29] : memref<96x219xbf16, #tpu.memory_space<vmem>>, vector<96x219xbf16>
    %49 = arith.truncf %47 : vector<219x144xf32> to vector<219x144xbf16>
    %cst_30 = arith.constant dense<0.000000e+00> : vector<96x144xf32>
    %50 = tpu.matmul %48, %49, %cst_30 {dimension_numbers = #tpu.dot_dimension_numbers<[1], [0], [0], [1], [0, 0, 1, 1], [], []>} : vector<96x219xbf16>, vector<219x144xbf16>, vector<96x144xf32> -> vector<96x144xf32>
    %51 = vector.extract_strided_slice %50 {offsets = [0, 0], sizes = [96, 138], strides = [1, 1]} : vector<96x144xf32> to vector<96x138xf32>
    %52 = vector.extract_strided_slice %50 {offsets = [0, 6], sizes = [96, 138], strides = [1, 1]} : vector<96x144xf32> to vector<96x138xf32>
    %53 = arith.maximumf %51, %52 : vector<96x138xf32>
    %54 = arith.truncf %53 : vector<96x138xf32> to vector<96x138xbf16>
    %c0_31 = arith.constant 0 : index
    %c0_32 = arith.constant 0 : index
    %55 = vector.load %arg7[%c0_31, %c0_32] : memref<138x72xbf16, #tpu.memory_space<vmem>>, vector<138x72xbf16>
    %cst_33 = arith.constant dense<0.000000e+00> : vector<96x72xf32>
    %56 = tpu.matmul %54, %55, %cst_33 {dimension_numbers = #tpu.dot_dimension_numbers<[1], [0], [0], [1], [0, 0, 1, 1], [], []>} : vector<96x138xbf16>, vector<138x72xbf16>, vector<96x72xf32> -> vector<96x72xf32>
    %57 = vector.extract_strided_slice %56 {offsets = [0, 0], sizes = [94, 72], strides = [1, 1]} : vector<96x72xf32> to vector<94x72xf32>
    %58 = arith.truncf %57 : vector<94x72xf32> to vector<94x72xbf16>
    %c0_34 = arith.constant 0 : index
    %c0_35 = arith.constant 0 : index
    %c0_36 = arith.constant 0 : index
    %59 = vector.load %arg8[%c0_34, %c0_35, %c0_36] : memref<3x72x160xbf16, #tpu.memory_space<vmem>>, vector<1x72x160xbf16>
    %60 = vector.shape_cast %59 : vector<1x72x160xbf16> to vector<72x160xbf16>
    %cst_37 = arith.constant dense<0.000000e+00> : vector<94x160xf32>
    %61 = tpu.matmul %58, %60, %cst_37 {dimension_numbers = #tpu.dot_dimension_numbers<[1], [0], [0], [1], [0, 0, 1, 1], [], []>} : vector<94x72xbf16>, vector<72x160xbf16>, vector<94x160xf32> -> vector<94x160xf32>
    %62 = vector.extract_strided_slice %56 {offsets = [1, 0], sizes = [94, 72], strides = [1, 1]} : vector<96x72xf32> to vector<94x72xf32>
    %63 = arith.truncf %62 : vector<94x72xf32> to vector<94x72xbf16>
    %c1_38 = arith.constant 1 : index
    %c0_39 = arith.constant 0 : index
    %c0_40 = arith.constant 0 : index
    %64 = vector.load %arg8[%c1_38, %c0_39, %c0_40] : memref<3x72x160xbf16, #tpu.memory_space<vmem>>, vector<1x72x160xbf16>
    %65 = vector.shape_cast %64 : vector<1x72x160xbf16> to vector<72x160xbf16>
    %cst_41 = arith.constant dense<0.000000e+00> : vector<94x160xf32>
    %66 = tpu.matmul %63, %65, %cst_41 {dimension_numbers = #tpu.dot_dimension_numbers<[1], [0], [0], [1], [0, 0, 1, 1], [], []>} : vector<94x72xbf16>, vector<72x160xbf16>, vector<94x160xf32> -> vector<94x160xf32>
    %67 = arith.addf %61, %66 : vector<94x160xf32>
    %68 = vector.extract_strided_slice %56 {offsets = [2, 0], sizes = [94, 72], strides = [1, 1]} : vector<96x72xf32> to vector<94x72xf32>
    %69 = arith.truncf %68 : vector<94x72xf32> to vector<94x72xbf16>
    %c2_42 = arith.constant 2 : index
    %c0_43 = arith.constant 0 : index
    %c0_44 = arith.constant 0 : index
    %70 = vector.load %arg8[%c2_42, %c0_43, %c0_44] : memref<3x72x160xbf16, #tpu.memory_space<vmem>>, vector<1x72x160xbf16>
    %71 = vector.shape_cast %70 : vector<1x72x160xbf16> to vector<72x160xbf16>
    %cst_45 = arith.constant dense<0.000000e+00> : vector<94x160xf32>
    %72 = tpu.matmul %69, %71, %cst_45 {dimension_numbers = #tpu.dot_dimension_numbers<[1], [0], [0], [1], [0, 0, 1, 1], [], []>} : vector<94x72xbf16>, vector<72x160xbf16>, vector<94x160xf32> -> vector<94x160xf32>
    %73 = arith.addf %67, %72 : vector<94x160xf32>
    %c0_46 = arith.constant 0 : index
    %c0_47 = arith.constant 0 : index
    %74 = vector.load %arg9[%c0_46, %c0_47] : memref<1x160xf32, #tpu.memory_space<vmem>>, vector<1x160xf32>
    %75 = vector.broadcast %74 : vector<1x160xf32> to vector<94x160xf32>
    %76 = arith.addf %73, %75 : vector<94x160xf32>
    %cst_48 = arith.constant 0.000000e+00 : f32
    %77 = vector.broadcast %cst_48 : f32 to vector<94x160xf32>
    %78 = arith.maximumf %76, %77 : vector<94x160xf32>
    %79 = vector.extract_strided_slice %78 {offsets = [0, 0], sizes = [93, 160], strides = [1, 1]} : vector<94x160xf32> to vector<93x160xf32>
    %80 = vector.extract_strided_slice %78 {offsets = [1, 0], sizes = [93, 160], strides = [1, 1]} : vector<94x160xf32> to vector<93x160xf32>
    %81 = arith.maximumf %79, %80 : vector<93x160xf32>
    %c0_49 = arith.constant 0 : index
    %c0_50 = arith.constant 0 : index
    %82 = vector.load %arg10[%c0_49, %c0_50] : memref<40x93xbf16, #tpu.memory_space<vmem>>, vector<40x93xbf16>
    %83 = arith.truncf %81 : vector<93x160xf32> to vector<93x160xbf16>
    %cst_51 = arith.constant dense<0.000000e+00> : vector<40x160xf32>
    %84 = tpu.matmul %82, %83, %cst_51 {dimension_numbers = #tpu.dot_dimension_numbers<[1], [0], [0], [1], [0, 0, 1, 1], [], []>} : vector<40x93xbf16>, vector<93x160xbf16>, vector<40x160xf32> -> vector<40x160xf32>
    %85 = vector.extract_strided_slice %84 {offsets = [0, 0], sizes = [40, 144], strides = [1, 1]} : vector<40x160xf32> to vector<40x144xf32>
    %86 = vector.extract_strided_slice %84 {offsets = [0, 16], sizes = [40, 144], strides = [1, 1]} : vector<40x160xf32> to vector<40x144xf32>
    %87 = arith.maximumf %85, %86 : vector<40x144xf32>
    %88 = arith.truncf %87 : vector<40x144xf32> to vector<40x144xbf16>
    %c0_52 = arith.constant 0 : index
    %c0_53 = arith.constant 0 : index
    %89 = vector.load %arg11[%c0_52, %c0_53] : memref<144x80xbf16, #tpu.memory_space<vmem>>, vector<144x80xbf16>
    %cst_54 = arith.constant dense<0.000000e+00> : vector<40x80xf32>
    %90 = tpu.matmul %88, %89, %cst_54 {dimension_numbers = #tpu.dot_dimension_numbers<[1], [0], [0], [1], [0, 0, 1, 1], [], []>} : vector<40x144xbf16>, vector<144x80xbf16>, vector<40x80xf32> -> vector<40x80xf32>
    %91 = arith.truncf %90 : vector<40x80xf32> to vector<40x80xbf16>
    %c0_55 = arith.constant 0 : index
    %c0_56 = arith.constant 0 : index
    %92 = vector.load %arg13[%c0_55, %c0_56] : memref<1x250xf32, #tpu.memory_space<vmem>>, vector<1x250xf32>
    %93 = vector.extract_strided_slice %91 {offsets = [0, 0], sizes = [8, 80], strides = [1, 1]} : vector<40x80xbf16> to vector<8x80xbf16>
    %c0_57 = arith.constant 0 : index
    %c0_58 = arith.constant 0 : index
    %94 = vector.load %arg12[%c0_57, %c0_58] : memref<400x250xbf16, #tpu.memory_space<vmem>>, vector<80x250xbf16>
    %cst_59 = arith.constant dense<0.000000e+00> : vector<8x250xf32>
    %95 = tpu.matmul %93, %94, %cst_59 {dimension_numbers = #tpu.dot_dimension_numbers<[1], [0], [0], [1], [0, 0, 1, 1], [], []>} : vector<8x80xbf16>, vector<80x250xbf16>, vector<8x250xf32> -> vector<8x250xf32>
    %96 = vector.broadcast %92 : vector<1x250xf32> to vector<8x250xf32>
    %97 = arith.addf %96, %95 : vector<8x250xf32>
    %98 = vector.extract_strided_slice %91 {offsets = [8, 0], sizes = [8, 80], strides = [1, 1]} : vector<40x80xbf16> to vector<8x80xbf16>
    %c80 = arith.constant 80 : index
    %c0_60 = arith.constant 0 : index
    %99 = vector.load %arg12[%c80, %c0_60] : memref<400x250xbf16, #tpu.memory_space<vmem>>, vector<80x250xbf16>
    %cst_61 = arith.constant dense<0.000000e+00> : vector<8x250xf32>
    %100 = tpu.matmul %98, %99, %cst_61 {dimension_numbers = #tpu.dot_dimension_numbers<[1], [0], [0], [1], [0, 0, 1, 1], [], []>} : vector<8x80xbf16>, vector<80x250xbf16>, vector<8x250xf32> -> vector<8x250xf32>
    %101 = arith.addf %97, %100 : vector<8x250xf32>
    %102 = vector.extract_strided_slice %91 {offsets = [16, 0], sizes = [8, 80], strides = [1, 1]} : vector<40x80xbf16> to vector<8x80xbf16>
    %c160 = arith.constant 160 : index
    %c0_62 = arith.constant 0 : index
    %103 = vector.load %arg12[%c160, %c0_62] : memref<400x250xbf16, #tpu.memory_space<vmem>>, vector<80x250xbf16>
    %cst_63 = arith.constant dense<0.000000e+00> : vector<8x250xf32>
    %104 = tpu.matmul %102, %103, %cst_63 {dimension_numbers = #tpu.dot_dimension_numbers<[1], [0], [0], [1], [0, 0, 1, 1], [], []>} : vector<8x80xbf16>, vector<80x250xbf16>, vector<8x250xf32> -> vector<8x250xf32>
    %105 = arith.addf %101, %104 : vector<8x250xf32>
    %106 = vector.extract_strided_slice %91 {offsets = [24, 0], sizes = [8, 80], strides = [1, 1]} : vector<40x80xbf16> to vector<8x80xbf16>
    %c240 = arith.constant 240 : index
    %c0_64 = arith.constant 0 : index
    %107 = vector.load %arg12[%c240, %c0_64] : memref<400x250xbf16, #tpu.memory_space<vmem>>, vector<80x250xbf16>
    %cst_65 = arith.constant dense<0.000000e+00> : vector<8x250xf32>
    %108 = tpu.matmul %106, %107, %cst_65 {dimension_numbers = #tpu.dot_dimension_numbers<[1], [0], [0], [1], [0, 0, 1, 1], [], []>} : vector<8x80xbf16>, vector<80x250xbf16>, vector<8x250xf32> -> vector<8x250xf32>
    %109 = arith.addf %105, %108 : vector<8x250xf32>
    %110 = vector.extract_strided_slice %91 {offsets = [32, 0], sizes = [8, 80], strides = [1, 1]} : vector<40x80xbf16> to vector<8x80xbf16>
    %c320 = arith.constant 320 : index
    %c0_66 = arith.constant 0 : index
    %111 = vector.load %arg12[%c320, %c0_66] : memref<400x250xbf16, #tpu.memory_space<vmem>>, vector<80x250xbf16>
    %cst_67 = arith.constant dense<0.000000e+00> : vector<8x250xf32>
    %112 = tpu.matmul %110, %111, %cst_67 {dimension_numbers = #tpu.dot_dimension_numbers<[1], [0], [0], [1], [0, 0, 1, 1], [], []>} : vector<8x80xbf16>, vector<80x250xbf16>, vector<8x250xf32> -> vector<8x250xf32>
    %113 = arith.addf %109, %112 : vector<8x250xf32>
    %cst_68 = arith.constant 0.000000e+00 : f32
    %114 = vector.broadcast %cst_68 : f32 to vector<8x250xf32>
    %115 = arith.maximumf %113, %114 : vector<8x250xf32>
    %116 = arith.truncf %115 : vector<8x250xf32> to vector<8x250xbf16>
    %c0_69 = arith.constant 0 : index
    %c0_70 = arith.constant 0 : index
    %117 = vector.load %arg14[%c0_69, %c0_70] : memref<250x120xbf16, #tpu.memory_space<vmem>>, vector<250x120xbf16>
    %cst_71 = arith.constant dense<0.000000e+00> : vector<8x120xf32>
    %118 = tpu.matmul %116, %117, %cst_71 {dimension_numbers = #tpu.dot_dimension_numbers<[1], [0], [0], [1], [0, 0, 1, 1], [], []>} : vector<8x250xbf16>, vector<250x120xbf16>, vector<8x120xf32> -> vector<8x120xf32>
    %c0_72 = arith.constant 0 : index
    %c0_73 = arith.constant 0 : index
    %119 = vector.load %arg15[%c0_72, %c0_73] : memref<1x120xf32, #tpu.memory_space<vmem>>, vector<1x120xf32>
    %120 = vector.broadcast %119 : vector<1x120xf32> to vector<8x120xf32>
    %121 = arith.addf %118, %120 : vector<8x120xf32>
    %cst_74 = arith.constant 0.000000e+00 : f32
    %122 = vector.broadcast %cst_74 : f32 to vector<8x120xf32>
    %123 = arith.maximumf %121, %122 : vector<8x120xf32>
    %124 = arith.truncf %123 : vector<8x120xf32> to vector<8x120xbf16>
    %c0_75 = arith.constant 0 : index
    %c0_76 = arith.constant 0 : index
    %125 = vector.load %arg16[%c0_75, %c0_76] : memref<120x128xbf16, #tpu.memory_space<vmem>>, vector<120x128xbf16>
    %cst_77 = arith.constant dense<0.000000e+00> : vector<8x128xf32>
    %126 = tpu.matmul %124, %125, %cst_77 {dimension_numbers = #tpu.dot_dimension_numbers<[1], [0], [0], [1], [0, 0, 1, 1], [], []>} : vector<8x120xbf16>, vector<120x128xbf16>, vector<8x128xf32> -> vector<8x128xf32>
    %c0_78 = arith.constant 0 : index
    %c0_79 = arith.constant 0 : index
    %127 = vector.load %arg17[%c0_78, %c0_79] : memref<1x128xf32, #tpu.memory_space<vmem>>, vector<1x128xf32>
    %128 = vector.broadcast %127 : vector<1x128xf32> to vector<8x128xf32>
    %129 = arith.addf %126, %128 : vector<8x128xf32>
    %c0_80 = arith.constant 0 : index
    %c0_81 = arith.constant 0 : index
    %130 = vector.load %arg18[%c0_80, %c0_81] : memref<8x128xf32, #tpu.memory_space<vmem>>, vector<8x128xf32>
    tpu.vector_store %arg18[%c0_80, %c0_81], %129 {strides = array<i32>} : memref<8x128xf32, #tpu.memory_space<vmem>>, vector<8x128xf32>,
    return
  }
  func.func @transform_0(%arg0: i32) -> (i32, i32) {
    %c0_i32 = arith.constant 0 : i32
    %c0_i32_0 = arith.constant 0 : i32
    return %arg0, %c0_i32 : i32, i32
  }
  func.func @transform_1(%arg0: i32) -> (i32, i32, i32) {
    %c0_i32 = arith.constant 0 : i32
    %c0_i32_0 = arith.constant 0 : i32
    %c0_i32_1 = arith.constant 0 : i32
    %c0_i32_2 = arith.constant 0 : i32
    return %c0_i32, %c0_i32_0, %c0_i32_1 : i32, i32, i32
  }
  func.func @transform_2(%arg0: i32) -> (i32, i32) {
    %c0_i32 = arith.constant 0 : i32
    %c0_i32_0 = arith.constant 0 : i32
    %c0_i32_1 = arith.constant 0 : i32
    return %c0_i32, %c0_i32_0 : i32, i32
  }
  func.func @transform_3(%arg0: i32) -> (i32, i32, i32) {
    %c0_i32 = arith.constant 0 : i32
    %c0_i32_0 = arith.constant 0 : i32
    %c0_i32_1 = arith.constant 0 : i32
    %c0_i32_2 = arith.constant 0 : i32
    return %c0_i32, %c0_i32_0, %c0_i32_1 : i32, i32, i32
  }
  func.func @transform_4(%arg0: i32) -> (i32, i32) {
    %c0_i32 = arith.constant 0 : i32
    %c0_i32_0 = arith.constant 0 : i32
    %c0_i32_1 = arith.constant 0 : i32
    return %c0_i32, %c0_i32_0 : i32, i32
  }
  func.func @transform_5(%arg0: i32) -> (i32, i32) {
    %c0_i32 = arith.constant 0 : i32
    %c0_i32_0 = arith.constant 0 : i32
    %c0_i32_1 = arith.constant 0 : i32
    return %c0_i32, %c0_i32_0 : i32, i32
  }
  func.func @transform_6(%arg0: i32) -> (i32, i32) {
    %c0_i32 = arith.constant 0 : i32
    %c0_i32_0 = arith.constant 0 : i32
    %c0_i32_1 = arith.constant 0 : i32
    return %c0_i32, %c0_i32_0 : i32, i32
  }
  func.func @transform_7(%arg0: i32) -> (i32, i32, i32) {
    %c0_i32 = arith.constant 0 : i32
    %c0_i32_0 = arith.constant 0 : i32
    %c0_i32_1 = arith.constant 0 : i32
    %c0_i32_2 = arith.constant 0 : i32
    return %c0_i32, %c0_i32_0, %c0_i32_1 : i32, i32, i32
  }
  func.func @transform_8(%arg0: i32) -> (i32, i32) {
    %c0_i32 = arith.constant 0 : i32
    %c0_i32_0 = arith.constant 0 : i32
    %c0_i32_1 = arith.constant 0 : i32
    return %c0_i32, %c0_i32_0 : i32, i32
  }
  func.func @transform_9(%arg0: i32) -> (i32, i32) {
    %c0_i32 = arith.constant 0 : i32
    %c0_i32_0 = arith.constant 0 : i32
    %c0_i32_1 = arith.constant 0 : i32
    return %c0_i32, %c0_i32_0 : i32, i32
  }
  func.func @transform_10(%arg0: i32) -> (i32, i32) {
    %c0_i32 = arith.constant 0 : i32
    %c0_i32_0 = arith.constant 0 : i32
    %c0_i32_1 = arith.constant 0 : i32
    return %c0_i32, %c0_i32_0 : i32, i32
  }
  func.func @transform_11(%arg0: i32) -> (i32, i32) {
    %c0_i32 = arith.constant 0 : i32
    %c0_i32_0 = arith.constant 0 : i32
    %c0_i32_1 = arith.constant 0 : i32
    return %c0_i32, %c0_i32_0 : i32, i32
  }
  func.func @transform_12(%arg0: i32) -> (i32, i32) {
    %c0_i32 = arith.constant 0 : i32
    %c0_i32_0 = arith.constant 0 : i32
    %c0_i32_1 = arith.constant 0 : i32
    return %c0_i32, %c0_i32_0 : i32, i32
  }
  func.func @transform_13(%arg0: i32) -> (i32, i32) {
    %c0_i32 = arith.constant 0 : i32
    %c0_i32_0 = arith.constant 0 : i32
    %c0_i32_1 = arith.constant 0 : i32
    return %c0_i32, %c0_i32_0 : i32, i32
  }
  func.func @transform_14(%arg0: i32) -> (i32, i32) {
    %c0_i32 = arith.constant 0 : i32
    %c0_i32_0 = arith.constant 0 : i32
    %c0_i32_1 = arith.constant 0 : i32
    return %c0_i32, %c0_i32_0 : i32, i32
  }
  func.func @transform_15(%arg0: i32) -> (i32, i32) {
    %c0_i32 = arith.constant 0 : i32
    %c0_i32_0 = arith.constant 0 : i32
    %c0_i32_1 = arith.constant 0 : i32
    return %c0_i32, %c0_i32_0 : i32, i32
  }
  func.func @transform_16(%arg0: i32) -> (i32, i32) {
    %c0_i32 = arith.constant 0 : i32
    %c0_i32_0 = arith.constant 0 : i32
    %c0_i32_1 = arith.constant 0 : i32
    return %c0_i32, %c0_i32_0 : i32, i32
  }
  func.func @transform_17(%arg0: i32) -> (i32, i32) {
    %c0_i32 = arith.constant 0 : i32
    %c0_i32_0 = arith.constant 0 : i32
    return %arg0, %c0_i32 : i32, i32
  }
}

</mosaic_0001>

<bundles_post_ra>
// kernel: net_forward.1
= control target key start
LH: loop header
LB: loop body
LE: loop exit
PB: predicated region body
PF: predicated region fallthrough
CT: control target
= control target key end

     0   :  { %s10308_s0 = inlined_call_operand.vmem [shape: f32[448,28], index: 0, kind: input, shape index: {}]   ;;  %s10309_s1 = inlined_call_operand.vmem [shape: bf16[3,28,156], index: 1, kind: input, shape index: {}]   ;;  %s10310_s2 = inlined_call_operand.hbm [shape: f32[1,156], index: 2, kind: input, shape index: {}]   ;;  %s10311_s3 = inlined_call_operand.vmem [shape: bf16[3,156,144], index: 3, kind: input, shape index: {}]   ;;  %s10312_s4 = inlined_call_operand.hbm [shape: f32[1,144], index: 4, kind: input, shape index: {}]   ;;  %s10313_s5 = inlined_call_operand.hbm [shape: bf16[96,219], index: 5, kind: input, shape index: {}]   ;;  %s10314_s6 = inlined_call_operand.hbm [shape: bf16[138,72], index: 6, kind: input, shape index: {}]   ;;  %s10315_s7 = inlined_call_operand.vmem [shape: bf16[3,72,160], index: 7, kind: input, shape index: {}]   ;;  %s10316_s8 = inlined_call_operand.hbm [shape: f32[1,160], index: 8, kind: input, shape index: {}]   ;;  %s10317_s9 = inlined_call_operand.vmem [shape: bf16[40,93], index: 9, kind: input, shape index: {}]   ;;  %s10318_s10 = inlined_call_operand.hbm [shape: bf16[144,80], index: 10, kind: input, shape index: {}]   ;;  %s10319_s11 = inlined_call_operand.vmem [shape: bf16[400,250], index: 11, kind: input, shape index: {}]   ;;  %s10320_s12 = inlined_call_operand.vmem [shape: f32[1,250], index: 12, kind: input, shape index: {}]   ;;  %s10321_s13 = inlined_call_operand.vmem [shape: bf16[250,120], index: 13, kind: input, shape index: {}]   ;;  %s10322_s14 = inlined_call_operand.vmem [shape: f32[1,120], index: 14, kind: input, shape index: {}]   ;;  %s10323_s15 = inlined_call_operand.hbm [shape: bf16[120,128], index: 15, kind: input, shape index: {}]   ;;  %s10324_s16 = inlined_call_operand.vmem [shape: f32[1,128], index: 16, kind: input, shape index: {}]   ;;  %s10325_s17 = inlined_call_operand.hbm [shape: f32[16,128], index: 17, kind: output, shape index: {}]  }
   0x1   :  { %10350 = sst [smem:[#allocation70_spill]] %s10308_s0 }
   0x2   :  { %10351 = sst [smem:[#allocation71_spill]] %s10309_s1 }
   0x3   :  { %10352 = sst [smem:[#allocation72_spill]] %s10312_s4 }
   0x4   :  { %10353 = sst [smem:[#allocation73_spill]] %s10314_s6 }
   0x5   :  { %22 = vsyncpa [#allocation3], 0 }
   0x6   :  { %23 = vsyncpa [#allocation6], 0 }
   0x7   :  { %24 = vsyncpa [#allocation9], 0 }
   0x8   :  { %25 = vsyncpa [#allocation12], 0 }
   0x9   :  { %26 = vsyncpa [#allocation4], 0 }
   0xa   :  { %28 = vsyncpa [#allocation4 + $0x1], 0  ;;  %s7534_s24 = smov 0   ;;  %s7536_s25 = smov 0  }
   0xb   :  { %s7538_s26 = smov 0   ;;  %s7540_s27 = smov 0  }
   0xc LB: > { %10354 = sst [smem:[#allocation20_spill]] %s7412_s24  ;;  %s7555_s28 = sadd.s32 4294967295, %s7424_s27   ;;  %s7424_s27 = sphi %s7540_s27, %s10560_s27   ;;  %s7420_s26 = sphi %s7538_s26, %s10562_s26   ;;  %s7416_s25 = sphi %s7536_s25, %s10564_s25   ;;  %s7412_s24 = sphi %s7534_s24, %s10563_s24  }
   0xd   : > { %10355 = sst [smem:[#allocation21_spill]] %s7420_s26  ;;  %s6184_s29 = sadd.s32 4294967294, %s7424_s27  }
   0xe   : > { %10356 = sst [smem:[#allocation22_spill]] %s7424_s27  ;;  %s7559_s0 = sadd.s32 1, %s7424_s27  }
   0xf   : > { %10357 = sst [smem:[#allocation23_spill]] %s7559_s0  ;;  %s403_s30 = sadd.s32 1, %s7420_s26 }
  0x10   : > { %s400_s18 = ssub.s32 %s7424_s27, %s7559_s0  ;;  %p413_p0 = scmp.ne.s32.totalorder %s7420_s26, %s7416_s25 }
  0x11   : > { %p401_p1 = scmp.eq.s32.totalorder %s400_s18, 0  ;;  %p414_p2 = scmp.eq.s32.totalorder %s7555_s28, 1 }
  0x12   : > { %p419_p3 = scmp.ne.s32.totalorder %s7416_s25, %s7412_s24  ;;  %p420_p4 = scmp.eq.s32.totalorder %s6184_s29, 1 }
  0x13   : > { %s7570_s19 = scalar_select %p401_p1, %s7420_s26, %s403_s30  }
  0x14   : > { %p7572_p5 = por %p414_p2, %p413_p0  ;;  %p7576_p6 = por %p420_p4, %p419_p3 }
  0x15   : > { %10358 = sst [smem:[#allocation24_spill]] %s7570_s19  ;;  %p6185_p7 = scmp.ge.s32.totalorder %s7424_s27, 1 }
  0x16   : > { %s10359_s1 = scalar_select %p7572_p5, 1, 0 }
  0x17   : > { %s10360_s20 = scalar_select %p7576_p6, 1, 0 }
  0x18   : > { %p427_p8 = scmp.lt.s32.totalorder %s7424_s27, 3  ;;  %p10331_p9 = scmp.eq.s32.totalorder %s7555_s28, 0 }
  0x19   : > { %10361 = sst [smem:[#allocation25_spill]] %s10360_s20  ;;  %s7426_s22 = smov [#allocation5]  }
  0x1a   : > { %p7583_p10 = pnand %p6185_p7, %p427_p8  ;;  %s457_s23 = sshll.u32 %s7426_s22, 4  ;;  %s458_s23 = int_to_ptr.vmem [resolvable:$true] %s457_s23 }
  0x1b   : > { %s7427_s29 = smov [#allocation8]   ;;  %s7428_s19 = smov [#allocation11]  }
  0x1c   : > { %s10362_s21 = scalar_select %p7583_p10, 1, 0 }
  0x1d   : > { %p6703_p11 = pneg %p7583_p10  ;;  %s480_s30 = sshll.u32 %s7427_s29, 4  ;;  %s481_s30 = int_to_ptr.vmem [resolvable:$true] %s480_s30 }
  0x1e   : > { %s510_s26 = sshll.u32 %s7428_s19, 4  ;;  %s7177_s22 = scalar_lea.vmem %s458_s23, 32  ;;  %s511_s26 = int_to_ptr.vmem [resolvable:$true] %s510_s26 }
  0x1f   : > { %p7591_p12 = pnand %p10331_p9, %p6703_p11  ;;  %p7178_p0 = scmp.ne.s32.totalorder %s458_s23, %s7177_s22 }
  0x20   : > { %p7185_p3 = scmp.lt.s32.totalorder %s458_s23, %s458_s23  ;;  %p7186_p4 = scmp.lt.s32.totalorder %s7177_s22, %s7177_s22 }
  0x21   : > { %p7597_p13 = pneg %p7591_p12 }
  0x22   : > { %p7187_p7 = por %p7186_p4, %p7185_p3 }
  0x23   : > { %p7180_p1 = pnand %p7178_p0, %p7597_p13 }
  0x25   : > { %p7181_p2 = pneg %p7180_p1 }
  0x27   : > { %p7188_p8 = pnand %p7187_p7, %p7181_p2 }
  0x29   : > { %7191 = shalt.err (!%p7188_p8)
}
  0x2a   : > { %s10365_s4 = sld [smem:[#allocation72_spill]]  ;;  %s7203_s20 = scalar_lea.vmem %s481_s30, 1152 }
  0x2b   : > { %p7204_p11 = scmp.ne.s32.totalorder %s481_s30, %s7203_s20  ;;  %p7211_p5 = scmp.lt.s32.totalorder %s481_s30, %s481_s30 }
  0x2c   : > { %p7212_p0 = scmp.lt.s32.totalorder %s7203_s20, %s7203_s20 }
  0x2d   : > { %p7206_p9 = pnand %p7204_p11, %p7597_p13 }
  0x2e   : > { %p7213_p1 = por %p7212_p0, %p7211_p5 }
  0x2f   : > { %p7207_p6 = pneg %p7206_p9 }
  0x30   : > { %6709 = dma.hbm_to_vmem [thread:$0]  (!%p7591_p12), %s10365_s4, 32, %s458_s23, [#allocation6]  }
  0x31   : > { %p7214_p10 = pnand %p7213_p1, %p7207_p6 }
  0x33   : > { %7217 = shalt.err (!%p7214_p10)
}
  0x34   : > { %s10336_s22 = smov 64   ;;  %s10337_s24 = smov 4  }
  0x35   : > { %s10366_s6 = sld [smem:[#allocation73_spill]]  ;;  %s7229_s19 = scalar_lea.vmem %s511_s26, 1152 }
  0x36   : > { %p7230_p9 = scmp.ne.s32.totalorder %s511_s26, %s7229_s19  ;;  %p7237_p6 = scmp.lt.s32.totalorder %s511_s26, %s511_s26 }
  0x37   : > { %p7238_p10 = scmp.lt.s32.totalorder %s7229_s19, %s7229_s19 }
  0x38   : > { %p7232_p2 = pnand %p7230_p9, %p7597_p13 }
  0x39   : > { %p7239_p3 = por %p7238_p10, %p7237_p6 }
  0x3a   : > { %p7233_p5 = pneg %p7232_p2 }
  0x3b   : > { %6715 = dma.hbm_to_vmem [thread:$0]  (!%p7591_p12), %s10366_s6, 1152, %s481_s30, [#allocation9], %s10336_s22, %s10336_s22, %s10337_s24  }
  0x3c   : > { %p7240_p4 = pnand %p7239_p3, %p7233_p5 }
  0x3e   : > { %7243 = shalt.err (!%p7240_p4)
}
  0x3f   : > { %6721 = dma.hbm_to_vmem [thread:$0]  (!%p7591_p12), %s10318_s10, 1152, %s511_s26, [#allocation12], %s10336_s22, %s10336_s22, %s10337_s24  }
  0x40   : > { %s7431_s30 = smov [#allocation2]   ;;  %s7432_s23 = smov [#allocation7]  }
  0x41   : > { %s443_s29 = sshll.u32 %s7431_s30, 4  ;;  %s467_s6 = sshll.u32 %s7432_s23, 4  ;;  %s444_s29 = int_to_ptr.vmem [resolvable:$true] %s443_s29  ;;  %s468_s6 = int_to_ptr.vmem [resolvable:$true] %s467_s6 }
  0x42   : > { %s7255_s27 = scalar_lea.vmem %s444_s29, 32  ;;  %p7263_p0 = scmp.lt.s32.totalorder %s444_s29, %s444_s29 }
  0x43   : > { %p7256_p7 = scmp.ne.s32.totalorder %s444_s29, %s7255_s27  ;;  %p7264_p1 = scmp.lt.s32.totalorder %s7255_s27, %s7255_s27 }
  0x45   : > { %p7258_p8 = pnand %p7256_p7, %p7597_p13  ;;  %p7265_p9 = por %p7264_p1, %p7263_p0 }
  0x47   : > { %p7259_p11 = pneg %p7258_p8 }
  0x49   : > { %p7266_p2 = pnand %p7265_p9, %p7259_p11 }
  0x4b   : > { %7269 = shalt.err (!%p7266_p2)
}
  0x4c   : > { %6706 = dma.hbm_to_vmem [thread:$0]  (!%p7591_p12), %s10310_s2, 32, %s444_s29, [#allocation3]  }
  0x4d   : > { %s7281_s26 = scalar_lea.vmem %s468_s6, 1536  ;;  %p7289_p3 = scmp.lt.s32.totalorder %s468_s6, %s468_s6 }
  0x4e   : > { %p7282_p5 = scmp.ne.s32.totalorder %s468_s6, %s7281_s26  ;;  %p7290_p4 = scmp.lt.s32.totalorder %s7281_s26, %s7281_s26 }
  0x50   : > { %p7284_p6 = pnand %p7282_p5, %p7597_p13  ;;  %p7291_p7 = por %p7290_p4, %p7289_p3 }
  0x52   : > { %p7285_p10 = pneg %p7284_p6 }
  0x54   : > { %p7292_p8 = pnand %p7291_p7, %p7285_p10 }
  0x56   : > { %7295 = shalt.err (!%p7292_p8)
}
  0x57   : > { %s7433_s27 = smov 128   ;;  %s7434_s20 = smov 8  }
  0x58   : > { %6712 = dma.hbm_to_vmem [thread:$0]  (!%p7591_p12), %s10313_s5, 1536, %s468_s6, [#allocation6], %s7433_s27, %s7433_s27, %s7434_s20  }
  0x59   : > { %s7435_s29 = smov [#allocation10]   ;;  %s7436_s19 = smov [#allocation13]  }
  0x5a   : > { %s497_s4 = sshll.u32 %s7435_s29, 4  ;;  %s535_s22 = sshll.u32 %s7436_s19, 4  ;;  %s498_s4 = int_to_ptr.vmem [resolvable:$true] %s497_s4  ;;  %s536_s22 = int_to_ptr.vmem [resolvable:$true] %s535_s22 }
  0x5b   : > { %s7307_s24 = scalar_lea.vmem %s498_s4, 32  ;;  %p7315_p9 = scmp.lt.s32.totalorder %s498_s4, %s498_s4 }
  0x5c   : > { %p7308_p11 = scmp.ne.s32.totalorder %s498_s4, %s7307_s24  ;;  %p7316_p2 = scmp.lt.s32.totalorder %s7307_s24, %s7307_s24 }
  0x5e   : > { %p7310_p0 = pnand %p7308_p11, %p7597_p13  ;;  %p7317_p5 = por %p7316_p2, %p7315_p9 }
  0x60   : > { %p7311_p1 = pneg %p7310_p0 }
  0x62   : > { %p7318_p6 = pnand %p7317_p5, %p7311_p1 }
  0x64   : > { %7321 = shalt.err (!%p7318_p6)
}
  0x65   : > { %6718 = dma.hbm_to_vmem [thread:$0]  (!%p7591_p12), %s10316_s8, 32, %s498_s4, [#allocation9]  }
  0x66   : > { %s7333_s6 = scalar_lea.vmem %s536_s22, 960  ;;  %p7341_p7 = scmp.lt.s32.totalorder %s536_s22, %s536_s22 }
  0x67   : > { %p7334_p10 = scmp.ne.s32.totalorder %s536_s22, %s7333_s6  ;;  %p7342_p8 = scmp.lt.s32.totalorder %s7333_s6, %s7333_s6 }
  0x69   : > { %p7336_p3 = pnand %p7334_p10, %p7597_p13  ;;  %p7343_p11 = por %p7342_p8, %p7341_p7 }
  0x6b   : > { %p7337_p4 = pneg %p7336_p3 }
  0x6d   : > { %p7344_p0 = pnand %p7343_p11, %p7337_p4 }
  0x6f   : > { %7347 = shalt.err (!%p7344_p0)
}
  0x70   : > { %s10367_s24 = smov 4   ;;  %s10368_s27 = smov 64  }
  0x71   : > { %6724 = dma.hbm_to_vmem [thread:$0]  (!%p7591_p12), %s10323_s15, 960, %s536_s22, [#allocation12], %s10368_s27, %s10368_s27, %s10367_s24  }
  0x72   : > { %p10369_p1 = scmp.ne.s32.totalorder %s10362_s21, 0 }
  0x74   : > { %563 = sbr.rel (%p10369_p1) target bundleno = 2980 (0xba4), region = 88 }
  0x79   : > { %p10370_p13 = scmp.eq.s32.totalorder %s7555_s28, 0 }
  0x7b   : > { %7391 = dma.done.wait (%p10370_p13), [#allocation3], 32   ;;  %p10371_p9 = pmov %p10370_p13 }
  0x7d   : > { %7393 = vsyncadd (%p10371_p9), [#allocation3], 4294967264  ;;  %p10372_p2 = pmov %p10371_p9 }
  0x7f   : > { %7395 = dma.done.wait (%p10372_p2), [#allocation6], 1568   ;;  %p10373_p5 = pmov %p10372_p2 }
  0x80   : > { %p10374_p6 = pmov %p10372_p2 }
  0x81   : > { %7397 = vsyncadd (%p10373_p5), [#allocation6], 4294965728 }
  0x82   : > { %7399 = dma.done.wait (%p10374_p6), [#allocation9], 1184   ;;  %p10375_p12 = pmov %p10372_p2 }
  0x83   : > { %p10376_p10 = pmov %p10372_p2 }
  0x84   : > { %7401 = vsyncadd (%p10375_p12), [#allocation9], 4294966112 }
  0x85   : > { %7403 = dma.done.wait (%p10376_p10), [#allocation12], 2112   ;;  %p10377_p3 = pmov %p10372_p2 }
  0x86   : > { %s639_s0 = smul.u32 28, %s7555_s28  ;;  %v10338_v0 = vmov 0   ;;  %vm870_vm0 = vcmask 1045504   ;;  %s10378_s29 = sld [smem:[#allocation71_spill]]  ;;  %vm827_vm1 = vcmask 228352   ;;  %vm1294_vm3 = vcmask 1046528  }
  0x87   : > { %7405 = vsyncadd (%p10377_p3), [#allocation12], 4294965184  ;;  %909 = vmatprep.mubr.bf16.mxu0 %v10338_v0  ;;  %1134 = vmatprep.mubr.bf16.mxu1 %v10338_v0  ;;  %s10379_s23 = sld [smem:[#allocation70_spill]]  ;;  %vm697_vm2 = vsmask.f32 7424  ;;  %vm3659_vm4 = vcmask 744448  }
  0x88   : > { %p640_p4 = scmp.lt.s32.totalorder %s639_s0, 55  ;;  %vm3678_vm5 = vcmask 1044480   ;;  %s7439_s30 = smov 122   ;;  %vm4235_vm6 = vcmask 1043456   ;;  %vm3852_vm7 = vcmask 998400   ;;  %vm3996_vm8 = vcmask 80896  }
  0x89   : > { %vm4216_vm9 = vcmask 588800   ;;  %vm4912_vm10 = vcmask 760832   ;;  %s7440_s19 = smov 112   ;;  %vm5021_vm11 = vcmask 916480   ;;  %vm5125_vm12 = vcmask 130048   ;;  %s636_s27 = sand.u32 1, %s7416_s25  }
  0x8a   : > { %s10566_s0 = smov (!%p640_p4, %s639_s0), 55  ;;  %vm5255_vm13 = vcmask 654336   ;;  %vm7442_vm14 = vmmov 0   ;;  %vm5994_vm15 = vcmask 982016   ;;  %s6202_s20 = sshll.u32 %s636_s27, 3 }
  0x8b   : > { %s6203_s21 = sshll.u32 %s10566_s0, 3  ;;  %s6618_s22 = sshll.u32 %s7555_s28, 7 }
  0x8c   : > { %v6878_v1 = vld [vmem:[%s10378_s29 + $0x34] ss:$8 sps:$4 sm:$0x3f]   ;;  %v6882_v3 = vld [vmem:[%s10378_s29 + $0x30] ss:$8 sps:$4 sm:$0x3f]   ;;  %s10267_s26 = scalar_lea.hbm %s10325_s17, %s6618_s22 }
  0x8d   : > { %v6880_v2 = vld [vmem:[%s10378_s29 + $0x14] ss:$8 sps:$4 sm:$0x3f]   ;;  %6212 = vmatprep.subr.msk.bf16.mxu0 %vm870_vm0, %v6878_v1  ;;  %v6883_v4 = vld [vmem:[%s10378_s29 + $0x10] ss:$8 sps:$4 sm:$0x3f]   ;;  %s7696_s0 = scalar_lea.vmem %s10379_s23, %s6203_s21 }
  0x8e   : > { %6231 = vmatprep.subr.msk.bf16.mxu1 %vm870_vm0, %v6880_v2  ;;  %v6884_v5 = vld [vmem:[%s10378_s29 + $0x24] ss:$8 sps:$4 sm:$0xff]   ;;  %v872_v6 = vsel %vm870_vm0, %v6882_v3, 0  ;;  %v1097_v7 = vsel %vm870_vm0, %v6883_v4, 0  ;;  %v6888_v9 = vld [vmem:[%s10378_s29 + $0x20] ss:$8 sps:$4 sm:$0xff]  }
  0x8f   : > { %v6886_v8 = vld [vmem:[%s10378_s29 + $0x4] ss:$8 sps:$4 sm:$0xff]   ;;  %890 = vmatpush1.bf16.msra.mxu0 %v872_v6  ;;  %1115 = vmatpush1.bf16.msra.mxu1 %v1097_v7  ;;  %v6889_v10 = vld [vmem:[%s10378_s29] ss:$8 sps:$4 sm:$0xff]   ;;  %v648_v13 = vld [vmem:[%s7696_s0 + $0x10] sm:$0xff]  ;;  %s638_s4 = scalar_lea.vmem [#allocation14], %s6202_s20 }
  0x90   : > { %v646_v11 = vld [vmem:[%s7696_s0] sm:$0xff]  ;;  %891 = vmatprep.subr.bf16.mxu0 %v6884_v5  ;;  %1116 = vmatprep.subr.bf16.mxu1 %v6886_v8  ;;  %v647_v12 = vld [vmem:[%s7696_s0 + $0x8] sm:$0xff]  ;;  %v649_v14 = vld [vmem:[%s7696_s0 + $0x18] sm:$0xff]  ;;  %p10555_p8 = scmp.ne.s32.totalorder %s10359_s1, 0  ;;  %s7443_s28 = smov [#allocation14]  }
  0x91   : > { %v7717_v15 = vpack.c.bf16 %v647_v12, %v646_v11  ;;  %v7719_v16 = vpack.c.bf16 %v649_v14, %v648_v13  ;;  %v650_v17 = vld [vmem:[%s7696_s0 + $0x20] sm:$0xff]  ;;  %v651_v18 = vld [vmem:[%s7696_s0 + $0x28] sm:$0xff]  ;;  %v6890_v28 = vld [vmem:[%s10378_s29 + $0x54] ss:$8 sps:$4 sm:$0x3f]   ;;  %s7352_s24 = sshll.u32 %s7443_s28, 4  ;;  %s7353_s24 = int_to_ptr.vmem [resolvable:$false] %s7352_s24 }
  0x92   : > { %v676_v22 = vpack.c.bf16 %v651_v18, %v650_v17  ;;  %v652_v29 = vld [vmem:[%s7696_s0 + $0x30] sm:$0xff]  ;;  %v653_v30 = vld [vmem:[%s7696_s0 + $0x38] sm:$0xff]  ;;  %v6893_v37 = vld [vmem:[%s10378_s29 + $0x40] ss:$8 sps:$4 sm:$0xff]   ;;  %s7354_s20 = scalar_lea.vmem %s7353_s24, 256 }
  0x93   : > { %892 = vmatpush1.bf16.msra.mxu0 %v6888_v9  ;;  %1117 = vmatpush1.bf16.msra.mxu1 %v6889_v10  ;;  %v699_v19 = vshrl.u32 %v7717_v15, 16  ;;  %v701_v20 = vshll.u32 %v7717_v15, 16  ;;  %v706_v21 = vshll.u32 %v7719_v16, 16  ;;  %v710_v26 = vshrl.u32 %v7719_v16, 16  ;;  %v6895_v38 = vld [vmem:[%s10378_s29 + $0x44] ss:$8 sps:$4 sm:$0xff]  }
  0x94   : > { %v714_v27 = vshll.u32 %v676_v22, 16  ;;  %v6892_v31 = vld [vmem:[%s10378_s29 + $0x50] ss:$8 sps:$4 sm:$0x3f]   ;;  %6254 = vmatprep.subr.msk.bf16.mxu0 %vm870_vm0, %v6890_v28  ;;  %v677_v36 = vpack.c.bf16 %v653_v30, %v652_v29  ;;  %v654_v39 = vld [vmem:[%s7696_s0 + $0x40] sm:$0xff]  ;;  %v718_v41 = vshrl.u32 %v676_v22, 16 }
  0x95   : > { %v703_v23 = vrot.slane %v701_v20, 1  ;;  %v708_v24 = vrot.slane %v706_v21, 1  ;;  %v1383_v33 = vsel %vm870_vm0, %v6892_v31, 0  ;;  %v655_v43 = vld [vmem:[%s7696_s0 + $0x48] sm:$0xff]  ;;  %v656_v44 = vld [vmem:[%s7696_s0 + $0x50] sm:$0xff]  ;;  %v657_v45 = vld [vmem:[%s7696_s0 + $0x58] sm:$0xff] }
  0x96   : > { %6232 = vmatmul.mubr.msk.bf16.vlgmr.msra.gmra.mxu1 %vm827_vm1, %v7717_v15  ;;  %v716_v35 = vrot.slane %v714_v27, 1  ;;  %v722_v42 = vshll.u32 %v677_v36, 16  ;;  %v678_v48 = vpack.c.bf16 %v655_v43, %v654_v39  ;;  %v658_v49 = vld [vmem:[%s7696_s0 + $0x60] sm:$0xff]  ;;  %v659_v50 = vld [vmem:[%s7696_s0 + $0x68] sm:$0xff]  ;;  %v726_v51 = vshrl.u32 %v677_v36, 16  ;;  %v660_v7 = vld [vmem:[%s7696_s0 + $0x70] sm:$0xff] }
  0x97   : > { %v704_v25 = vor.u32 %v703_v23, %v699_v19  ;;  %1144 = vmatprep.mubr.bf16.mxu1 %v10338_v0  ;;  %v712_v34 = vor.u32 %v710_v26, %v708_v24  ;;  %v1295_v52 = vrot.slane %v7717_v15, 1  ;;  %v679_v53 = vpack.c.bf16 %v657_v45, %v656_v44  ;;  %v661_v8 = vld [vmem:[%s7696_s0 + $0x78] sm:$0xff]  ;;  %v662_v18 = vld [vmem:[%s7696_s0 + $0x80] sm:$0xff]  ;;  %v663_v19 = vld [vmem:[%s7696_s0 + $0x88] sm:$0xff] }
  0x98   : > { %v720_v46 = vor.u32 %v718_v41, %v716_v35  ;;  %v724_v47 = vrot.slane %v722_v42, 1  ;;  %v1296_v54 = vrot.slane %v7719_v16, 1  ;;  %v1298_v55 = vrot.slane %v676_v22, 1  ;;  %v664_v27 = vld [vmem:[%s7696_s0 + $0x90] sm:$0xff]  ;;  %v665_v28 = vld [vmem:[%s7696_s0 + $0x98] sm:$0xff]  ;;  %v666_v43 = vld [vmem:[%s7696_s0 + $0xa0] sm:$0xff] }
  0x99   : > { %v709_v32 = vsel %vm697_vm2, %v704_v25, %v708_v24  ;;  %v717_v40 = vsel %vm697_vm2, %v712_v34, %v716_v35  ;;  %v730_v57 = vshll.u32 %v678_v48, 16  ;;  %v1300_v58 = vrot.slane %v677_v36, 1  ;;  %v667_v44 = vld [vmem:[%s7696_s0 + $0xa8] sm:$0xff] }
  0x9a   : > { %6213 = vmatmul.mubr.msk.bf16.vlgmr.msra.gmra.mxu0 %vm827_vm1, %v709_v32  ;;  %v725_v56 = vsel %vm697_vm2, %v720_v46, %v724_v47  ;;  %v1302_v59 = vrot.slane %v678_v48, 1  ;;  %v7767_v60 = vsel %vm1294_vm3, %v1295_v52, %v1296_v54  ;;  %v7770_v61 = vsel %vm1294_vm3, %v1296_v54, %v1298_v55  ;;  %v671_v54 = vld [vmem:[%s7696_s0 + $0xc8] sm:$0xff] }
  0x9b   : > { %919 = vmatprep.mubr.bf16.mxu0 %v10338_v0  ;;  %1401 = vmatpush1.bf16.msra.mxu0 %v1383_v33  ;;  %v1304_v62 = vrot.slane %v679_v53, 1  ;;  %v680_v63 = vpack.c.bf16 %v659_v50, %v658_v49  ;;  %v7773_v1 = vsel %vm1294_vm3, %v1298_v55, %v1300_v58  ;;  %v728_v4 = vor.u32 %v726_v51, %v724_v47  ;;  %v669_v49 = vld [vmem:[%s7696_s0 + $0xb8] sm:$0xff] }
  0x9c   : > { %1402 = vmatprep.subr.bf16.mxu0 %v6895_v38  ;;  %v7776_v2 = vsel %vm1294_vm3, %v1300_v58, %v1302_v59  ;;  %v732_v5 = vrot.slane %v730_v57, 1  ;;  %v734_v11 = vshrl.u32 %v678_v48, 16  ;;  %v738_v12 = vshll.u32 %v679_v53, 16 }
  0x9d   : > { %v7780_v3 = vsel %vm1294_vm3, %v1302_v59, %v1304_v62  ;;  %v1306_v6 = vrot.slane %v680_v63, 1  ;;  %v746_v13 = vshll.u32 %v680_v63, 16  ;;  %v681_v14 = vpack.c.bf16 %v661_v8, %v660_v7 }
  0x9e   : > { %6233 = vmatmul.mubr.msk.bf16.gmra.mxu1 %vm827_vm1, %v7719_v16  ;;  %v733_v10 = vsel %vm697_vm2, %v728_v4, %v732_v5  ;;  %v736_v15 = vor.u32 %v734_v11, %v732_v5  ;;  %v740_v16 = vrot.slane %v738_v12, 1  ;;  %v742_v20 = vshrl.u32 %v679_v53, 16  ;;  %v672_v11 = vld [vmem:[%s7696_s0 + $0xd0] sm:$0xff]  ;;  %v673_v12 = vld [vmem:[%s7696_s0 + $0xd8] sm:$0xff] }
  0x9f   : > { %1154 = vmatprep.mubr.bf16.mxu1 %v10338_v0  ;;  %1403 = vmatpush1.bf16.msra.mxu0 %v6893_v37  ;;  %v7786_v9 = vsel %vm1294_vm3, %v1304_v62, %v1306_v6  ;;  %v1308_v17 = vrot.slane %v681_v14, 1  ;;  %v748_v21 = vrot.slane %v746_v13, 1  ;;  %v682_v24 = vpack.c.bf16 %v663_v19, %v662_v18 }
  0xa0   : > { %v741_v23 = vsel %vm697_vm2, %v736_v15, %v740_v16  ;;  %v744_v25 = vor.u32 %v742_v20, %v740_v16  ;;  %v750_v31 = vshrl.u32 %v680_v63, 16  ;;  %v754_v32 = vshll.u32 %v681_v14, 16 }
  0xa1   : > { %v1310_v26 = vrot.slane %v682_v24, 1  ;;  %v7811_v33 = vpack.c.bf16 %v665_v28, %v664_v27  ;;  %v758_v34 = vshrl.u32 %v681_v14, 16  ;;  %v762_v35 = vshll.u32 %v682_v24, 16  ;;  %v6896_v27 = vld [vmem:[%s10311_s3 + $0x110] ss:$8 sps:$4 sm:$0xff]  }
  0xa2   : > { %6214 = vmatmul.mubr.msk.bf16.gmra.mxu0 %vm827_vm1, %v717_v40  ;;  %v749_v30 = vsel %vm697_vm2, %v744_v25, %v748_v21  ;;  %v756_v37 = vrot.slane %v754_v32, 1  ;;  %v766_v46 = vshrl.u32 %v682_v24, 16  ;;  %v7836_v52 = vpack.c.bf16 %v667_v44, %v666_v43  ;;  %v6907_v28 = vld [vmem:[%s10311_s3 + $0x64] ss:$8 sps:$4 sm:$0xff]   ;;  %v6910_v32 = vld [vmem:[%s10311_s3 + $0xf4] ss:$8 sps:$4 sm:$0xff]  }
  0xa3   : > { %929 = vmatprep.mubr.bf16.mxu0 %v10338_v0  ;;  %v7806_v29 = vsel %vm1294_vm3, %v1308_v17, %v1310_v26  ;;  %v1312_v38 = vrot.slane %v7811_v33, 1  ;;  %v764_v42 = vrot.slane %v762_v35, 1  ;;  %v770_v47 = vshll.u32 %v7811_v33, 16  ;;  %v6916_v35 = vld [vmem:[%s10311_s3 + $0x44] ss:$8 sps:$4 sm:$0xff]  }
  0xa4   : > { %v760_v41 = vor.u32 %v758_v34, %v756_v37  ;;  %v778_v57 = vshll.u32 %v7836_v52, 16  ;;  %v782_v4 = vshrl.u32 %v7836_v52, 16  ;;  %v6911_v34 = vld [vmem:[%s10311_s3 + $0x50] ss:$8 sps:$4 sm:$0xff]   ;;  %v6928_v43 = vld [vmem:[%s10311_s3 + $0x14] ss:$8 sps:$4 sm:$0xff]  }
  0xa5   : > { %v7819_v39 = vsel %vm1294_vm3, %v1310_v26, %v1312_v38  ;;  %v768_v50 = vor.u32 %v766_v46, %v764_v42  ;;  %v772_v51 = vrot.slane %v770_v47, 1  ;;  %v6926_v44 = vld [vmem:[%s10311_s3 + $0x10] ss:$8 sps:$4 sm:$0xff]   ;;  %v6934_v46 = vld [vmem:[%s10311_s3 + $0x4] ss:$8 sps:$4 sm:$0xff]  }
  0xa6   : > { %6234 = vmatmul.mubr.msk.bf16.gmra.mxu1 %vm827_vm1, %v676_v22  ;;  %v7796_v22 = vsel %vm1294_vm3, %v1306_v6, %v1308_v17  ;;  %v765_v45 = vsel %vm697_vm2, %v760_v41, %v764_v42  ;;  %v7869_v17 = vpack.c.bf16 %v673_v12, %v672_v11  ;;  %v6922_v41 = vld [vmem:[%s10311_s3 + $0xe4] ss:$8 sps:$4 sm:$0xff]   ;;  %v6931_v47 = vld [vmem:[%s10311_s3 + $0xd4] ss:$8 sps:$4 sm:$0xff]  }
  0xa7   : > { %1164 = vmatprep.mubr.bf16.mxu1 %v10338_v0  ;;  %v773_v55 = vsel %vm697_vm2, %v768_v50, %v772_v51  ;;  %v6925_v42 = vld [vmem:[%s10311_s3 + $0x24] ss:$8 sps:$4 sm:$0xff]   ;;  %v6935_v50 = vld [vmem:[%s10311_s3 + $0x94] ss:$8 sps:$4 sm:$0x3f]  }
  0xa8   : > { %v802_v20 = vshll.u32 %v7869_v17, 16  ;;  %v806_v25 = vshrl.u32 %v7869_v17, 16  ;;  %v6952_v11 = vld [vmem:[%s10311_s3 + $0x130] ss:$8 sps:$4 sm:$0x3f]  }
  0xaa   : > { %6215 = vmatmul.mubr.msk.bf16.gmra.mxu0 %vm827_vm1, %v725_v56  ;;  %v774_v56 = vshrl.u32 %v7811_v33, 16 }
  0xab   : > { %939 = vmatprep.mubr.bf16.mxu0 %v10338_v0 }
  0xac   : > { %v776_v62 = vor.u32 %v774_v56, %v772_v51  ;;  %v6940_v51 = vld [vmem:[%s10311_s3 + $0x90] ss:$8 sps:$4 sm:$0x3f]   ;;  %v6946_v56 = vld [vmem:[%s10311_s3 + $0xb4] ss:$8 sps:$4 sm:$0xff]  }
  0xae   : > { %6235 = vmatmul.mubr.msk.bf16.gmra.mxu1 %vm827_vm1, %v677_v36  ;;  %v752_v36 = vor.u32 %v750_v31, %v748_v21  ;;  %v6913_v31 = vld [vmem:[%s10311_s3 + $0x54] ss:$8 sps:$4 sm:$0xff]  }
  0xaf   : > { %1174 = vmatprep.mubr.bf16.mxu1 %v10338_v0 }
  0xb0   : > { %v757_v40 = vsel %vm697_vm2, %v752_v36, %v756_v37  ;;  %v6914_v36 = vld [vmem:[%s10311_s3 + $0x40] ss:$8 sps:$4 sm:$0xff]   ;;  %v6917_v37 = vld [vmem:[%s10311_s3 + $0x30] ss:$8 sps:$4 sm:$0xff]  }
  0xb2   : > { %6216 = vmatmul.mubr.msk.bf16.gmra.mxu0 %vm827_vm1, %v733_v10 }
  0xb3   : > { %949 = vmatprep.mubr.bf16.mxu0 %v10338_v0 }
  0xb6   : > { %6236 = vmatmul.mubr.msk.bf16.gmra.mxu1 %vm827_vm1, %v678_v48  ;;  %v668_v48 = vld [vmem:[%s7696_s0 + $0xb0] sm:$0xff] }
  0xb7   : > { %1184 = vmatprep.mubr.bf16.mxu1 %v10338_v0  ;;  %v7845_v58 = vpack.c.bf16 %v669_v49, %v668_v48  ;;  %v6932_v48 = vld [vmem:[%s10311_s3] ss:$8 sps:$4 sm:$0xff]  }
  0xb9   : > { %v786_v5 = vshll.u32 %v7845_v58, 16 }
  0xba   : > { %6217 = vmatmul.mubr.msk.bf16.gmra.mxu0 %vm827_vm1, %v741_v23  ;;  %v804_v23 = vrot.slane %v802_v20, 1  ;;  %v1320_v20 = vrot.slane %v7869_v17, 1 }
  0xbb   : > { %959 = vmatprep.mubr.bf16.mxu0 %v10338_v0  ;;  %v788_v7 = vrot.slane %v786_v5, 1  ;;  %v6947_v5 = vld [vmem:[%s10311_s3 + $0xa0] ss:$8 sps:$4 sm:$0xff]  }
  0xbc   : > { %v808_v26 = vor.u32 %v806_v25, %v804_v23 }
  0xbe   : > { %6237 = vmatmul.mubr.msk.bf16.gmra.mxu1 %vm827_vm1, %v679_v53  ;;  %v670_v53 = vld [vmem:[%s7696_s0 + $0xc0] sm:$0xff]  ;;  %s6056_s0 = sshll.u32 %s638_s4, 4  ;;  %s10269_s0 = int_to_ptr.vmem [resolvable:$true] %s6056_s0 }
  0xbf   : > { %1194 = vmatprep.mubr.bf16.mxu1 %v10338_v0  ;;  %v7848_v59 = vpack.c.bf16 %v671_v54, %v670_v53  ;;  %v1316_v53 = vrot.slane %v7845_v58, 1  ;;  %v6943_v54 = vld [vmem:[%s10311_s3 + $0x84] ss:$8 sps:$4 sm:$0xff]   ;;  %s7348_s6 = scalar_lea.vmem %s10269_s0, 128  ;;  %p7355_p1 = scmp.lt.s32.totalorder %s10269_s0, %s7353_s24 }
  0xc0   : > { %p7349_p7 = scmp.ne.s32.totalorder %s10269_s0, %s7348_s6  ;;  %p7356_p13 = scmp.lt.s32.totalorder %s7354_s20, %s7348_s6 }
  0xc1   : > { %v794_v8 = vshll.u32 %v7848_v59, 16  ;;  %v798_v19 = vshrl.u32 %v7848_v59, 16 }
  0xc2   : > { %6218 = vmatmul.mubr.msk.bf16.gmra.mxu0 %vm827_vm1, %v749_v30  ;;  %v6905_v30 = vld [vmem:[%s10311_s3 + $0x60] ss:$8 sps:$4 sm:$0xff]   ;;  %p7350_p11 = pnand %p7349_p7, %p10555_p8  ;;  %p7357_p9 = por %p7356_p13, %p7355_p1 }
  0xc3   : > { %969 = vmatprep.mubr.bf16.mxu0 %v10338_v0  ;;  %v796_v15 = vrot.slane %v794_v8, 1 }
  0xc4   : > { %p7351_p0 = pneg %p7350_p11 }
  0xc5   : > { %v800_v21 = vor.u32 %v798_v19, %v796_v15  ;;  %v6953_v19 = vld [vmem:[%s10311_s3 + $0x120] ss:$8 sps:$4 sm:$0xff]  }
  0xc6   : > { %6238 = vmatmul.mubr.msk.bf16.gmra.mxu1 %vm827_vm1, %v680_v63  ;;  %v780_v63 = vrot.slane %v778_v57, 1  ;;  %v6944_v57 = vld [vmem:[%s10311_s3 + $0xb0] ss:$8 sps:$4 sm:$0xff]   ;;  %p7358_p2 = pnand %p7357_p9, %p7351_p0 }
  0xc7   : > { %1204 = vmatprep.mubr.bf16.mxu1 %v10338_v0 }
  0xc8   : > { %v781_v6 = vsel %vm697_vm2, %v776_v62, %v780_v63  ;;  %v784_v10 = vor.u32 %v782_v4, %v780_v63  ;;  %v6949_v63 = vld [vmem:[%s10311_s3 + $0xa4] ss:$8 sps:$4 sm:$0xff]  }
  0xca   : > { %6219 = vmatmul.mubr.msk.bf16.gmra.mxu0 %vm827_vm1, %v757_v40  ;;  %v789_v13 = vsel %vm697_vm2, %v784_v10, %v788_v7  ;;  %v6920_v40 = vld [vmem:[%s10311_s3 + $0xe0] ss:$8 sps:$4 sm:$0xff]   ;;  %v6950_v10 = vld [vmem:[%s10311_s3 + $0x134] ss:$8 sps:$4 sm:$0x3f]  }
  0xcb   : > { %979 = vmatprep.mubr.bf16.mxu0 %v10338_v0 }
  0xce   : > { %6239 = vmatmul.mubr.msk.bf16.gmra.mxu1 %vm827_vm1, %v681_v14  ;;  %v790_v14 = vshrl.u32 %v7845_v58, 16 }
  0xcf   : > { %1214 = vmatprep.mubr.bf16.mxu1 %v10338_v0 }
  0xd0   : > { %v792_v16 = vor.u32 %v790_v14, %v788_v7 }
  0xd2   : > { %6220 = vmatmul.mubr.msk.bf16.gmra.mxu0 %vm827_vm1, %v765_v45  ;;  %v797_v18 = vsel %vm697_vm2, %v792_v16, %v796_v15  ;;  %v1314_v45 = vrot.slane %v7836_v52, 1  ;;  %v6955_v16 = vld [vmem:[%s10311_s3 + $0x124] ss:$8 sps:$4 sm:$0xff]  }
  0xd3   : > { %989 = vmatprep.mubr.bf16.mxu0 %v10338_v0 }
  0xd4   : > { %v1315_v49 = vsel %vm1294_vm3, %v1312_v38, %v1314_v45  ;;  %v2492_v38 = vsel %vm870_vm0, %v6940_v51, 0 }
  0xd6   : > { %6240 = vmatmul.mubr.msk.bf16.gmra.mxu1 %vm827_vm1, %v682_v24  ;;  %v805_v24 = vsel %vm697_vm2, %v800_v21, %v804_v23 }
  0xd7   : > { %1224 = vmatprep.mubr.bf16.mxu1 %v10338_v0 }
  0xda   : > { %6221 = vmatmul.mubr.msk.bf16.gmra.mxu0 %vm827_vm1, %v773_v55  ;;  %v6941_v55 = vld [vmem:[%s10311_s3 + $0x80] ss:$8 sps:$4 sm:$0xff]  }
  0xdb   : > { %999 = vmatprep.mubr.bf16.mxu0 %v10338_v0 }
  0xde   : > { %6241 = vmatmul.mubr.msk.bf16.gmra.mxu1 %vm827_vm1, %v7811_v33  ;;  %v6937_v33 = vld [vmem:[%s10311_s3 + $0xc0] ss:$8 sps:$4 sm:$0xff]  }
  0xdf   : > { %1234 = vmatprep.mubr.bf16.mxu1 %v10338_v0 }
  0xe2   : > { %6222 = vmatmul.mubr.msk.bf16.gmra.mxu0 %vm827_vm1, %v781_v6  ;;  %v1318_v6 = vrot.slane %v7848_v59, 1 }
  0xe3   : > { %1009 = vmatprep.mubr.bf16.mxu0 %v10338_v0 }
  0xe4   : > { %v1321_v25 = vsel %vm1294_vm3, %v1318_v6, %v1320_v20 }
  0xe6   : > { %6242 = vmatmul.mubr.msk.bf16.gmra.mxu1 %vm827_vm1, %v7836_v52  ;;  %v6939_v52 = vld [vmem:[%s10311_s3 + $0xc4] ss:$8 sps:$4 sm:$0xff]  }
  0xe7   : > { %1244 = vmatprep.mubr.bf16.mxu1 %v10338_v0 }
  0xea   : > { %6223 = vmatmul.mubr.msk.bf16.gmra.mxu0 %vm827_vm1, %v789_v13  ;;  %v1319_v13 = vsel %vm1294_vm3, %v1316_v53, %v1318_v6 }
  0xeb   : > { %1019 = vmatprep.mubr.bf16.mxu0 %v10338_v0 }
  0xee   : > { %6243 = vmatmul.mubr.msk.bf16.gmra.mxu1 %vm827_vm1, %v7845_v58  ;;  %v1317_v58 = vsel %vm1294_vm3, %v1314_v45, %v1316_v53 }
  0xef   : > { %1254 = vmatprep.mubr.bf16.mxu1 %v10338_v0 }
  0xf2   : > { %6224 = vmatmul.mubr.msk.bf16.gmra.mxu0 %vm827_vm1, %v797_v18 }
  0xf3   : > { %1029 = vmatprep.mubr.bf16.mxu0 %v10338_v0 }
  0xf6   : > { %6244 = vmatmul.mubr.msk.bf16.gmra.mxu1 %vm827_vm1, %v7848_v59  ;;  %v2187_v59 = vsel %vm870_vm0, %v6952_v11, 0 }
  0xf7   : > { %1264 = vmatprep.mubr.bf16.mxu1 %v10338_v0 }
  0xfa   : > { %6225 = vmatmul.mubr.msk.bf16.gmra.mxu0 %vm827_vm1, %v805_v24 }
  0xfb   : > { %1039 = vmatprep.mubr.bf16.mxu0 %v10338_v0 }
  0xfe   : > { %6245 = vmatmul.mubr.msk.bf16.gmra.mxu1 %vm827_vm1, %v7869_v17 }
 0x102   : > { %6226 = vmatmul.mubr.msk.bf16.gmra.mxu0 %vm827_vm1, %v808_v26 }
 0x103   : > { %1420 = vmatprep.mubr.bf16.mxu0 %v10338_v0 }
 0x10a   : > { %6255 = vmatmul.mubr.msk.bf16.vlgmr.msra.gmra.mxu0 %vm827_vm1, %v7767_v60  ;;  %v6898_v60 = vld [vmem:[%s10311_s3 + $0x114] ss:$8 sps:$4 sm:$0xff]  }
 0x10b   : > { %1430 = vmatprep.mubr.bf16.mxu0 %v10338_v0  ;;  %2192 = vmatprep.subr.bf16.mxu1 %v6898_v60 }
 0x10c   : > { %2193 = vmatpush1.bf16.msra.mxu1 %v6896_v27 }
 0x112   : > { %6256 = vmatmul.mubr.msk.bf16.gmra.mxu0 %vm827_vm1, %v7770_v61  ;;  %v6899_v61 = vld [vmem:[%s10311_s3 + $0x100] ss:$8 sps:$4 sm:$0xff]  }
 0x113   : > { %1440 = vmatprep.mubr.bf16.mxu0 %v10338_v0 }
 0x11a   : > { %6257 = vmatmul.mubr.msk.bf16.gmra.mxu0 %vm827_vm1, %v7773_v1  ;;  %v6901_v1 = vld [vmem:[%s10311_s3 + $0x104] ss:$8 sps:$4 sm:$0xff]  }
 0x11b   : > { %1450 = vmatprep.mubr.bf16.mxu0 %v10338_v0  ;;  %2194 = vmatprep.subr.bf16.mxu1 %v6901_v1 }
 0x11c   : > { %2195 = vmatpush1.bf16.msra.mxu1 %v6899_v61 }
 0x11d   : > { %2196 = vmatprep.subr.bf16.mxu1 %v6910_v32 }
 0x122   : > { %6258 = vmatmul.mubr.msk.bf16.gmra.mxu0 %vm827_vm1, %v7776_v2  ;;  %v6904_v2 = vld [vmem:[%s10311_s3 + $0x74] ss:$8 sps:$4 sm:$0xff]  }
 0x123   : > { %1460 = vmatprep.mubr.bf16.mxu0 %v10338_v0  ;;  %2497 = vmatprep.subr.bf16.mxu0 %v6904_v2 }
 0x12a   : > { %6259 = vmatmul.mubr.msk.bf16.gmra.mxu0 %vm827_vm1, %v7780_v3  ;;  %v6902_v3 = vld [vmem:[%s10311_s3 + $0x70] ss:$8 sps:$4 sm:$0xff]  }
 0x12b   : > { %1470 = vmatprep.mubr.bf16.mxu0 %v10338_v0  ;;  %2498 = vmatpush1.bf16.msra.mxu0 %v6902_v3 }
 0x12c   : > { %2499 = vmatprep.subr.bf16.mxu0 %v6907_v28 }
 0x12f   : > { %2500 = vmatpush1.bf16.msra.mxu0 %v6905_v30 }
 0x130   : > { %2501 = vmatprep.subr.bf16.mxu0 %v6913_v31 }
 0x132   : > { %6260 = vmatmul.mubr.msk.bf16.gmra.mxu0 %vm827_vm1, %v7786_v9  ;;  %v6908_v9 = vld [vmem:[%s10311_s3 + $0xf0] ss:$8 sps:$4 sm:$0xff]  }
 0x133   : > { %1480 = vmatprep.mubr.bf16.mxu0 %v10338_v0  ;;  %2197 = vmatpush1.bf16.msra.mxu1 %v6908_v9 }
 0x134   : > { %2502 = vmatpush1.bf16.msra.mxu0 %v6911_v34  ;;  %2198 = vmatprep.subr.bf16.mxu1 %v6922_v41 }
 0x135   : > { %2503 = vmatprep.subr.bf16.mxu0 %v6916_v35 }
 0x137   : > { %2199 = vmatpush1.bf16.msra.mxu1 %v6920_v40 }
 0x138   : > { %2504 = vmatpush1.bf16.msra.mxu0 %v6914_v36  ;;  %2200 = vmatprep.subr.bf16.mxu1 %v6931_v47 }
 0x13a   : > { %6261 = vmatmul.mubr.msk.bf16.gmra.mxu0 %vm827_vm1, %v7796_v22  ;;  %v6919_v22 = vld [vmem:[%s10311_s3 + $0x34] ss:$8 sps:$4 sm:$0xff]  }
 0x13b   : > { %1490 = vmatprep.mubr.bf16.mxu0 %v10338_v0  ;;  %2505 = vmatprep.subr.bf16.mxu0 %v6919_v22 }
 0x13c   : > { %2506 = vmatpush1.bf16.msra.mxu0 %v6917_v37 }
 0x13d   : > { %2507 = vmatprep.subr.bf16.mxu0 %v6925_v42 }
 0x142   : > { %6262 = vmatmul.mubr.msk.bf16.gmra.mxu0 %vm827_vm1, %v7806_v29  ;;  %v6923_v29 = vld [vmem:[%s10311_s3 + $0x20] ss:$8 sps:$4 sm:$0xff]  }
 0x143   : > { %1500 = vmatprep.mubr.bf16.mxu0 %v10338_v0  ;;  %2508 = vmatpush1.bf16.msra.mxu0 %v6923_v29 }
 0x144   : > { %2509 = vmatprep.subr.bf16.mxu0 %v6928_v43 }
 0x147   : > { %2510 = vmatpush1.bf16.msra.mxu0 %v6926_v44 }
 0x148   : > { %2511 = vmatprep.subr.bf16.mxu0 %v6934_v46 }
 0x14a   : > { %6263 = vmatmul.mubr.msk.bf16.gmra.mxu0 %vm827_vm1, %v7819_v39  ;;  %v6929_v39 = vld [vmem:[%s10311_s3 + $0xd0] ss:$8 sps:$4 sm:$0xff]  }
 0x14b   : > { %1510 = vmatprep.mubr.bf16.mxu0 %v10338_v0  ;;  %2201 = vmatpush1.bf16.msra.mxu1 %v6929_v39 }
 0x14c   : > { %2512 = vmatpush1.bf16.msra.mxu0 %v6932_v48  ;;  %2202 = vmatprep.subr.bf16.mxu1 %v6939_v52 }
 0x14d   : > { %6344 = vmatprep.subr.msk.bf16.mxu0 %vm870_vm0, %v6935_v50 }
 0x14f   : > { %2203 = vmatpush1.bf16.msra.mxu1 %v6937_v33 }
 0x150   : > { %2526 = vmatpush2.bf16.msra.mxu0 %v2492_v38  ;;  %2204 = vmatprep.subr.bf16.mxu1 %v6946_v56 }
 0x151   : > { %2527 = vmatprep.subr.bf16.mxu0 %v6943_v54  ;;  %v6958_v54 = vld [vmem:[%s10311_s3 + $0x1b4] ss:$8 sps:$4 sm:$0xff]  }
 0x152   : > { %6264 = vmatmul.mubr.msk.bf16.gmra.mxu0 %vm827_vm1, %v1315_v49 }
 0x153   : > { %1520 = vmatprep.mubr.bf16.mxu0 %v10338_v0  ;;  %2205 = vmatpush1.bf16.msra.mxu1 %v6944_v57 }
 0x154   : > { %2528 = vmatpush2.bf16.msra.mxu0 %v6941_v55  ;;  %2206 = vmatprep.subr.bf16.mxu1 %v6949_v63 }
 0x156   : > { %v8029_v62 = vpop.f32.mrf.mxu1 }
 0x157   : > { %2207 = vmatpush1.bf16.msra.mxu1 %v6947_v5 }
 0x158   : > { %v8044_v8 = vpop.f32.mrf.mxu1  ;;  %6309 = vmatprep.subr.msk.bf16.mxu1 %vm870_vm0, %v6950_v10 }
 0x15a   : > { %v8034_v4 = vpop.f32.mrf.mxu0  ;;  %6265 = vmatmul.mubr.msk.bf16.gmra.mxu0 %vm827_vm1, %v1317_v58  ;;  %v8057_v14 = vpop.f32.mrf.mxu1 }
 0x15b   : > { %1530 = vmatprep.mubr.bf16.mxu0 %v10338_v0  ;;  %2221 = vmatpush2.bf16.msra.mxu1 %v2187_v59 }
 0x15c   : > { %v8042_v7 = vpop.f32.mrf.mxu0  ;;  %2222 = vmatprep.subr.bf16.mxu1 %v6955_v16  ;;  %v8072_v21 = vpop.f32.mrf.mxu1 }
 0x15e   : > { %v8052_v12 = vpop.f32.mrf.mxu0  ;;  %v8079_v26 = vpop.f32.mrf.mxu1 }
 0x15f   : > { %2223 = vmatpush2.bf16.msra.mxu1 %v6953_v19 }
 0x160   : > { %v8059_v15 = vpop.f32.mrf.mxu0  ;;  %v8087_v17 = vpop.f32.mrf.mxu1  ;;  %2933 = vmatprep.subr.bf16.mxu1 %v6958_v54 }
 0x162   : > { %v8064_v18 = vpop.f32.mrf.mxu0  ;;  %6266 = vmatmul.mubr.msk.bf16.gmra.mxu0 %vm827_vm1, %v1319_v13  ;;  %v8093_v2 = vpop.f32.mrf.mxu1 }
 0x163   : > { %1540 = vmatprep.mubr.bf16.mxu0 %v10338_v0 }
 0x164   : > { %v8074_v23 = vpop.f32.mrf.mxu0  ;;  %v8100_v30 = vpop.f32.mrf.mxu1 }
 0x166   : > { %v8076_v24 = vpop.f32.mrf.mxu0  ;;  %v8106_v32 = vpop.f32.mrf.mxu1 }
 0x168   : > { %v8081_v27 = vpop.f32.mrf.mxu0  ;;  %v8112_v36 = vpop.f32.mrf.mxu1 }
 0x16a   : > { %v8083_v60 = vpop.f32.mrf.mxu0  ;;  %6267 = vmatmul.mubr.msk.bf16.gmra.mxu0 %vm827_vm1, %v1321_v25  ;;  %v8118_v40 = vpop.f32.mrf.mxu1 }
 0x16b   : > { %1550 = vmatprep.mubr.bf16.mxu0 %v10338_v0 }
 0x16c   : > { %v8089_v61 = vpop.f32.mrf.mxu0  ;;  %v8124_v29 = vpop.f32.mrf.mxu1 }
 0x16e   : > { %v8091_v1 = vpop.f32.mrf.mxu0  ;;  %v8130_v45 = vpop.f32.mrf.mxu1 }
 0x170   : > { %v8095_v3 = vpop.f32.mrf.mxu0  ;;  %v8136_v48 = vpop.f32.mrf.mxu1 }
 0x172   : > { %v8097_v28 = vpop.f32.mrf.mxu0  ;;  %6268 = vmatmul.mubr.msk.bf16.gmra.mxu0 %vm827_vm1, %v1320_v20  ;;  %v8142_v50 = vpop.f32.mrf.mxu1 }
 0x174   : > { %v8102_v31 = vpop.f32.mrf.mxu0  ;;  %v8148_v33 = vpop.f32.mrf.mxu1 }
 0x176   : > { %v8104_v9 = vpop.f32.mrf.mxu0  ;;  %v8157_v55 = vpop.f32.mrf.mxu1 }
 0x178   : > { %v8108_v34 = vpop.f32.mrf.mxu0  ;;  %v8163_v58 = vpop.f32.mrf.mxu1 }
 0x17a   : > { %v8110_v35 = vpop.f32.mrf.mxu0  ;;  %v8169_v6 = vpop.f32.mrf.mxu1 }
 0x17c   : > { %v8114_v22 = vpop.f32.mrf.mxu0  ;;  %v8175_v13 = vpop.f32.mrf.mxu1 }
 0x17e   : > { %v8116_v37 = vpop.f32.mrf.mxu0  ;;  %v8181_v19 = vpop.f32.mrf.mxu1 }
 0x180   : > { %v8120_v41 = vpop.f32.mrf.mxu0  ;;  %v8187_v54 = vpop.f32.mrf.mxu1 }
 0x182   : > { %v8122_v42 = vpop.f32.mrf.mxu0 }
 0x184   : > { %v8126_v43 = vpop.f32.mrf.mxu0 }
 0x186   : > { %v8128_v44 = vpop.f32.mrf.mxu0 }
 0x188   : > { %v8132_v46 = vpop.f32.mrf.mxu0 }
 0x18a   : > { %v8134_v47 = vpop.f32.mrf.mxu0 }
 0x18c   : > { %v8138_v39 = vpop.f32.mrf.mxu0 }
 0x18d   : > { %10380 = vst [vmem:[#allocation26_spill] sm:$0xff] %v8138_v39 }
 0x18e   : > { %v8140_v49 = vpop.f32.mrf.mxu0 }
 0x18f   : > { %10381 = vst [vmem:[#allocation27_spill] sm:$0xff] %v8140_v49 }
 0x190   : > { %v8144_v51 = vpop.f32.mrf.mxu0 }
 0x191   : > { %10382 = vst [vmem:[#allocation28_spill] sm:$0xff] %v8144_v51 }
 0x192   : > { %v8146_v52 = vpop.f32.mrf.mxu0 }
 0x193   : > { %10383 = vst [vmem:[#allocation29_spill] sm:$0xff] %v8146_v52 }
 0x194   : > { %v8150_v38 = vpop.f32.mrf.mxu0 }
 0x195   : > { %10384 = vst [vmem:[#allocation30_spill] sm:$0xff] %v8150_v38 }
 0x196   : > { %v8152_v53 = vpop.f32.mrf.mxu0 }
 0x197   : > { %10385 = vst [vmem:[#allocation31_spill] sm:$0xff] %v8152_v53 }
 0x198   : > { %v8159_v56 = vpop.f32.mrf.mxu0 }
 0x199   : > { %10386 = vst [vmem:[#allocation32_spill] sm:$0xff] %v8159_v56 }
 0x19a   : > { %v8161_v57 = vpop.f32.mrf.mxu0 }
 0x19b   : > { %10387 = vst [vmem:[#allocation33_spill] sm:$0xff] %v8161_v57 }
 0x19c   : > { %v8165_v63 = vpop.f32.mrf.mxu0 }
 0x19d   : > { %10388 = vst [vmem:[#allocation34_spill] sm:$0xff] %v8165_v63 }
 0x19e   : > { %v8167_v5 = vpop.f32.mrf.mxu0 }
 0x19f   : > { %10389 = vst [vmem:[#allocation35_spill] sm:$0xff] %v8167_v5 }
 0x1a0   : > { %v8171_v10 = vpop.f32.mrf.mxu0 }
 0x1a1   : > { %10390 = vst [vmem:[#allocation36_spill] sm:$0xff] %v8171_v10  ;;  %v8193_v10 = vpop.f32.mrf.mxu1 }
 0x1a2   : > { %v8173_v11 = vpop.f32.mrf.mxu0 }
 0x1a3   : > { %10391 = vst [vmem:[#allocation37_spill] sm:$0xff] %v8173_v11 }
 0x1a4   : > { %v8177_v59 = vpop.f32.mrf.mxu0 }
 0x1a5   : > { %10392 = vst [vmem:[#allocation38_spill] sm:$0xff] %v8177_v59  ;;  %v8199_v59 = vpop.f32.mrf.mxu1 }
 0x1a6   : > { %v8179_v16 = vpop.f32.mrf.mxu0 }
 0x1a7   : > { %10393 = vst [vmem:[#allocation39_spill] sm:$0xff] %v8179_v16 }
 0x1a8   : > { %v8183_v20 = vpop.f32.mrf.mxu0 }
 0x1a9   : > { %10394 = vst [vmem:[#allocation40_spill] sm:$0xff] %v8183_v20  ;;  %v8205_v20 = vpop.f32.mrf.mxu1 }
 0x1aa   : > { %v8185_v25 = vpop.f32.mrf.mxu0 }
 0x1ab   : > { %10395 = vst [vmem:[#allocation41_spill] sm:$0xff] %v8185_v25 }
 0x1ac   : > { %v8189_v0 = vpop.f32.mrf.mxu0 }
 0x1ad   : > { %10396 = vst [vmem:[#allocation42_spill] sm:$0xff] %v8189_v0  ;;  %v8211_v0 = vpop.f32.mrf.mxu1 }
 0x1ae   : > { %v8191_v5 = vpop.f32.mrf.mxu0  ;;  %10404 = vst [vmem:[#allocation50_spill] sm:$0xff] %v8211_v0 }
 0x1af   : > { %10397 = vst [vmem:[#allocation43_spill] sm:$0xff] %v8191_v5 }
 0x1b0   : > { %v8195_v11 = vpop.f32.mrf.mxu0 }
 0x1b1   : > { %10398 = vst [vmem:[#allocation44_spill] sm:$0xff] %v8195_v11  ;;  %v1619_v11 = vlaneseq }
 0x1b2   : > { %v8197_v63 = vpop.f32.mrf.mxu0 }
 0x1b3   : > { %10399 = vst [vmem:[#allocation45_spill] sm:$0xff] %v8197_v63  ;;  %v8217_v63 = vpop.f32.mrf.mxu1 }
 0x1b4   : > { %v8201_v16 = vpop.f32.mrf.mxu0  ;;  %10407 = vst [vmem:[#allocation53_spill] sm:$0xff] %v8217_v63  ;;  %v1137_v63 = vadd.f32 %v8029_v62, %v8034_v4  ;;  %v1143_v4 = vadd.f32 %v8072_v21, %v8059_v15 }
 0x1b5   : > { %10400 = vst [vmem:[#allocation46_spill] sm:$0xff] %v8201_v16  ;;  %v8223_v52 = vpop.f32.mrf.mxu1 }
 0x1b6   : > { %v8203_v57 = vpop.f32.mrf.mxu0  ;;  %10410 = vst [vmem:[#allocation56_spill] sm:$0xff] %v8223_v52 }
 0x1b7   : > { %10401 = vst [vmem:[#allocation47_spill] sm:$0xff] %v8203_v57  ;;  %v1620_v57 = vshrl.u32 %v1619_v11, 7  ;;  %v8231_v49 = vpop.f32.mrf.mxu1  ;;  %v1139_v11 = vadd.f32 %v8044_v8, %v8042_v7 }
 0x1b8   : > { %v8207_v25 = vpop.f32.mrf.mxu0  ;;  %10414 = vst [vmem:[#allocation60_spill] sm:$0xff] %v8231_v49 }
 0x1b9   : > { %10402 = vst [vmem:[#allocation48_spill] sm:$0xff] %v8207_v25 }
 0x1ba   : > { %v8209_v56 = vpop.f32.mrf.mxu0 }
 0x1bb   : > { %10403 = vst [vmem:[#allocation49_spill] sm:$0xff] %v8209_v56  ;;  %v8229_v56 = vsub.s32 0, %v1620_v57 }
 0x1bc   : > { %v8213_v5 = vpop.f32.mrf.mxu0 }
 0x1bd   : > { %10405 = vst [vmem:[#allocation51_spill] sm:$0xff] %v8213_v5  ;;  %10413 = vst [vmem:[#allocation59_spill] sm:$0xff] %v8229_v56 }
 0x1be   : > { %v8215_v53 = vpop.f32.mrf.mxu0 }
 0x1bf   : > { %10406 = vst [vmem:[#allocation52_spill] sm:$0xff] %v8215_v53  ;;  %v1617_v53 = vld [vmem:[#allocation2] sm:$0x3] }
 0x1c0   : > { %v8219_v38 = vpop.f32.mrf.mxu0 }
 0x1c1   : > { %10408 = vst [vmem:[#allocation54_spill] sm:$0xff] %v8219_v38  ;;  %v8237_v38 = vsub.s32 1, %v1620_v57 }
 0x1c2   : > { %v8221_v16 = vpop.f32.mrf.mxu0 }
 0x1c3   : > { %10409 = vst [vmem:[#allocation55_spill] sm:$0xff] %v8221_v16  ;;  %10416 = vst [vmem:[#allocation62_spill] sm:$0xff] %v8237_v38  ;;  %v8249_v39 = vrot.slane %v1617_v53, %v8237_v38 }
 0x1c4   : > { %v8225_v51 = vpop.f32.mrf.mxu0 }
 0x1c5   : > { %10411 = vst [vmem:[#allocation57_spill] sm:$0xff] %v8225_v51  ;;  %v8242_v51 = vrot.slane %v1617_v53, %v8229_v56 }
 0x1c6   : > { %v8227_v25 = vpop.f32.mrf.mxu0 }
 0x1c7   : > { %10412 = vst [vmem:[#allocation58_spill] sm:$0xff] %v8227_v25  ;;  %v8244_v25 = vpop.f32.mrf.mxu1 }
 0x1c8   : > { %v8233_v5 = vpop.f32.mrf.mxu0 }
 0x1c9   : > { %10415 = vst [vmem:[#allocation61_spill] sm:$0xff] %v8233_v5  ;;  %v1141_v5 = vadd.f32 %v8057_v14, %v8052_v12  ;;  %v8254_v57 = vpop.f32.mrf.mxu1  ;;  %v1149_v14 = vadd.f32 %v8087_v17, %v8074_v23  ;;  %v1153_v23 = vadd.f32 %v8100_v30, %v8081_v27  ;;  %v1159_v27 = vadd.f32 %v8112_v36, %v8089_v61 }
 0x1ca   : > { %v1422_v16 = vpop.f32.mrf.mxu0  ;;  %v1161_v30 = vadd.f32 %v8118_v40, %v8091_v1 }
 0x1cb   : > { %v1561_v52 = vadd.f32 %v1422_v16, %v1137_v63  ;;  %v1147_v16 = vadd.f32 %v8079_v26, %v8064_v18 }
 0x1cc   : > { %v1424_v0 = vpop.f32.mrf.mxu0 }
 0x1cd   : > { %v1562_v49 = vadd.f32 %v1424_v0, %v1139_v11  ;;  %v1629_v7 = vadd.f32 %v8242_v51, %v1561_v52 }
 0x1ce   : > { %v1426_v62 = vpop.f32.mrf.mxu0 }
 0x1cf   : > { %v1563_v8 = vadd.f32 %v1426_v62, %v1141_v5  ;;  %v1630_v56 = vadd.f32 %v8249_v39, %v1562_v49  ;;  %v1685_v11 = vmax.f32 %v1629_v7, 0.0  ;;  %v1151_v5 = vadd.f32 %v8093_v2, %v8076_v24  ;;  %v8265_v62 = vpop.f32.mrf.mxu1 }
 0x1d0   : > { %v1428_v63 = vpop.f32.mrf.mxu0  ;;  %v1157_v2 = vadd.f32 %v8106_v32, %v8083_v60 }
 0x1d1   : > { %v1631_v0 = vadd.f32 %v8242_v51, %v1563_v8  ;;  %v1564_v12 = vadd.f32 %v1428_v63, %v1143_v4  ;;  %v1686_v26 = vmax.f32 %v1630_v56, 0.0 }
 0x1d2   : > { %v1432_v53 = vpop.f32.mrf.mxu0 }
 0x1d3   : > { %v1687_v15 = vmax.f32 %v1631_v0, 0.0  ;;  %v1632_v21 = vadd.f32 %v8249_v39, %v1564_v12  ;;  %v1565_v52 = vadd.f32 %v1432_v53, %v1147_v16  ;;  %v8272_v16 = vpop.f32.mrf.mxu1 }
 0x1d4   : > { %v1434_v18 = vpop.f32.mrf.mxu0 }
 0x1d5   : > { %v1741_v49 = vpack.c.bf16 %v1687_v15, %v1685_v11  ;;  %v1688_v38 = vmax.f32 %v1632_v21, 0.0  ;;  %v1566_v8 = vadd.f32 %v1434_v18, %v1149_v14  ;;  %v1633_v7 = vadd.f32 %v8242_v51, %v1565_v52  ;;  %v8291_v61 = vpop.f32.mrf.mxu1 }
 0x1d6   : > { %v1436_v4 = vpop.f32.mrf.mxu0  ;;  %v1167_v21 = vadd.f32 %v8130_v45, %v8097_v28  ;;  %v1169_v52 = vadd.f32 %v8136_v48, %v8102_v31 }
 0x1d7   : > { %v8269_v17 = vpack.c.bf16 %v1688_v38, %v1686_v26  ;;  %v1567_v63 = vadd.f32 %v1436_v4, %v1151_v5  ;;  %v1813_v24 = vshll.u32 %v1741_v49, 16  ;;  %v1634_v56 = vadd.f32 %v8249_v39, %v1566_v8 }
 0x1d8   : > { %v1438_v0 = vpop.f32.mrf.mxu0  ;;  %v1163_v38 = vadd.f32 %v8124_v29, %v8095_v3  ;;  %v1689_v60 = vmax.f32 %v1633_v7, 0.0  ;;  %v1171_v26 = vadd.f32 %v8142_v50, %v8104_v9  ;;  %v1811_v45 = vshrl.u32 %v1741_v49, 16 }
 0x1d9   : > { %v1635_v12 = vadd.f32 %v8242_v51, %v1567_v63  ;;  %v1568_v14 = vadd.f32 %v1438_v0, %v1153_v23  ;;  %6345 = vmatprep.mubr.msk.bf16.mxu0 %vm827_vm1, %v8269_v17  ;;  %v1825_v1 = vshll.u32 %v8269_v17, 16  ;;  %v1815_v40 = vrot.slane %v1813_v24, 1  ;;  %v8303_v63 = vpop.f32.mrf.mxu1 }
 0x1da   : > { %v1442_v53 = vpop.f32.mrf.mxu0  ;;  %2530 = vmatmul.mubr.bf16.vlgmr.msra.gmra.mxu0 %v1741_v49  ;;  %v1690_v3 = vmax.f32 %v1634_v56, 0.0  ;;  %v2719_v4 = vrot.slane %v1741_v49, 1  ;;  %v1823_v23 = vshrl.u32 %v8269_v17, 16  ;;  %v2722_v7 = vrot.slane %v8269_v17, 1 }
 0x1db   : > { %v1691_v32 = vmax.f32 %v1635_v12, 0.0  ;;  %v1636_v11 = vadd.f32 %v8249_v39, %v1568_v14  ;;  %v1569_v15 = vadd.f32 %v1442_v53, %v1157_v2  ;;  %v1827_v24 = vrot.slane %v1825_v1, 1  ;;  %v8320_v1 = vpop.f32.mrf.mxu1 }
 0x1dc   : > { %v1444_v36 = vpop.f32.mrf.mxu0  ;;  %v1816_v2 = vor.u32 %v1815_v40, %v1811_v45 }
 0x1dd   : > { %v8294_v29 = vpack.c.bf16 %v1691_v32, %v1689_v60  ;;  %v1692_v5 = vmax.f32 %v1636_v11, 0.0  ;;  %v1570_v18 = vadd.f32 %v1444_v36, %v1159_v27  ;;  %v1637_v8 = vadd.f32 %v8242_v51, %v1569_v15 }
 0x1de   : > { %v1446_v28 = vpop.f32.mrf.mxu0  ;;  %v1173_v36 = vadd.f32 %v8148_v33, %v8108_v34  ;;  %v1177_v34 = vadd.f32 %v8157_v55, %v8110_v35  ;;  %v8346_v55 = vpop.f32.mrf.mxu1 }
 0x1df   : > { %v8299_v31 = vpack.c.bf16 %v1692_v5, %v1690_v3  ;;  %v1571_v48 = vadd.f32 %v1446_v28, %v1161_v30  ;;  %v1818_v56 = vshll.u32 %v8294_v29, 16  ;;  %v2720_v9 = vrot.slane %v8294_v29, 1 }
 0x1e0   : > { %v1448_v0 = vpop.f32.mrf.mxu0  ;;  %v1638_v50 = vadd.f32 %v8249_v39, %v1570_v18  ;;  %v1693_v17 = vmax.f32 %v1637_v8, 0.0  ;;  %v1828_v3 = vor.u32 %v1827_v24, %v1823_v23  ;;  %v1181_v24 = vadd.f32 %v8169_v6, %v8116_v37 }
 0x1e1   : > { %v1639_v49 = vadd.f32 %v8242_v51, %v1571_v48  ;;  %v1572_v12 = vadd.f32 %v1448_v0, %v1163_v38  ;;  %6346 = vmatprep.mubr.msk.bf16.mxu0 %vm827_vm1, %v8299_v31  ;;  %v1830_v14 = vshll.u32 %v8299_v31, 16  ;;  %v1820_v30 = vrot.slane %v1818_v56, 1  ;;  %v6961_v0 = vld [vmem:[%s10311_s3 + $0x1a4] ss:$8 sps:$4 sm:$0xff]  }
 0x1e2   : > { %v1452_v27 = vpop.f32.mrf.mxu0  ;;  %2540 = vmatmul.mubr.bf16.gmra.mxu0 %v8294_v29  ;;  %v2723_v53 = vrot.slane %v8299_v31, 1  ;;  %v8315_v60 = vsel %vm1294_vm3, %v2719_v4, %v2720_v9  ;;  %v1694_v8 = vmax.f32 %v1638_v50, 0.0 }
 0x1e3   : > { %v1695_v32 = vmax.f32 %v1639_v49, 0.0  ;;  %v1640_v11 = vadd.f32 %v8249_v39, %v1572_v12  ;;  %v1573_v15 = vadd.f32 %v1452_v27, %v1167_v21  ;;  %v1832_v38 = vrot.slane %v1830_v14, 1  ;;  %v6956_v21 = vld [vmem:[%s10311_s3 + $0x1b0] ss:$8 sps:$4 sm:$0xff]   ;;  %v6964_v27 = vld [vmem:[%s10311_s3 + $0x194] ss:$8 sps:$4 sm:$0xff]  }
 0x1e4   : > { %v1454_v40 = vpop.f32.mrf.mxu0  ;;  %v1821_v5 = vsel %vm697_vm2, %v1816_v2, %v1820_v30  ;;  %v8324_v18 = vsel %vm1294_vm3, %v2722_v7, %v2723_v53  ;;  %v1834_v7 = vshrl.u32 %v8294_v29, 16  ;;  %v1842_v29 = vshrl.u32 %v8299_v31, 16 }
 0x1e5   : > { %v8326_v28 = vpack.c.bf16 %v1695_v32, %v1693_v17  ;;  %v1696_v45 = vmax.f32 %v1640_v11, 0.0  ;;  %v1574_v4 = vadd.f32 %v1454_v40, %v1169_v52  ;;  %v1641_v33 = vadd.f32 %v8242_v51, %v1573_v15 }
 0x1e6   : > { %v1456_v48 = vpop.f32.mrf.mxu0  ;;  %v1833_v23 = vsel %vm697_vm2, %v1828_v3, %v1832_v38  ;;  %v1179_v52 = vadd.f32 %v8163_v58, %v8114_v22  ;;  %v1836_v50 = vor.u32 %v1834_v7, %v1820_v30  ;;  %v1183_v3 = vadd.f32 %v8175_v13, %v8120_v41 }
 0x1e7   : > { %v8343_v2 = vpack.c.bf16 %v1696_v45, %v1694_v8  ;;  %v1575_v35 = vadd.f32 %v1456_v48, %v1171_v26  ;;  %6310 = vmatprep.mubr.msk.bf16.mxu1 %vm827_vm1, %v1833_v23  ;;  %v1838_v49 = vshll.u32 %v8326_v28, 16  ;;  %v2725_v12 = vrot.slane %v8326_v28, 1  ;;  %v6959_v26 = vld [vmem:[%s10311_s3 + $0x1a0] ss:$8 sps:$4 sm:$0xff]  }
 0x1e8   : > { %2225 = vmatmul.mubr.bf16.vlgmr.msra.gmra.mxu1 %v1821_v5  ;;  %v1458_v56 = vpop.f32.mrf.mxu0  ;;  %v1642_v22 = vadd.f32 %v8249_v39, %v1574_v4  ;;  %v1697_v31 = vmax.f32 %v1641_v33, 0.0  ;;  %v8372_v5 = vpop.f32.mrf.mxu1  ;;  %v1844_v45 = vor.u32 %v1842_v29, %v1832_v38  ;;  %v1187_v41 = vadd.f32 %v8181_v19, %v8122_v42 }
 0x1e9   : > { %v1643_v37 = vadd.f32 %v8242_v51, %v1575_v35  ;;  %v1576_v58 = vadd.f32 %v1458_v56, %v1173_v36  ;;  %6347 = vmatprep.mubr.msk.bf16.mxu0 %vm827_vm1, %v8343_v2  ;;  %v1846_v6 = vshll.u32 %v8343_v2, 16  ;;  %2934 = vmatpush1.bf16.msra.mxu1 %v6956_v21  ;;  %v1840_v17 = vrot.slane %v1838_v49, 1 }
 0x1ea   : > { %v1462_v14 = vpop.f32.mrf.mxu0  ;;  %2550 = vmatmul.mubr.bf16.gmra.mxu0 %v8326_v28  ;;  %2935 = vmatprep.subr.bf16.mxu1 %v6961_v0  ;;  %v2727_v30 = vrot.slane %v8343_v2, 1  ;;  %v8367_v32 = vsel %vm1294_vm3, %v2720_v9, %v2725_v12  ;;  %v1698_v33 = vmax.f32 %v1642_v22, 0.0  ;;  %v6967_v0 = vld [vmem:[%s10311_s3 + $0x184] ss:$8 sps:$4 sm:$0xff]   ;;  %v1191_v35 = vadd.f32 %v8193_v10, %v8128_v44  ;;  %v8398_v19 = vpop.f32.mrf.mxu1 }
 0x1eb   : > { %v1699_v11 = vmax.f32 %v1643_v37, 0.0  ;;  %v1644_v15 = vadd.f32 %v8249_v39, %v1576_v58  ;;  %v1577_v36 = vadd.f32 %v1462_v14, %v1177_v34  ;;  %v1848_v40 = vrot.slane %v1846_v6, 1  ;;  %v6962_v34 = vld [vmem:[%s10311_s3 + $0x190] ss:$8 sps:$4 sm:$0xff]  }
 0x1ec   : > { %v1464_v8 = vpop.f32.mrf.mxu0  ;;  %v1841_v4 = vsel %vm697_vm2, %v1836_v50, %v1840_v17  ;;  %v8376_v21 = vsel %vm1294_vm3, %v2723_v53, %v2727_v30  ;;  %v1850_v53 = vshrl.u32 %v8326_v28, 16  ;;  %v1858_v50 = vshrl.u32 %v8343_v2, 16 }
 0x1ed   : > { %v8378_v9 = vpack.c.bf16 %v1699_v11, %v1697_v31  ;;  %v1700_v48 = vmax.f32 %v1644_v15, 0.0  ;;  %v1578_v23 = vadd.f32 %v1464_v8, %v1179_v52  ;;  %2936 = vmatpush1.bf16.msra.mxu1 %v6959_v26  ;;  %v1645_v13 = vadd.f32 %v8242_v51, %v1577_v36  ;;  %v6970_v26 = vld [vmem:[%s10311_s3 + $0x174] ss:$8 sps:$4 sm:$0xff]  }
 0x1ee   : > { %v1466_v38 = vpop.f32.mrf.mxu0  ;;  %v1849_v7 = vsel %vm697_vm2, %v1844_v45, %v1848_v40  ;;  %2937 = vmatprep.subr.bf16.mxu1 %v6964_v27  ;;  %v1189_v52 = vadd.f32 %v8187_v54, %v8126_v43  ;;  %v1852_v49 = vor.u32 %v1850_v53, %v1840_v17  ;;  %v1193_v36 = vadd.f32 %v8199_v59, %v8132_v46 }
 0x1ef   : > { %v8395_v56 = vpack.c.bf16 %v1700_v48, %v1698_v33  ;;  %v1579_v42 = vadd.f32 %v1466_v38, %v1181_v24  ;;  %6311 = vmatprep.mubr.msk.bf16.mxu1 %vm827_vm1, %v1849_v7  ;;  %v1854_v22 = vshll.u32 %v8378_v9, 16  ;;  %v2729_v37 = vrot.slane %v8378_v9, 1  ;;  %v6965_v24 = vld [vmem:[%s10311_s3 + $0x180] ss:$8 sps:$4 sm:$0xff]  }
 0x1f0   : > { %2235 = vmatmul.mubr.bf16.gmra.mxu1 %v1841_v4  ;;  %v1468_v29 = vpop.f32.mrf.mxu0  ;;  %v1646_v43 = vadd.f32 %v8249_v39, %v1578_v23  ;;  %v1701_v2 = vmax.f32 %v1645_v13, 0.0  ;;  %v1860_v45 = vor.u32 %v1858_v50, %v1848_v40  ;;  %v1197_v46 = vadd.f32 %v8205_v20, %v8134_v47  ;;  %v6973_v13 = vld [vmem:[%s10311_s3 + $0x164] ss:$8 sps:$4 sm:$0xff]  }
 0x1f1   : > { %v1647_v44 = vadd.f32 %v8242_v51, %v1579_v42  ;;  %v1580_v10 = vadd.f32 %v1468_v29, %v1183_v3  ;;  %6348 = vmatprep.mubr.msk.bf16.mxu0 %vm827_vm1, %v8395_v56  ;;  %v1862_v54 = vshll.u32 %v8395_v56, 16  ;;  %2938 = vmatpush1.bf16.msra.mxu1 %v6962_v34  ;;  %v1856_v6 = vrot.slane %v1854_v22, 1  ;;  %v8426_v3 = vpop.f32.mrf.mxu1  ;;  %v6968_v34 = vld [vmem:[%s10311_s3 + $0x170] ss:$8 sps:$4 sm:$0xff]   ;;  %v10417_v38 = vld [vmem:[#allocation26_spill] sm:$0xff] }
 0x1f2   : > { %v1472_v58 = vpop.f32.mrf.mxu0  ;;  %2560 = vmatmul.mubr.bf16.gmra.mxu0 %v8378_v9  ;;  %2939 = vmatprep.subr.bf16.mxu1 %v6967_v0  ;;  %v2731_v31 = vrot.slane %v8395_v56, 1  ;;  %v8421_v14 = vsel %vm1294_vm3, %v2725_v12, %v2729_v37  ;;  %v1702_v28 = vmax.f32 %v1646_v43, 0.0  ;;  %v10418_v7 = vld [vmem:[#allocation50_spill] sm:$0xff]  ;;  %v10419_v0 = vld [vmem:[#allocation27_spill] sm:$0xff] }
 0x1f3   : > { %v1703_v17 = vmax.f32 %v1647_v44, 0.0  ;;  %v1648_v27 = vadd.f32 %v8249_v39, %v1580_v10  ;;  %v1581_v11 = vadd.f32 %v1472_v58, %v1187_v41  ;;  %v1864_v15 = vrot.slane %v1862_v54, 1  ;;  %v8452_v20 = vpop.f32.mrf.mxu1 }
 0x1f4   : > { %v1474_v8 = vpop.f32.mrf.mxu0  ;;  %v1857_v4 = vsel %vm697_vm2, %v1852_v49, %v1856_v6  ;;  %v8430_v33 = vsel %vm1294_vm3, %v2727_v30, %v2731_v31  ;;  %v1866_v30 = vshrl.u32 %v8378_v9, 16  ;;  %v1199_v53 = vadd.f32 %v10418_v7, %v10417_v38  ;;  %v10423_v38 = vld [vmem:[#allocation29_spill] sm:$0xff]  ;;  %v10424_v7 = vld [vmem:[#allocation60_spill] sm:$0xff] }
 0x1f5   : > { %v8432_v12 = vpack.c.bf16 %v1703_v17, %v1701_v2  ;;  %v1704_v48 = vmax.f32 %v1648_v27, 0.0  ;;  %v1582_v23 = vadd.f32 %v1474_v8, %v1189_v52  ;;  %2940 = vmatpush1.bf16.msra.mxu1 %v6965_v24  ;;  %v1649_v59 = vadd.f32 %v8242_v51, %v1581_v11  ;;  %v10420_v52 = vld [vmem:[#allocation53_spill] sm:$0xff] }
 0x1f6   : > { %v1476_v40 = vpop.f32.mrf.mxu0  ;;  %v1865_v41 = vsel %vm697_vm2, %v1860_v45, %v1864_v15  ;;  %2941 = vmatprep.subr.bf16.mxu1 %v6970_v26  ;;  %v1201_v42 = vadd.f32 %v10420_v52, %v10419_v0  ;;  %v1874_v49 = vshrl.u32 %v8395_v56, 16  ;;  %v1868_v22 = vor.u32 %v1866_v30, %v1856_v6  ;;  %v6971_v56 = vld [vmem:[%s10311_s3 + $0x160] ss:$8 sps:$4 sm:$0xff]   ;;  %v6976_v26 = vld [vmem:[%s10311_s3 + $0x154] ss:$8 sps:$4 sm:$0xff]  }
 0x1f7   : > { %v8449_v29 = vpack.c.bf16 %v1704_v48, %v1702_v28  ;;  %v1583_v47 = vadd.f32 %v1476_v40, %v1191_v35  ;;  %6312 = vmatprep.mubr.msk.bf16.mxu1 %vm827_vm1, %v1865_v41  ;;  %v1870_v43 = vshll.u32 %v8432_v12, 16  ;;  %v2733_v44 = vrot.slane %v8432_v12, 1  ;;  %v10422_v28 = vld [vmem:[#allocation56_spill] sm:$0xff] }
 0x1f8   : > { %2245 = vmatmul.mubr.bf16.gmra.mxu1 %v1857_v4  ;;  %v1478_v50 = vpop.f32.mrf.mxu0  ;;  %v1650_v10 = vadd.f32 %v8249_v39, %v1582_v23  ;;  %v1705_v2 = vmax.f32 %v1649_v59, 0.0  ;;  %v10421_v4 = vld [vmem:[#allocation28_spill] sm:$0xff]  ;;  %v8480_v23 = vpop.f32.mrf.mxu1  ;;  %v1876_v59 = vor.u32 %v1874_v49, %v1864_v15  ;;  %v1207_v15 = vadd.f32 %v10424_v7, %v10423_v38 }
 0x1f9   : > { %v1651_v54 = vadd.f32 %v8242_v51, %v1583_v47  ;;  %v1584_v24 = vadd.f32 %v1478_v50, %v1193_v36  ;;  %6349 = vmatprep.mubr.msk.bf16.mxu0 %vm827_vm1, %v8449_v29  ;;  %v1878_v35 = vshll.u32 %v8449_v29, 16  ;;  %2942 = vmatpush1.bf16.msra.mxu1 %v6968_v34  ;;  %v1872_v6 = vrot.slane %v1870_v43, 1  ;;  %v10425_v50 = vld [vmem:[#allocation30_spill] sm:$0xff] }
 0x1fa   : > { %v1482_v58 = vpop.f32.mrf.mxu0  ;;  %2570 = vmatmul.mubr.bf16.gmra.mxu0 %v8432_v12  ;;  %2943 = vmatprep.subr.bf16.mxu1 %v6973_v13  ;;  %v2735_v17 = vrot.slane %v8449_v29, 1  ;;  %v8475_v27 = vsel %vm1294_vm3, %v2729_v37, %v2733_v44  ;;  %v1203_v48 = vadd.f32 %v10422_v28, %v10421_v4  ;;  %v1706_v37 = vmax.f32 %v1650_v10, 0.0  ;;  %v6974_v13 = vld [vmem:[%s10311_s3 + $0x150] ss:$8 sps:$4 sm:$0xff]  }
 0x1fb   : > { %v1707_v11 = vmax.f32 %v1651_v54, 0.0  ;;  %v1652_v36 = vadd.f32 %v8249_v39, %v1584_v24  ;;  %v1585_v8 = vadd.f32 %v1482_v58, %v1197_v46  ;;  %v1880_v45 = vrot.slane %v1878_v35, 1  ;;  %v8508_v24 = vpop.f32.mrf.mxu1 }
 0x1fc   : > { %v1484_v34 = vpop.f32.mrf.mxu0  ;;  %v1873_v40 = vsel %vm697_vm2, %v1868_v22, %v1872_v6  ;;  %v8486_v9 = vsel %vm1294_vm3, %v2731_v31, %v2735_v17  ;;  %v1882_v31 = vshrl.u32 %v8432_v12, 16  ;;  %v1209_v49 = vadd.f32 %v8244_v25, %v10425_v50  ;;  %v10426_v22 = vld [vmem:[#allocation31_spill] sm:$0xff] }
 0x1fd   : > { %v8488_v41 = vpack.c.bf16 %v1707_v11, %v1705_v2  ;;  %v1708_v30 = vmax.f32 %v1652_v36, 0.0  ;;  %v1586_v46 = vadd.f32 %v1484_v34, %v1199_v53  ;;  %2944 = vmatpush1.bf16.msra.mxu1 %v6971_v56  ;;  %v1653_v0 = vadd.f32 %v8242_v51, %v1585_v8  ;;  %v6979_v53 = vld [vmem:[%s10311_s3 + $0x144] ss:$8 sps:$4 sm:$0xff]   ;;  %v6977_v36 = vld [vmem:[%s10311_s3 + $0x140] ss:$8 sps:$4 sm:$0xff]   ;;  %v8539_v7 = vpop.f32.mrf.mxu1 }
 0x1fe   : > { %v1486_v52 = vpop.f32.mrf.mxu0  ;;  %v1881_v47 = vsel %vm697_vm2, %v1876_v59, %v1880_v45  ;;  %2945 = vmatprep.subr.bf16.mxu1 %v6976_v26  ;;  %v1211_v43 = vadd.f32 %v8254_v57, %v10426_v22  ;;  %v1890_v56 = vshrl.u32 %v8449_v29, 16  ;;  %v1884_v2 = vor.u32 %v1882_v31, %v1872_v6  ;;  %v6980_v6 = vld [vmem:[%s10311_s3 + $0x1d4] ss:$8 sps:$4 sm:$0x3f]  }
 0x1ff   : > { %v8505_v10 = vpack.c.bf16 %v1708_v30, %v1706_v37  ;;  %v1587_v54 = vadd.f32 %v1486_v52, %v1201_v42  ;;  %6313 = vmatprep.mubr.msk.bf16.mxu1 %vm827_vm1, %v1881_v47  ;;  %v1886_v58 = vshll.u32 %v8488_v41, 16  ;;  %v2737_v26 = vrot.slane %v8488_v41, 1 }
 0x200   : > { %2255 = vmatmul.mubr.bf16.gmra.mxu1 %v1873_v40  ;;  %v1488_v35 = vpop.f32.mrf.mxu0  ;;  %v1654_v25 = vadd.f32 %v8249_v39, %v1586_v46  ;;  %v1709_v8 = vmax.f32 %v1653_v0, 0.0  ;;  %v1892_v52 = vor.u32 %v1890_v56, %v1880_v45  ;;  %v1898_v45 = vshrl.u32 %v8488_v41, 16 }
 0x201   : > { %v1655_v57 = vadd.f32 %v8242_v51, %v1587_v54  ;;  %v1588_v11 = vadd.f32 %v1488_v35, %v1203_v48  ;;  %6350 = vmatprep.mubr.msk.bf16.mxu0 %vm827_vm1, %v8505_v10  ;;  %v1894_v42 = vshll.u32 %v8505_v10, 16  ;;  %2946 = vmatpush1.bf16.msra.mxu1 %v6974_v13  ;;  %v1888_v28 = vrot.slane %v1886_v58, 1  ;;  %v6982_v48 = vld [vmem:[%s10311_s3 + $0x1d0] ss:$8 sps:$4 sm:$0x3f]   ;;  %v10428_v54 = vld [vmem:[#allocation33_spill] sm:$0xff] }
 0x202   : > { %v1492_v4 = vpop.f32.mrf.mxu0  ;;  %2580 = vmatmul.mubr.bf16.gmra.mxu0 %v8488_v41  ;;  %2947 = vmatprep.subr.bf16.mxu1 %v6979_v53  ;;  %v2739_v34 = vrot.slane %v8505_v10, 1  ;;  %v8534_v59 = vsel %vm1294_vm3, %v2733_v44, %v2737_v26  ;;  %v10427_v13 = vld [vmem:[#allocation32_spill] sm:$0xff]  ;;  %v1710_v44 = vmax.f32 %v1654_v25, 0.0  ;;  %v2928_v29 = vsel %vm870_vm0, %v6982_v48, 0  ;;  %v8564_v25 = vpop.f32.mrf.mxu1 }
 0x203   : > { %v1711_v40 = vmax.f32 %v1655_v57, 0.0  ;;  %v1656_v37 = vadd.f32 %v8249_v39, %v1588_v11  ;;  %v1589_v30 = vadd.f32 %v1492_v4, %v1207_v15  ;;  %v1896_v46 = vrot.slane %v1894_v42, 1 }
 0x204   : > { %v1213_v38 = vadd.f32 %v8265_v62, %v10427_v13  ;;  %v1494_v0 = vpop.f32.mrf.mxu0  ;;  %v1889_v47 = vsel %vm697_vm2, %v1884_v2, %v1888_v28  ;;  %v8545_v12 = vsel %vm1294_vm3, %v2735_v17, %v2739_v34  ;;  %v6985_v17 = vld [vmem:[%s10311_s3 + $0x1c4] ss:$8 sps:$4 sm:$0xff]   ;;  %v1217_v35 = vadd.f32 %v8272_v16, %v10428_v54 }
 0x205   : > { %v8547_v31 = vpack.c.bf16 %v1711_v40, %v1709_v8  ;;  %v1712_v53 = vmax.f32 %v1656_v37, 0.0  ;;  %v1590_v15 = vadd.f32 %v1494_v0, %v1209_v49  ;;  %2948 = vmatpush1.bf16.msra.mxu1 %v6977_v36  ;;  %v1657_v50 = vadd.f32 %v8242_v51, %v1589_v30  ;;  %v10429_v49 = vld [vmem:[#allocation34_spill] sm:$0xff] }
 0x206   : > { %v1496_v62 = vpop.f32.mrf.mxu0  ;;  %v1897_v22 = vsel %vm697_vm2, %v1892_v52, %v1896_v46  ;;  %6399 = vmatprep.subr.msk.bf16.mxu1 %vm870_vm0, %v6980_v6  ;;  %v1219_v56 = vadd.f32 %v8291_v61, %v10429_v49  ;;  %v1906_v11 = vshrl.u32 %v8505_v10, 16  ;;  %v1900_v42 = vor.u32 %v1898_v45, %v1888_v28  ;;  %v6983_v10 = vld [vmem:[%s10311_s3 + $0x1c0] ss:$8 sps:$4 sm:$0xff]  }
 0x207   : > { %v8561_v2 = vpack.c.bf16 %v1712_v53, %v1710_v44  ;;  %v1591_v58 = vadd.f32 %v1496_v62, %v1211_v43  ;;  %6314 = vmatprep.mubr.msk.bf16.mxu1 %vm827_vm1, %v1897_v22  ;;  %v1902_v36 = vshll.u32 %v8547_v31, 16  ;;  %v2741_v6 = vrot.slane %v8547_v31, 1  ;;  %v10430_v52 = vld [vmem:[#allocation35_spill] sm:$0xff]  ;;  %v8587_v44 = vpop.f32.mrf.mxu1 }
 0x208   : > { %2265 = vmatmul.mubr.bf16.gmra.mxu1 %v1889_v47  ;;  %v1498_v57 = vpop.f32.mrf.mxu0  ;;  %v1658_v16 = vadd.f32 %v8249_v39, %v1590_v15  ;;  %v1713_v4 = vmax.f32 %v1657_v50, 0.0  ;;  %v1221_v47 = vadd.f32 %v8303_v63, %v10430_v52  ;;  %v1908_v15 = vor.u32 %v1906_v11, %v1896_v46 }
 0x209   : > { %v1659_v61 = vadd.f32 %v8242_v51, %v1591_v58  ;;  %v1592_v8 = vadd.f32 %v1498_v57, %v1213_v38  ;;  %6351 = vmatprep.mubr.msk.bf16.mxu0 %vm827_vm1, %v8561_v2  ;;  %v1910_v43 = vshll.u32 %v8561_v2, 16  ;;  %2962 = vmatpush2.bf16.msra.mxu1 %v2928_v29  ;;  %v1904_v48 = vrot.slane %v1902_v36, 1  ;;  %v10431_v29 = vld [vmem:[#allocation36_spill] sm:$0xff]  ;;  %v10434_v57 = vld [vmem:[#allocation38_spill] sm:$0xff] }
 0x20a   : > { %v1502_v28 = vpop.f32.mrf.mxu0  ;;  %2590 = vmatmul.mubr.bf16.gmra.mxu0 %v8547_v31  ;;  %2963 = vmatprep.subr.bf16.mxu1 %v6985_v17  ;;  %v2743_v40 = vrot.slane %v8561_v2, 1  ;;  %v8582_v37 = vsel %vm1294_vm3, %v2737_v26, %v2741_v6  ;;  %v1714_v41 = vmax.f32 %v1658_v16, 0.0  ;;  %v1223_v17 = vadd.f32 %v8320_v1, %v10431_v29  ;;  %v8608_v1 = vpop.f32.mrf.mxu1 }
 0x20b   : > { %v1715_v30 = vmax.f32 %v1659_v61, 0.0  ;;  %v1660_v13 = vadd.f32 %v8249_v39, %v1592_v8  ;;  %v1593_v38 = vadd.f32 %v1502_v28, %v1217_v35  ;;  %v1912_v0 = vrot.slane %v1910_v43, 1 }
 0x20c   : > { %v1504_v53 = vpop.f32.mrf.mxu0  ;;  %v1905_v50 = vsel %vm697_vm2, %v1900_v42, %v1904_v48  ;;  %v8591_v62 = vsel %vm1294_vm3, %v2739_v34, %v2743_v40  ;;  %v1914_v46 = vshrl.u32 %v8547_v31, 16  ;;  %v10432_v49 = vmov 0   ;;  %v10433_v34 = vld [vmem:[#allocation37_spill] sm:$0xff] }
 0x20d   : > { %v8593_v26 = vpack.c.bf16 %v1715_v30, %v1713_v4  ;;  %v1716_v22 = vmax.f32 %v1660_v13, 0.0  ;;  %v1594_v45 = vadd.f32 %v1504_v53, %v1219_v56  ;;  %2964 = vmatpush2.bf16.msra.mxu1 %v6983_v10  ;;  %v1661_v63 = vadd.f32 %v8242_v51, %v1593_v38  ;;  %v10435_v53 = vld [vmem:[#allocation39_spill] sm:$0xff] }
 0x20e   : > { %v1506_v54 = vpop.f32.mrf.mxu0  ;;  %v1913_v35 = vsel %vm697_vm2, %v1908_v15, %v1912_v0  ;;  %4018 = vmatprep.subr.bf16.mxu1 %v10432_v49  ;;  %v1227_v58 = vadd.f32 %v8346_v55, %v10433_v34  ;;  %v1229_v11 = vadd.f32 %v8372_v5, %v10434_v57  ;;  %v1922_v16 = vshrl.u32 %v8561_v2, 16  ;;  %v10437_v57 = vld [vmem:[#allocation41_spill] sm:$0xff] }
 0x20f   : > { %v8605_v56 = vpack.c.bf16 %v1716_v22, %v1714_v41  ;;  %v1595_v42 = vadd.f32 %v1506_v54, %v1221_v47  ;;  %6315 = vmatprep.mubr.msk.bf16.mxu1 %vm827_vm1, %v1913_v35  ;;  %v1916_v31 = vor.u32 %v1914_v46, %v1904_v48  ;;  %v1918_v61 = vshll.u32 %v8593_v26, 16  ;;  %v10436_v35 = vld [vmem:[#allocation40_spill] sm:$0xff] }
 0x210   : > { %2275 = vmatmul.mubr.bf16.gmra.mxu1 %v1905_v50  ;;  %v1508_v36 = vpop.f32.mrf.mxu0  ;;  %v2745_v8 = vrot.slane %v8593_v26, 1  ;;  %v1662_v55 = vadd.f32 %v8249_v39, %v1594_v45  ;;  %v1717_v4 = vmax.f32 %v1661_v63, 0.0  ;;  %v1231_v15 = vadd.f32 %v8398_v19, %v10435_v53  ;;  %v8626_v50 = vpop.f32.mrf.mxu1 }
 0x211   : > { %v1663_v5 = vadd.f32 %v8242_v51, %v1595_v42  ;;  %v1596_v43 = vadd.f32 %v1508_v36, %v1223_v17  ;;  %6352 = vmatprep.mubr.msk.bf16.mxu0 %vm827_vm1, %v8605_v56  ;;  %v1926_v10 = vshll.u32 %v8605_v56, 16  ;;  %v1920_v2 = vrot.slane %v1918_v61, 1 }
 0x212   : > { %v1512_v28 = vpop.f32.mrf.mxu0  ;;  %2600 = vmatmul.mubr.bf16.gmra.mxu0 %v8593_v26  ;;  %v2747_v48 = vrot.slane %v8605_v56, 1  ;;  %v8621_v30 = vsel %vm1294_vm3, %v2741_v6, %v2745_v8  ;;  %v1924_v22 = vor.u32 %v1922_v16, %v1912_v0  ;;  %v1718_v17 = vmax.f32 %v1662_v55, 0.0 }
 0x213   : > { %v1719_v13 = vmax.f32 %v1663_v5, 0.0  ;;  %v1664_v38 = vadd.f32 %v8249_v39, %v1596_v43  ;;  %v1597_v52 = vadd.f32 %v1512_v28, %v1227_v58  ;;  %v1928_v47 = vrot.slane %v1926_v10, 1 }
 0x214   : > { %v1514_v41 = vpop.f32.mrf.mxu0  ;;  %v1921_v45 = vsel %vm697_vm2, %v1916_v31, %v1920_v2  ;;  %v8630_v29 = vsel %vm1294_vm3, %v2743_v40, %v2747_v48  ;;  %v1233_v46 = vadd.f32 %v8426_v3, %v10436_v35  ;;  %v1930_v0 = vshrl.u32 %v8593_v26, 16  ;;  %v10438_v40 = vld [vmem:[#allocation42_spill] sm:$0xff] }
 0x215   : > { %v8632_v6 = vpack.c.bf16 %v1719_v13, %v1717_v4  ;;  %v1720_v63 = vmax.f32 %v1664_v38, 0.0  ;;  %v1598_v54 = vadd.f32 %v1514_v41, %v1229_v11  ;;  %v1665_v34 = vadd.f32 %v8242_v51, %v1597_v52  ;;  %v8646_v11 = vpop.f32.mrf.mxu1  ;;  %v10439_v41 = vld [vmem:[#allocation43_spill] sm:$0xff] }
 0x216   : > { %v1516_v19 = vpop.f32.mrf.mxu0  ;;  %v1929_v58 = vsel %vm697_vm2, %v1924_v22, %v1928_v47  ;;  %v1237_v42 = vadd.f32 %v8452_v20, %v10437_v57  ;;  %v1239_v36 = vadd.f32 %v8480_v23, %v10438_v40  ;;  %v1938_v61 = vshrl.u32 %v8605_v56, 16  ;;  %v10441_v40 = vld [vmem:[#allocation45_spill] sm:$0xff] }
 0x217   : > { %v8643_v16 = vpack.c.bf16 %v1720_v63, %v1718_v17  ;;  %v1599_v31 = vadd.f32 %v1516_v19, %v1231_v15  ;;  %6316 = vmatprep.mubr.msk.bf16.mxu1 %vm827_vm1, %v1929_v58  ;;  %v1932_v55 = vor.u32 %v1930_v0, %v1920_v2  ;;  %v1934_v26 = vshll.u32 %v8632_v6, 16  ;;  %v10440_v58 = vld [vmem:[#allocation44_spill] sm:$0xff] }
 0x218   : > { %2285 = vmatmul.mubr.bf16.gmra.mxu1 %v1921_v45  ;;  %v1518_v3 = vpop.f32.mrf.mxu0  ;;  %v2749_v5 = vrot.slane %v8632_v6, 1  ;;  %v1666_v20 = vadd.f32 %v8249_v39, %v1598_v54  ;;  %v1721_v4 = vmax.f32 %v1665_v34, 0.0  ;;  %v1241_v22 = vadd.f32 %v8508_v24, %v10439_v41  ;;  %v1258_v45 = vpop.f32.mrf.mxu1 }
 0x219   : > { %v1667_v23 = vadd.f32 %v8242_v51, %v1599_v31  ;;  %v1600_v43 = vadd.f32 %v1518_v3, %v1233_v46  ;;  %6353 = vmatprep.mubr.msk.bf16.mxu0 %vm827_vm1, %v8643_v16  ;;  %v1942_v10 = vshll.u32 %v8643_v16, 16  ;;  %v1936_v56 = vrot.slane %v1934_v26, 1 }
 0x21a   : > { %v1522_v28 = vpop.f32.mrf.mxu0  ;;  %2610 = vmatmul.mubr.bf16.gmra.mxu0 %v8632_v6  ;;  %v2751_v2 = vrot.slane %v8643_v16, 1  ;;  %v8659_v13 = vsel %vm1294_vm3, %v2745_v8, %v2749_v5  ;;  %v1940_v63 = vor.u32 %v1938_v61, %v1928_v47  ;;  %v1722_v46 = vmax.f32 %v1666_v20, 0.0 }
 0x21b   : > { %v1723_v38 = vmax.f32 %v1667_v23, 0.0  ;;  %v1668_v52 = vadd.f32 %v8249_v39, %v1600_v43  ;;  %v1601_v53 = vadd.f32 %v1522_v28, %v1237_v42  ;;  %v1944_v15 = vrot.slane %v1942_v10, 1 }
 0x21c   : > { %v1524_v17 = vpop.f32.mrf.mxu0  ;;  %v1937_v54 = vsel %vm697_vm2, %v1932_v55, %v1936_v56  ;;  %v8666_v35 = vsel %vm1294_vm3, %v2747_v48, %v2751_v2  ;;  %v1243_v0 = vadd.f32 %v8539_v7, %v10440_v58  ;;  %v1946_v47 = vshrl.u32 %v8632_v6, 16  ;;  %v10442_v48 = vld [vmem:[#allocation46_spill] sm:$0xff] }
 0x21d   : > { %v8668_v34 = vpack.c.bf16 %v1723_v38, %v1721_v4  ;;  %v1724_v8 = vmax.f32 %v1668_v52, 0.0  ;;  %v1602_v19 = vadd.f32 %v1524_v17, %v1239_v36  ;;  %v1669_v57 = vadd.f32 %v8242_v51, %v1601_v53  ;;  %v8682_v36 = vpop.f32.mrf.mxu1  ;;  %v10443_v17 = vld [vmem:[#allocation47_spill] sm:$0xff] }
 0x21e   : > { %v1526_v42 = vpop.f32.mrf.mxu0  ;;  %v1945_v24 = vsel %vm697_vm2, %v1940_v63, %v1944_v15  ;;  %v1247_v31 = vadd.f32 %v8564_v25, %v10441_v40  ;;  %v1249_v3 = vadd.f32 %v8587_v44, %v10442_v48  ;;  %v1954_v26 = vshrl.u32 %v8643_v16, 16  ;;  %v10445_v48 = vld [vmem:[#allocation49_spill] sm:$0xff] }
 0x21f   : > { %v8679_v61 = vpack.c.bf16 %v1724_v8, %v1722_v46  ;;  %v1603_v55 = vadd.f32 %v1526_v42, %v1241_v22  ;;  %6317 = vmatprep.mubr.msk.bf16.mxu1 %vm827_vm1, %v1945_v24  ;;  %v1948_v20 = vor.u32 %v1946_v47, %v1936_v56  ;;  %v1950_v6 = vshll.u32 %v8668_v34, 16  ;;  %v10444_v24 = vld [vmem:[#allocation48_spill] sm:$0xff] }
 0x220   : > { %2295 = vmatmul.mubr.bf16.gmra.mxu1 %v1937_v54  ;;  %v1528_v7 = vpop.f32.mrf.mxu0  ;;  %v2753_v23 = vrot.slane %v8668_v34, 1  ;;  %v1670_v25 = vadd.f32 %v8249_v39, %v1602_v19  ;;  %v1725_v4 = vmax.f32 %v1669_v57, 0.0  ;;  %v1251_v63 = vadd.f32 %v8608_v1, %v10443_v17  ;;  %v1262_v54 = vpop.f32.mrf.mxu1 }
 0x221   : > { %v1671_v44 = vadd.f32 %v8242_v51, %v1603_v55  ;;  %v1604_v43 = vadd.f32 %v1528_v7, %v1243_v0  ;;  %6354 = vmatprep.mubr.msk.bf16.mxu0 %vm827_vm1, %v8679_v61  ;;  %v1958_v10 = vshll.u32 %v8679_v61, 16  ;;  %v1952_v16 = vrot.slane %v1950_v6, 1 }
 0x222   : > { %v1532_v28 = vpop.f32.mrf.mxu0  ;;  %2620 = vmatmul.mubr.bf16.gmra.mxu0 %v8668_v34  ;;  %v2755_v56 = vrot.slane %v8679_v61, 1  ;;  %v8695_v38 = vsel %vm1294_vm3, %v2749_v5, %v2753_v23  ;;  %v1956_v8 = vor.u32 %v1954_v26, %v1944_v15  ;;  %v1726_v0 = vmax.f32 %v1670_v25, 0.0 }
 0x223   : > { %v1727_v52 = vmax.f32 %v1671_v44, 0.0  ;;  %v1672_v53 = vadd.f32 %v8249_v39, %v1604_v43  ;;  %v1605_v41 = vadd.f32 %v1532_v28, %v1247_v31  ;;  %v1960_v22 = vrot.slane %v1958_v10, 1 }
 0x224   : > { %v1534_v46 = vpop.f32.mrf.mxu0  ;;  %v1953_v19 = vsel %vm697_vm2, %v1948_v20, %v1952_v16  ;;  %v8702_v58 = vsel %vm1294_vm3, %v2751_v2, %v2755_v56  ;;  %v1253_v47 = vadd.f32 %v8626_v50, %v10444_v24  ;;  %v1962_v15 = vshrl.u32 %v8668_v34, 16  ;;  %v10446_v2 = vld [vmem:[#allocation51_spill] sm:$0xff] }
 0x225   : > { %v8704_v57 = vpack.c.bf16 %v1727_v52, %v1725_v4  ;;  %v1728_v5 = vmax.f32 %v1672_v53, 0.0  ;;  %v1606_v42 = vadd.f32 %v1534_v46, %v1249_v3  ;;  %v1673_v40 = vadd.f32 %v8242_v51, %v1605_v41  ;;  %v1266_v3 = vpop.f32.mrf.mxu1  ;;  %v10447_v46 = vld [vmem:[#allocation52_spill] sm:$0xff] }
 0x226   : > { %v1536_v31 = vpop.f32.mrf.mxu0  ;;  %v1961_v1 = vsel %vm697_vm2, %v1956_v8, %v1960_v22  ;;  %v1257_v55 = vadd.f32 %v8646_v11, %v10445_v48  ;;  %v1259_v7 = vadd.f32 %v1258_v45, %v10446_v2  ;;  %v1970_v6 = vshrl.u32 %v8679_v61, 16 }
 0x227   : > { %v8714_v26 = vpack.c.bf16 %v1728_v5, %v1726_v0  ;;  %v1607_v20 = vadd.f32 %v1536_v31, %v1251_v63  ;;  %6318 = vmatprep.mubr.msk.bf16.mxu1 %vm827_vm1, %v1961_v1  ;;  %v1964_v25 = vor.u32 %v1962_v15, %v1952_v16  ;;  %v1966_v44 = vshll.u32 %v8704_v57, 16  ;;  %v10448_v1 = vld [vmem:[#allocation54_spill] sm:$0xff] }
 0x228   : > { %2305 = vmatmul.mubr.bf16.gmra.mxu1 %v1953_v19  ;;  %v1538_v50 = vpop.f32.mrf.mxu0  ;;  %v2757_v34 = vrot.slane %v8704_v57, 1  ;;  %v1674_v43 = vadd.f32 %v8249_v39, %v1606_v42  ;;  %v1729_v4 = vmax.f32 %v1673_v40, 0.0  ;;  %v1261_v8 = vadd.f32 %v8682_v36, %v10447_v46  ;;  %v1268_v19 = vpop.f32.mrf.mxu1 }
 0x229   : > { %v1675_v11 = vadd.f32 %v8242_v51, %v1607_v20  ;;  %v1608_v45 = vadd.f32 %v1538_v50, %v1253_v47  ;;  %6355 = vmatprep.mubr.msk.bf16.mxu0 %vm827_vm1, %v8714_v26  ;;  %v1974_v10 = vshll.u32 %v8714_v26, 16  ;;  %v1968_v61 = vrot.slane %v1966_v44, 1  ;;  %v10450_v50 = vld [vmem:[#allocation57_spill] sm:$0xff] }
 0x22a   : > { %v1542_v28 = vpop.f32.mrf.mxu0  ;;  %2630 = vmatmul.mubr.bf16.gmra.mxu0 %v8704_v57  ;;  %v2759_v16 = vrot.slane %v8714_v26, 1  ;;  %v8728_v52 = vsel %vm1294_vm3, %v2753_v23, %v2757_v34  ;;  %v1972_v5 = vor.u32 %v1970_v6, %v1960_v22  ;;  %v1730_v47 = vmax.f32 %v1674_v43, 0.0  ;;  %v10449_v22 = vld [vmem:[#allocation55_spill] sm:$0xff]  ;;  %v1270_v44 = vpop.f32.mrf.mxu1 }
 0x22b   : > { %v1731_v53 = vmax.f32 %v1675_v11, 0.0  ;;  %v1676_v41 = vadd.f32 %v8249_v39, %v1608_v45  ;;  %v1609_v17 = vadd.f32 %v1542_v28, %v1257_v55  ;;  %v1976_v63 = vrot.slane %v1974_v10, 1 }
 0x22c   : > { %v1544_v0 = vpop.f32.mrf.mxu0  ;;  %v1969_v42 = vsel %vm697_vm2, %v1964_v25, %v1968_v61  ;;  %v8735_v24 = vsel %vm1294_vm3, %v2755_v56, %v2759_v16  ;;  %v1263_v15 = vadd.f32 %v1262_v54, %v10448_v1  ;;  %v1978_v2 = vshrl.u32 %v8704_v57, 16 }
 0x22d   : > { %v8737_v40 = vpack.c.bf16 %v1731_v53, %v1729_v4  ;;  %v1732_v23 = vmax.f32 %v1676_v41, 0.0  ;;  %v1610_v31 = vadd.f32 %v1544_v0, %v1259_v7  ;;  %v1677_v48 = vadd.f32 %v8242_v51, %v1609_v17  ;;  %v10451_v0 = vld [vmem:[#allocation58_spill] sm:$0xff] }
 0x22e   : > { %v1546_v55 = vpop.f32.mrf.mxu0  ;;  %v1977_v36 = vsel %vm697_vm2, %v1972_v5, %v1976_v63  ;;  %v1267_v20 = vadd.f32 %v1266_v3, %v10449_v22  ;;  %v1269_v6 = vadd.f32 %v1268_v19, %v10450_v50  ;;  %v1986_v54 = vshrl.u32 %v8714_v26, 16 }
 0x22f   : > { %v8745_v56 = vpack.c.bf16 %v1732_v23, %v1730_v47  ;;  %v1611_v25 = vadd.f32 %v1546_v55, %v1261_v8  ;;  %6319 = vmatprep.mubr.msk.bf16.mxu1 %vm827_vm1, %v1977_v36  ;;  %v1980_v43 = vor.u32 %v1978_v2, %v1968_v61  ;;  %v1982_v11 = vshll.u32 %v8737_v40, 16 }
 0x230   : > { %2315 = vmatmul.mubr.bf16.gmra.mxu1 %v1969_v42  ;;  %v1548_v7 = vpop.f32.mrf.mxu0  ;;  %v2761_v45 = vrot.slane %v8737_v40, 1  ;;  %v1678_v57 = vadd.f32 %v8249_v39, %v1610_v31  ;;  %v1733_v28 = vmax.f32 %v1677_v48, 0.0  ;;  %v1271_v5 = vadd.f32 %v1270_v44, %v10451_v0  ;;  %v1272_v42 = vpop.f32.mrf.mxu1 }
 0x231   : > { %v1679_v3 = vadd.f32 %v8242_v51, %v1611_v25  ;;  %v1612_v10 = vadd.f32 %v1548_v7, %v1263_v15  ;;  %6356 = vmatprep.mubr.msk.bf16.mxu0 %vm827_vm1, %v8745_v56  ;;  %v1990_v4 = vshll.u32 %v8745_v56, 16  ;;  %v1984_v26 = vrot.slane %v1982_v11, 1 }
 0x232   : > { %v1552_v53 = vpop.f32.mrf.mxu0  ;;  %2640 = vmatmul.mubr.bf16.gmra.mxu0 %v8737_v40  ;;  %v2763_v61 = vrot.slane %v8745_v56, 1  ;;  %v8759_v41 = vsel %vm1294_vm3, %v2757_v34, %v2761_v45  ;;  %v1988_v23 = vor.u32 %v1986_v54, %v1976_v63  ;;  %v1734_v15 = vmax.f32 %v1678_v57, 0.0 }
 0x233   : > { %v1735_v17 = vmax.f32 %v1679_v3, 0.0  ;;  %v1680_v46 = vadd.f32 %v8249_v39, %v1612_v10  ;;  %v1613_v8 = vadd.f32 %v1552_v53, %v1267_v20  ;;  %v1992_v19 = vrot.slane %v1990_v4, 1  ;;  %v10452_v20 = vld [vmem:[#allocation61_spill] sm:$0xff] }
 0x234   : > { %v1554_v47 = vpop.f32.mrf.mxu0  ;;  %v1985_v31 = vsel %vm697_vm2, %v1980_v43, %v1984_v26  ;;  %v8765_v1 = vsel %vm1294_vm3, %v2759_v16, %v2763_v61  ;;  %v1994_v22 = vshrl.u32 %v8737_v40, 16  ;;  %v1273_v50 = vadd.f32 %v1272_v42, %v10452_v20 }
 0x235   : > { %v1765_v48 = vpack.c.bf16 %v1735_v17, %v1733_v28  ;;  %v1736_v55 = vmax.f32 %v1680_v46, 0.0  ;;  %v1614_v34 = vadd.f32 %v1554_v47, %v1269_v6  ;;  %v1993_v2 = vsel %vm697_vm2, %v1988_v23, %v1992_v19 }
 0x236   : > { %v1556_v36 = vpop.f32.mrf.mxu0  ;;  %v1681_v44 = vadd.f32 %v8242_v51, %v1613_v8  ;;  %6320 = vmatprep.mubr.msk.bf16.mxu1 %vm827_vm1, %v1993_v2  ;;  %v2002_v7 = vshrl.u32 %v8745_v56, 16  ;;  %v1996_v54 = vor.u32 %v1994_v22, %v1984_v26 }
 0x237   : > { %v1766_v25 = vpack.c.bf16 %v1736_v55, %v1734_v15  ;;  %v1615_v63 = vadd.f32 %v1556_v36, %v1271_v5  ;;  %v1998_v43 = vshll.u32 %v1765_v48, 16  ;;  %v2765_v6 = vrot.slane %v1765_v48, 1 }
 0x238   : > { %2325 = vmatmul.mubr.bf16.gmra.mxu1 %v1985_v31  ;;  %v1558_v16 = vpop.f32.mrf.mxu0  ;;  %v1682_v11 = vadd.f32 %v8249_v39, %v1614_v34  ;;  %v2004_v10 = vor.u32 %v2002_v7, %v1992_v19  ;;  %v1737_v17 = vmax.f32 %v1681_v44, 0.0  ;;  %v2010_v47 = vshrl.u32 %v1765_v48, 16 }
 0x239   : > { %v1683_v57 = vadd.f32 %v8242_v51, %v1615_v63  ;;  %v1616_v40 = vadd.f32 %v1558_v16, %v1273_v50  ;;  %6357 = vmatprep.mubr.msk.bf16.mxu0 %vm827_vm1, %v1766_v25  ;;  %v2006_v3 = vshll.u32 %v1766_v25, 16  ;;  %v2000_v4 = vrot.slane %v1998_v43, 1 }
 0x23a   : > { %2650 = vmatmul.mubr.bf16.gmra.mxu0 %v1765_v48  ;;  %v2767_v28 = vrot.slane %v1766_v25, 1  ;;  %v8777_v53 = vsel %vm1294_vm3, %v2761_v45, %v2765_v6  ;;  %v1738_v0 = vmax.f32 %v1682_v11, 0.0  ;;  %v2018_v31 = vshrl.u32 %v1766_v25, 16 }
 0x23b   : > { %v1739_v56 = vmax.f32 %v1683_v57, 0.0  ;;  %v1684_v26 = vadd.f32 %v8249_v39, %v1616_v40  ;;  %v2008_v46 = vrot.slane %v2006_v3, 1  ;;  %v2001_v8 = vsel %vm697_vm2, %v1996_v54, %v2000_v4 }
 0x23c   : > { %v8782_v51 = vsel %vm1294_vm3, %v2763_v61, %v2767_v28  ;;  %v2012_v15 = vor.u32 %v2010_v47, %v2000_v4 }
 0x23d   : > { %v8784_v5 = vpack.c.bf16 %v1739_v56, %v1737_v17  ;;  %v1740_v42 = vmax.f32 %v1684_v26, 0.0  ;;  %v2009_v19 = vsel %vm697_vm2, %v2004_v10, %v2008_v46  ;;  %v2020_v36 = vor.u32 %v2018_v31, %v2008_v46 }
 0x23e   : > { %6321 = vmatprep.mubr.msk.bf16.mxu1 %vm827_vm1, %v2009_v19 }
 0x23f   : > { %v8788_v45 = vpack.c.bf16 %v1740_v42, %v1738_v0  ;;  %v2014_v23 = vshll.u32 %v8784_v5, 16  ;;  %v2769_v39 = vrot.slane %v8784_v5, 1  ;;  %v2026_v63 = vshrl.u32 %v8784_v5, 16 }
 0x240   : > { %2335 = vmatmul.mubr.bf16.gmra.mxu1 %v2001_v8 }
 0x241   : > { %6358 = vmatprep.mubr.msk.bf16.mxu0 %vm827_vm1, %v8788_v45  ;;  %v2022_v61 = vshll.u32 %v8788_v45, 16  ;;  %v2016_v55 = vrot.slane %v2014_v23, 1  ;;  %v2771_v34 = vrot.slane %v8788_v45, 1  ;;  %v8800_v48 = vsel %vm1294_vm3, %v2765_v6, %v2769_v39 }
 0x242   : > { %2660 = vmatmul.mubr.bf16.gmra.mxu0 %v8784_v5  ;;  %v2029_v20 = vshrl.u32 %v8788_v45, 16 }
 0x243   : > { %v2024_v2 = vrot.slane %v2022_v61, 1  ;;  %v2017_v22 = vsel %vm697_vm2, %v2012_v15, %v2016_v55  ;;  %v2772_v50 = vsel %vm1294_vm3, %v2767_v28, %v2771_v34  ;;  %v2028_v16 = vor.u32 %v2026_v63, %v2016_v55 }
 0x245   : > { %v2025_v25 = vsel %vm697_vm2, %v2020_v36, %v2024_v2  ;;  %v2031_v44 = vor.u32 %v2029_v20, %v2024_v2 }
 0x246   : > { %6322 = vmatprep.mubr.msk.bf16.mxu1 %vm827_vm1, %v2025_v25 }
 0x248   : > { %2345 = vmatmul.mubr.bf16.gmra.mxu1 %v2017_v22 }
 0x249   : > { %6323 = vmatprep.mubr.msk.bf16.mxu1 %vm827_vm1, %v2031_v44 }
 0x250   : > { %2355 = vmatmul.mubr.bf16.gmra.mxu1 %v2028_v16 }
 0x251   : > { %6400 = vmatprep.mubr.msk.bf16.mxu1 %vm827_vm1, %v8324_v18 }
 0x258   : > { %2966 = vmatmul.mubr.bf16.vlgmr.msra.gmra.mxu1 %v8315_v60 }
 0x259   : > { %6401 = vmatprep.mubr.msk.bf16.mxu1 %vm827_vm1, %v8376_v21 }
 0x260   : > { %2976 = vmatmul.mubr.bf16.gmra.mxu1 %v8367_v32 }
 0x261   : > { %6402 = vmatprep.mubr.msk.bf16.mxu1 %vm827_vm1, %v8430_v33 }
 0x268   : > { %2986 = vmatmul.mubr.bf16.gmra.mxu1 %v8421_v14 }
 0x269   : > { %6403 = vmatprep.mubr.msk.bf16.mxu1 %vm827_vm1, %v8486_v9 }
 0x270   : > { %2996 = vmatmul.mubr.bf16.gmra.mxu1 %v8475_v27 }
 0x271   : > { %6404 = vmatprep.mubr.msk.bf16.mxu1 %vm827_vm1, %v8545_v12 }
 0x278   : > { %3006 = vmatmul.mubr.bf16.gmra.mxu1 %v8534_v59 }
 0x279   : > { %6405 = vmatprep.mubr.msk.bf16.mxu1 %vm827_vm1, %v8591_v62 }
 0x280   : > { %3016 = vmatmul.mubr.bf16.gmra.mxu1 %v8582_v37 }
 0x281   : > { %6406 = vmatprep.mubr.msk.bf16.mxu1 %vm827_vm1, %v8630_v29 }
 0x288   : > { %3026 = vmatmul.mubr.bf16.gmra.mxu1 %v8621_v30 }
 0x289   : > { %6407 = vmatprep.mubr.msk.bf16.mxu1 %vm827_vm1, %v8666_v35 }
 0x290   : > { %3036 = vmatmul.mubr.bf16.gmra.mxu1 %v8659_v13 }
 0x291   : > { %6408 = vmatprep.mubr.msk.bf16.mxu1 %vm827_vm1, %v8702_v58 }
 0x298   : > { %3046 = vmatmul.mubr.bf16.gmra.mxu1 %v8695_v38 }
 0x299   : > { %6409 = vmatprep.mubr.msk.bf16.mxu1 %vm827_vm1, %v8735_v24 }
 0x29a   : > { %v2531_v60 = vpop.f32.mrf.mxu0 }
 0x29c   : > { %v2533_v18 = vpop.f32.mrf.mxu0 }
 0x29e   : > { %v2535_v32 = vpop.f32.mrf.mxu0 }
 0x2a0   : > { %3056 = vmatmul.mubr.bf16.gmra.mxu1 %v8728_v52  ;;  %v8841_v21 = vpop.f32.mrf.mxu0 }
 0x2a1   : > { %6410 = vmatprep.mubr.msk.bf16.mxu1 %vm827_vm1, %v8765_v1 }
 0x2a2   : > { %v2541_v14 = vpop.f32.mrf.mxu0 }
 0x2a4   : > { %v2543_v33 = vpop.f32.mrf.mxu0 }
 0x2a6   : > { %v2545_v27 = vpop.f32.mrf.mxu0 }
 0x2a8   : > { %v2226_v9 = vpop.f32.mrf.mxu1  ;;  %3066 = vmatmul.mubr.bf16.gmra.mxu1 %v8759_v41  ;;  %v8846_v59 = vpop.f32.mrf.mxu0 }
 0x2a9   : > { %v8848_v12 = vadd.f32 %v2531_v60, %v2226_v9  ;;  %6411 = vmatprep.mubr.msk.bf16.mxu1 %vm827_vm1, %v8782_v51 }
 0x2aa   : > { %v2228_v37 = vpop.f32.mrf.mxu1  ;;  %v2551_v62 = vpop.f32.mrf.mxu0 }
 0x2ab   : > { %v8852_v30 = vadd.f32 %v2533_v18, %v2228_v37 }
 0x2ac   : > { %v2230_v29 = vpop.f32.mrf.mxu1  ;;  %v2553_v13 = vpop.f32.mrf.mxu0 }
 0x2ad   : > { %v8854_v35 = vadd.f32 %v2535_v32, %v2230_v29 }
 0x2ae   : > { %v8856_v38 = vpop.f32.mrf.mxu1  ;;  %v2555_v58 = vpop.f32.mrf.mxu0 }
 0x2b0   : > { %v2236_v52 = vpop.f32.mrf.mxu1  ;;  %3076 = vmatmul.mubr.bf16.gmra.mxu1 %v8777_v53  ;;  %v8859_v24 = vpop.f32.mrf.mxu0 }
 0x2b1   : > { %v8861_v41 = vadd.f32 %v2541_v14, %v2236_v52  ;;  %6412 = vmatprep.mubr.msk.bf16.mxu1 %vm827_vm1, %v2772_v50 }
 0x2b2   : > { %v2238_v1 = vpop.f32.mrf.mxu1  ;;  %v8864_v7 = vpop.f32.mrf.mxu0 }
 0x2b3   : > { %v8866_v54 = vadd.f32 %v2543_v33, %v2238_v1 }
 0x2b4   : > { %v2240_v43 = vpop.f32.mrf.mxu1  ;;  %v8868_v6 = vpop.f32.mrf.mxu0 }
 0x2b5   : > { %v8870_v11 = vadd.f32 %v2545_v27, %v2240_v43 }
 0x2b6   : > { %v8872_v57 = vpop.f32.mrf.mxu1  ;;  %v8874_v40 = vpop.f32.mrf.mxu0 }
 0x2b8   : > { %v2246_v3 = vpop.f32.mrf.mxu1  ;;  %3086 = vmatmul.mubr.bf16.gmra.mxu1 %v8800_v48  ;;  %v8877_v10 = vpop.f32.mrf.mxu0 }
 0x2b9   : > { %v8879_v4 = vadd.f32 %v2551_v62, %v2246_v3  ;;  %6413 = vmatprep.mubr.msk.bf16.mxu1 %vm827_vm1, %v2771_v34 }
 0x2ba   : > { %v2248_v28 = vpop.f32.mrf.mxu1  ;;  %v8884_v53 = vpop.f32.mrf.mxu0 }
 0x2bb   : > { %v8886_v17 = vadd.f32 %v2553_v13, %v2248_v28 }
 0x2bc   : > { %v2250_v56 = vpop.f32.mrf.mxu1  ;;  %v8888_v26 = vpop.f32.mrf.mxu0 }
 0x2bd   : > { %v8890_v46 = vadd.f32 %v2555_v58, %v2250_v56 }
 0x2be   : > { %v8892_v8 = vpop.f32.mrf.mxu1  ;;  %v8894_v51 = vpop.f32.mrf.mxu0 }
 0x2c0   : > { %v8896_v0 = vpop.f32.mrf.mxu1  ;;  %3096 = vmatmul.mubr.bf16.gmra.mxu1 %v2769_v39  ;;  %v8900_v42 = vpop.f32.mrf.mxu0 }
 0x2c2   : > { %v8902_v19 = vpop.f32.mrf.mxu1  ;;  %v8904_v45 = vpop.f32.mrf.mxu0 }
 0x2c4   : > { %v8906_v47 = vpop.f32.mrf.mxu1  ;;  %v8908_v23 = vpop.f32.mrf.mxu0 }
 0x2c6   : > { %v8910_v31 = vpop.f32.mrf.mxu1  ;;  %v8912_v61 = vpop.f32.mrf.mxu0 }
 0x2c8   : > { %v8914_v15 = vpop.f32.mrf.mxu1  ;;  %v8916_v55 = vpop.f32.mrf.mxu0 }
 0x2ca   : > { %v8918_v5 = vpop.f32.mrf.mxu1  ;;  %v8920_v39 = vpop.f32.mrf.mxu0 }
 0x2cc   : > { %v8922_v34 = vpop.f32.mrf.mxu1  ;;  %v8924_v36 = vpop.f32.mrf.mxu0 }
 0x2ce   : > { %v8926_v48 = vpop.f32.mrf.mxu1  ;;  %v8928_v2 = vpop.f32.mrf.mxu0 }
 0x2d0   : > { %v8930_v22 = vpop.f32.mrf.mxu1  ;;  %v8932_v20 = vpop.f32.mrf.mxu0 }
 0x2d1   : > { %10453 = vst [vmem:[#allocation26_spill] sm:$0xff] %v8932_v20 }
 0x2d2   : > { %v8934_v50 = vpop.f32.mrf.mxu1  ;;  %v8936_v25 = vpop.f32.mrf.mxu0 }
 0x2d3   : > { %10454 = vst [vmem:[#allocation50_spill] sm:$0xff] %v8936_v25 }
 0x2d4   : > { %v8938_v44 = vpop.f32.mrf.mxu1  ;;  %v8942_v16 = vpop.f32.mrf.mxu0 }
 0x2d5   : > { %10455 = vst [vmem:[#allocation27_spill] sm:$0xff] %v8942_v16 }
 0x2d6   : > { %v8940_v63 = vpop.f32.mrf.mxu1  ;;  %v8948_v32 = vpop.f32.mrf.mxu0 }
 0x2d7   : > { %10456 = vst [vmem:[#allocation53_spill] sm:$0xff] %v8948_v32 }
 0x2d8   : > { %v8944_v60 = vpop.f32.mrf.mxu1  ;;  %v8954_v27 = vpop.f32.mrf.mxu0 }
 0x2d9   : > { %10458 = vst [vmem:[#allocation56_spill] sm:$0xff] %v8954_v27 }
 0x2da   : > { %v8946_v18 = vpop.f32.mrf.mxu1  ;;  %v8960_v62 = vpop.f32.mrf.mxu0 }
 0x2db   : > { %10461 = vst [vmem:[#allocation30_spill] sm:$0xff] %v8960_v62 }
 0x2dc   : > { %v8950_v14 = vpop.f32.mrf.mxu1  ;;  %v8966_v58 = vpop.f32.mrf.mxu0 }
 0x2dd   : > { %10464 = vst [vmem:[#allocation33_spill] sm:$0xff] %v8966_v58 }
 0x2de   : > { %v8952_v33 = vpop.f32.mrf.mxu1  ;;  %v2615_v43 = vpop.f32.mrf.mxu0 }
 0x2df   : > { %10457 = vst [vmem:[#allocation28_spill] sm:$0xff] %v8952_v33 }
 0x2e0   : > { %v8956_v9 = vpop.f32.mrf.mxu1 }
 0x2e1   : > { %10459 = vst [vmem:[#allocation29_spill] sm:$0xff] %v8956_v9 }
 0x2e2   : > { %v8958_v37 = vpop.f32.mrf.mxu1 }
 0x2e3   : > { %10460 = vst [vmem:[#allocation60_spill] sm:$0xff] %v8958_v37 }
 0x2e4   : > { %v8962_v29 = vpop.f32.mrf.mxu1 }
 0x2e5   : > { %10462 = vst [vmem:[#allocation31_spill] sm:$0xff] %v8962_v29 }
 0x2e6   : > { %v8964_v13 = vpop.f32.mrf.mxu1 }
 0x2e7   : > { %10463 = vst [vmem:[#allocation32_spill] sm:$0xff] %v8964_v13 }
 0x2e8   : > { %v8968_v52 = vpop.f32.mrf.mxu1 }
 0x2e9   : > { %10465 = vst [vmem:[#allocation34_spill] sm:$0xff] %v8968_v52 }
 0x2ea   : > { %v8970_v1 = vpop.f32.mrf.mxu1 }
 0x2eb   : > { %10466 = vst [vmem:[#allocation35_spill] sm:$0xff] %v8970_v1 }
 0x2ec   : > { %v2310_v3 = vpop.f32.mrf.mxu1 }
 0x2ed   : > { %v8972_v28 = vadd.f32 %v2615_v43, %v2310_v3 }
 0x2ee   : > { %v8974_v56 = vpop.f32.mrf.mxu1 }
 0x2ef   : > { %10467 = vst [vmem:[#allocation36_spill] sm:$0xff] %v8972_v28  ;;  %10468 = vst [vmem:[#allocation37_spill] sm:$0xff] %v8974_v56 }
 0x2f0   : > { %v8976_v49 = vpop.f32.mrf.mxu1 }
 0x2f1   : > { %10469 = vst [vmem:[#allocation38_spill] sm:$0xff] %v8976_v49 }
 0x2f2   : > { %v8978_v27 = vpop.f32.mrf.mxu1 }
 0x2f3   : > { %10470 = vst [vmem:[#allocation39_spill] sm:$0xff] %v8978_v27 }
 0x2f4   : > { %v8980_v62 = vpop.f32.mrf.mxu1 }
 0x2f5   : > { %10471 = vst [vmem:[#allocation40_spill] sm:$0xff] %v8980_v62 }
 0x2f6   : > { %v8982_v32 = vpop.f32.mrf.mxu1 }
 0x2f7   : > { %10472 = vst [vmem:[#allocation41_spill] sm:$0xff] %v8982_v32 }
 0x2f8   : > { %v8984_v13 = vpop.f32.mrf.mxu1 }
 0x2f9   : > { %10473 = vst [vmem:[#allocation42_spill] sm:$0xff] %v8984_v13 }
 0x2fa   : > { %v8986_v58 = vpop.f32.mrf.mxu1 }
 0x2fb   : > { %10474 = vst [vmem:[#allocation43_spill] sm:$0xff] %v8986_v58 }
 0x2fc   : > { %v8988_v52 = vpop.f32.mrf.mxu1 }
 0x2fd   : > { %10475 = vst [vmem:[#allocation44_spill] sm:$0xff] %v8988_v52 }
 0x2fe   : > { %v8990_v1 = vpop.f32.mrf.mxu1 }
 0x2ff   : > { %10476 = vst [vmem:[#allocation45_spill] sm:$0xff] %v8990_v1 }
 0x300   : > { %v8992_v43 = vpop.f32.mrf.mxu1 }
 0x301   : > { %10477 = vst [vmem:[#allocation46_spill] sm:$0xff] %v8992_v43  ;;  %v3162_v43 = vld [vmem:[#allocation5] sm:$0x3] }
 0x302   : > { %v8994_v3 = vpop.f32.mrf.mxu1 }
 0x303   : > { %10478 = vst [vmem:[#allocation47_spill] sm:$0xff] %v8994_v3 }
 0x304   : > { %v8996_v28 = vpop.f32.mrf.mxu1 }
 0x305   : > { %10479 = vst [vmem:[#allocation48_spill] sm:$0xff] %v8996_v28  ;;  %v10489_v28 = vld [vmem:[#allocation59_spill] sm:$0xff] }
 0x306   : > { %v8998_v49 = vpop.f32.mrf.mxu1  ;;  %v9017_v56 = vrot.slane %v3162_v43, %v10489_v28 }
 0x307   : > { %10480 = vst [vmem:[#allocation49_spill] sm:$0xff] %v8998_v49 }
 0x308   : > { %v9000_v27 = vpop.f32.mrf.mxu1 }
 0x309   : > { %10481 = vst [vmem:[#allocation51_spill] sm:$0xff] %v9000_v27 }
 0x30a   : > { %v9002_v62 = vpop.f32.mrf.mxu1 }
 0x30b   : > { %10482 = vst [vmem:[#allocation52_spill] sm:$0xff] %v9002_v62  ;;  %v10490_v62 = vld [vmem:[#allocation62_spill] sm:$0xff] }
 0x30c   : > { %v9004_v32 = vpop.f32.mrf.mxu1  ;;  %v9021_v29 = vrot.slane %v3162_v43, %v10490_v62 }
 0x30d   : > { %10483 = vst [vmem:[#allocation54_spill] sm:$0xff] %v9004_v32 }
 0x30e   : > { %v9006_v13 = vpop.f32.mrf.mxu1 }
 0x30f   : > { %10484 = vst [vmem:[#allocation55_spill] sm:$0xff] %v9006_v13 }
 0x310   : > { %v9008_v58 = vpop.f32.mrf.mxu1 }
 0x311   : > { %10485 = vst [vmem:[#allocation57_spill] sm:$0xff] %v9008_v58 }
 0x312   : > { %v9010_v52 = vpop.f32.mrf.mxu1 }
 0x313   : > { %10486 = vst [vmem:[#allocation58_spill] sm:$0xff] %v9010_v52 }
 0x314   : > { %v9012_v1 = vpop.f32.mrf.mxu1 }
 0x315   : > { %10487 = vst [vmem:[#allocation61_spill] sm:$0xff] %v9012_v1  ;;  %v2538_v1 = vadd.f32 %v8841_v21, %v8856_v38 }
 0x316   : > { %v9014_v3 = vpop.f32.mrf.mxu1 }
 0x317   : > { %10488 = vst [vmem:[#allocation63_spill] sm:$0xff] %v9014_v3 }
 0x318   : > { %v2967_v49 = vpop.f32.mrf.mxu1 }
 0x319   : > { %v3106_v27 = vadd.f32 %v2967_v49, %v8848_v12 }
 0x31a   : > { %v2969_v32 = vpop.f32.mrf.mxu1 }
 0x31b   : > { %v3174_v13 = vadd.f32 %v9017_v56, %v3106_v27  ;;  %v3107_v58 = vadd.f32 %v2969_v32, %v8852_v30 }
 0x31c   : > { %v2971_v52 = vpop.f32.mrf.mxu1 }
 0x31d   : > { %v3175_v3 = vadd.f32 %v9021_v29, %v3107_v58  ;;  %v3108_v28 = vadd.f32 %v2971_v52, %v8854_v35  ;;  %v3230_v16 = vmax.f32 %v3174_v13, 0.0  ;;  %v2548_v13 = vadd.f32 %v8846_v59, %v8872_v57 }
 0x31e   : > { %v2973_v37 = vpop.f32.mrf.mxu1 }
 0x31f   : > { %v3176_v49 = vadd.f32 %v9017_v56, %v3108_v28  ;;  %v3109_v12 = vadd.f32 %v2973_v37, %v2538_v1  ;;  %v3231_v43 = vmax.f32 %v3175_v3, 0.0  ;;  %v3343_v32 = vrot.slane %v3230_v16, 1 }
 0x320   : > { %v2977_v62 = vpop.f32.mrf.mxu1 }
 0x321   : > { %v3232_v25 = vmax.f32 %v3176_v49, 0.0  ;;  %v3177_v27 = vadd.f32 %v9021_v29, %v3109_v12  ;;  %v3110_v30 = vadd.f32 %v2977_v62, %v8861_v41  ;;  %v3346_v58 = vrot.slane %v3231_v43, 1 }
 0x322   : > { %v2979_v9 = vpop.f32.mrf.mxu1 }
 0x323   : > { %v3344_v20 = vrot.slane %v3232_v25, 1  ;;  %v3233_v21 = vmax.f32 %v3177_v27, 0.0  ;;  %v3178_v38 = vadd.f32 %v9017_v56, %v3110_v30  ;;  %v3111_v35 = vadd.f32 %v2979_v9, %v8866_v54 }
 0x324   : > { %v2981_v37 = vpop.f32.mrf.mxu1 }
 0x325   : > { %v3345_v52 = vsel %vm1294_vm3, %v3343_v32, %v3344_v20  ;;  %v3347_v1 = vrot.slane %v3233_v21, 1  ;;  %v3234_v28 = vmax.f32 %v3178_v38, 0.0  ;;  %v9038_v3 = vadd.f32 %v9021_v29, %v3111_v35 }
 0x326   : > { %v3112_v41 = vadd.f32 %v2981_v37, %v8870_v11  ;;  %v2983_v62 = vpop.f32.mrf.mxu1  ;;  %v9041_v49 = vmax.f32 %v3230_v16, %v3345_v52  ;;  %v2558_v11 = vadd.f32 %v8859_v24, %v8892_v8 }
 0x327   : > { %v3349_v12 = vrot.slane %v3234_v28, 1  ;;  %v3235_v54 = vmax.f32 %v9038_v3, 0.0  ;;  %v3113_v9 = vadd.f32 %v2983_v62, %v2548_v13  ;;  %v3348_v59 = vsel %vm1294_vm3, %v3346_v58, %v3347_v1  ;;  %v6988_v62 = vld [vmem:[#allocation7 + $0x4] ss:$8 sps:$4 sm:$0xff]  }
 0x328   : > { %10491 = vst [vmem:[#allocation64_spill] sm:$0xff] %v9041_v49  ;;  %v3180_v57 = vadd.f32 %v9017_v56, %v3112_v41  ;;  %v2987_v27 = vpop.f32.mrf.mxu1  ;;  %v9051_v52 = vmax.f32 %v3231_v43, %v3348_v59  ;;  %6426 = vmatprep.mubr.msk.bf16.mxu0 %vm3659_vm4, %v6988_v62 }
 0x329   : > { %v3350_v30 = vsel %vm1294_vm3, %v3344_v20, %v3349_v12  ;;  %v3351_v32 = vrot.slane %v3235_v54, 1  ;;  %v3181_v38 = vadd.f32 %v9021_v29, %v3113_v9  ;;  %v3114_v35 = vadd.f32 %v2987_v27, %v8879_v4 }
 0x32a   : > { %v3236_v16 = vmax.f32 %v3180_v57, 0.0  ;;  %v2989_v37 = vpop.f32.mrf.mxu1  ;;  %10492 = vst [vmem:[#allocation65_spill] sm:$0xff] %v9051_v52  ;;  %v9053_v13 = vmax.f32 %v3232_v25, %v3350_v30 }
 0x32b   : > { %v3237_v58 = vmax.f32 %v3181_v38, 0.0  ;;  %v3182_v3 = vadd.f32 %v9017_v56, %v3114_v35  ;;  %v3115_v41 = vadd.f32 %v2989_v37, %v8886_v17  ;;  %v3352_v20 = vsel %vm1294_vm3, %v3347_v1, %v3351_v32 }
 0x32c   : > { %10493 = vst [vmem:[#allocation66_spill] sm:$0xff] %v9053_v13  ;;  %v3353_v9 = vrot.slane %v3236_v16, 1  ;;  %v2991_v33 = vpop.f32.mrf.mxu1  ;;  %v9058_v4 = vmax.f32 %v3233_v21, %v3352_v20  ;;  %v2562_v35 = vadd.f32 %v8864_v7, %v8896_v0  ;;  %v2568_v7 = vadd.f32 %v8877_v10, %v8910_v31 }
 0x32d   : > { %v3355_v8 = vrot.slane %v3237_v58, 1  ;;  %v3238_v43 = vmax.f32 %v3182_v3, 0.0  ;;  %v9063_v25 = vadd.f32 %v9021_v29, %v3115_v41  ;;  %v3116_v59 = vadd.f32 %v2991_v33, %v8890_v46 }
 0x32e   : > { %10494 = vst [vmem:[#allocation67_spill] sm:$0xff] %v9058_v4  ;;  %v3354_v17 = vsel %vm1294_vm3, %v3349_v12, %v3353_v9  ;;  %v2993_v1 = vpop.f32.mrf.mxu1  ;;  %v2564_v46 = vadd.f32 %v8868_v6, %v8902_v19  ;;  %v9087_v19 = vpop.f32.mrf.mxu0 }
 0x32f   : > { %v3357_v57 = vrot.slane %v3238_v43, 1  ;;  %v3239_v27 = vmax.f32 %v9063_v25, 0.0  ;;  %v3184_v30 = vadd.f32 %v9017_v56, %v3116_v59  ;;  %v3117_v38 = vadd.f32 %v2993_v1, %v2558_v11 }
 0x330   : > { %v2997_v33 = vpop.f32.mrf.mxu1  ;;  %v3356_v37 = vsel %vm1294_vm3, %v3351_v32, %v3355_v8  ;;  %v9077_v12 = vmax.f32 %v3234_v28, %v3354_v17  ;;  %v2566_v11 = vadd.f32 %v8874_v40, %v8906_v47 }
 0x331   : > { %v3358_v3 = vsel %vm1294_vm3, %v3353_v9, %v3357_v57  ;;  %v3359_v41 = vrot.slane %v3239_v27, 1  ;;  %v3240_v20 = vmax.f32 %v3184_v30, 0.0  ;;  %v3185_v62 = vadd.f32 %v9021_v29, %v3117_v38 }
 0x332   : > { %10495 = vst [vmem:[#allocation68_spill] sm:$0xff] %v9077_v12  ;;  %v3118_v0 = vadd.f32 %v2997_v33, %v2562_v35  ;;  %v2999_v25 = vpop.f32.mrf.mxu1  ;;  %v9085_v6 = vmax.f32 %v3236_v16, %v3358_v3  ;;  %v9091_v30 = vmax.f32 %v3235_v54, %v3356_v37  ;;  %v9107_v33 = vpop.f32.mrf.mxu0 }
 0x333   : > { %v3361_v28 = vrot.slane %v3240_v20, 1  ;;  %v3241_v32 = vmax.f32 %v3185_v62, 0.0  ;;  %v3119_v59 = vadd.f32 %v2999_v25, %v2564_v46  ;;  %v3360_v9 = vsel %vm1294_vm3, %v3355_v8, %v3359_v41 }
 0x334   : > { %10496 = vst [vmem:[#allocation69_spill] sm:$0xff] %v9085_v6  ;;  %v3186_v17 = vadd.f32 %v9017_v56, %v3118_v0  ;;  %v3001_v1 = vpop.f32.mrf.mxu1  ;;  %v9093_v40 = vmax.f32 %v3237_v58, %v3360_v9  ;;  %v2572_v58 = vadd.f32 %v8884_v53, %v8914_v15  ;;  %v2574_v62 = vadd.f32 %v8888_v26, %v8918_v5 }
 0x335   : > { %v3362_v47 = vsel %vm1294_vm3, %v3357_v57, %v3361_v28  ;;  %v3363_v31 = vrot.slane %v3241_v32, 1  ;;  %v9099_v16 = vadd.f32 %v9021_v29, %v3119_v59  ;;  %v3120_v38 = vadd.f32 %v3001_v1, %v2566_v11 }
 0x336   : > { %v3242_v35 = vmax.f32 %v3186_v17, 0.0  ;;  %v3003_v46 = vpop.f32.mrf.mxu1  ;;  %v9101_v8 = vmax.f32 %v3238_v43, %v3362_v47  ;;  %v2576_v53 = vadd.f32 %v8894_v51, %v8922_v34  ;;  %v9118_v47 = vpop.f32.mrf.mxu0 }
 0x337   : > { %v3243_v37 = vmax.f32 %v9099_v16, 0.0  ;;  %v3188_v57 = vadd.f32 %v9017_v56, %v3120_v38  ;;  %v3121_v3 = vadd.f32 %v3003_v46, %v2568_v7  ;;  %v3364_v43 = vsel %vm1294_vm3, %v3359_v41, %v3363_v31 }
 0x338   : > { %v3365_v11 = vrot.slane %v3242_v35, 1  ;;  %v3007_v0 = vpop.f32.mrf.mxu1  ;;  %v2578_v41 = vadd.f32 %v8900_v42, %v8926_v48  ;;  %v2582_v48 = vadd.f32 %v8904_v45, %v8930_v22 }
 0x339   : > { %v3367_v25 = vrot.slane %v3243_v37, 1  ;;  %v3244_v59 = vmax.f32 %v3188_v57, 0.0  ;;  %v3189_v9 = vadd.f32 %v9021_v29, %v3121_v3  ;;  %v3122_v17 = vadd.f32 %v3007_v0, %v2572_v58 }
 0x33a   : > { %v3366_v15 = vsel %vm1294_vm3, %v3361_v28, %v3365_v11  ;;  %v3009_v1 = vpop.f32.mrf.mxu1  ;;  %v9124_v58 = vmax.f32 %v3239_v27, %v3364_v43  ;;  %v9140_v27 = vpop.f32.mrf.mxu0  ;;  %v2584_v43 = vadd.f32 %v8908_v23, %v8934_v50  ;;  %v2588_v23 = vadd.f32 %v8916_v55, %v8940_v63  ;;  %v10505_v55 = vld [vmem:[#allocation32_spill] sm:$0xff] }
 0x33b   : > { %v3369_v7 = vrot.slane %v3244_v59, 1  ;;  %v3245_v16 = vmax.f32 %v3189_v9, 0.0  ;;  %v3190_v26 = vadd.f32 %v9017_v56, %v3122_v17  ;;  %v3123_v5 = vadd.f32 %v3009_v1, %v2574_v62 }
 0x33c   : > { %v3011_v38 = vpop.f32.mrf.mxu1  ;;  %v3368_v46 = vsel %vm1294_vm3, %v3363_v31, %v3367_v25  ;;  %v9126_v57 = vmax.f32 %v3240_v20, %v3366_v15 }
 0x33d   : > { %v3370_v51 = vsel %vm1294_vm3, %v3365_v11, %v3369_v7  ;;  %v3371_v34 = vrot.slane %v3245_v16, 1  ;;  %v3246_v28 = vmax.f32 %v3190_v26, 0.0  ;;  %v9130_v3 = vadd.f32 %v9021_v29, %v3123_v5 }
 0x33e   : > { %v3124_v0 = vadd.f32 %v3011_v38, %v2576_v53  ;;  %v3013_v9 = vpop.f32.mrf.mxu1  ;;  %v9132_v62 = vmax.f32 %v3242_v35, %v3370_v51  ;;  %v9134_v17 = vmax.f32 %v3241_v32, %v3368_v46  ;;  %v2586_v5 = vadd.f32 %v8912_v61, %v8938_v44 }
 0x33f   : > { %v3373_v20 = vrot.slane %v3246_v28, 1  ;;  %v3247_v31 = vmax.f32 %v9130_v3, 0.0  ;;  %v3125_v11 = vadd.f32 %v3013_v9, %v2578_v41  ;;  %v3372_v32 = vsel %vm1294_vm3, %v3367_v25, %v3371_v34  ;;  %v9157_v25 = vpop.f32.mrf.mxu0 }
 0x340   : > { %v3192_v35 = vadd.f32 %v9017_v56, %v3124_v0  ;;  %v3017_v53 = vpop.f32.mrf.mxu1 }
 0x341   : > { %v3374_v1 = vsel %vm1294_vm3, %v3369_v7, %v3373_v20  ;;  %v3375_v45 = vrot.slane %v3247_v31, 1  ;;  %v3193_v22 = vadd.f32 %v9021_v29, %v3125_v11  ;;  %v3126_v26 = vadd.f32 %v3017_v53, %v2582_v48  ;;  %v9173_v53 = vpop.f32.mrf.mxu0 }
 0x342   : > { %v3248_v50 = vmax.f32 %v3192_v35, 0.0  ;;  %v3019_v41 = vpop.f32.mrf.mxu1  ;;  %v9155_v38 = vmax.f32 %v3244_v59, %v3374_v1  ;;  %v9161_v48 = vmax.f32 %v3243_v37, %v3372_v32 }
 0x343   : > { %v3249_v46 = vmax.f32 %v3193_v22, 0.0  ;;  %v3194_v51 = vadd.f32 %v9017_v56, %v3126_v26  ;;  %v3127_v7 = vadd.f32 %v3019_v41, %v2584_v43  ;;  %v3376_v3 = vsel %vm1294_vm3, %v3371_v34, %v3375_v45 }
 0x344   : > { %v3377_v0 = vrot.slane %v3248_v50, 1  ;;  %v3021_v9 = vpop.f32.mrf.mxu1  ;;  %v9163_v61 = vmax.f32 %v3245_v16, %v3376_v3  ;;  %v2592_v22 = vadd.f32 %v8920_v39, %v8944_v60  ;;  %v2594_v26 = vadd.f32 %v8924_v36, %v8946_v18  ;;  %v9192_v18 = vpop.f32.mrf.mxu0 }
 0x345   : > { %v3379_v44 = vrot.slane %v3249_v46, 1  ;;  %v3250_v63 = vmax.f32 %v3194_v51, 0.0  ;;  %v9168_v59 = vadd.f32 %v9021_v29, %v3127_v7  ;;  %v3128_v11 = vadd.f32 %v3021_v9, %v2586_v5 }
 0x346   : > { %v3378_v35 = vsel %vm1294_vm3, %v3373_v20, %v3377_v0  ;;  %v3023_v43 = vpop.f32.mrf.mxu1 }
 0x347   : > { %v3381_v37 = vrot.slane %v3250_v63, 1  ;;  %v3251_v16 = vmax.f32 %v9168_v59, 0.0  ;;  %v3196_v32 = vadd.f32 %v9017_v56, %v3128_v11  ;;  %v3129_v1 = vadd.f32 %v3023_v43, %v2588_v23  ;;  %v10497_v59 = vld [vmem:[#allocation28_spill] sm:$0xff]  ;;  %v10498_v11 = vld [vmem:[#allocation26_spill] sm:$0xff] }
 0x348   : > { %v3027_v5 = vpop.f32.mrf.mxu1  ;;  %v3380_v20 = vsel %vm1294_vm3, %v3375_v45, %v3379_v44  ;;  %v9182_v41 = vmax.f32 %v3246_v28, %v3378_v35  ;;  %v2596_v23 = vadd.f32 %v8928_v2, %v8950_v14  ;;  %v2598_v39 = vadd.f32 %v10498_v11, %v10497_v59  ;;  %v9212_v11 = vpop.f32.mrf.mxu0 }
 0x349   : > { %v3382_v51 = vsel %vm1294_vm3, %v3377_v0, %v3381_v37  ;;  %v3383_v7 = vrot.slane %v3251_v16, 1  ;;  %v3252_v3 = vmax.f32 %v3196_v32, 0.0  ;;  %v3197_v9 = vadd.f32 %v9021_v29, %v3129_v1 }
 0x34a   : > { %v3130_v60 = vadd.f32 %v3027_v5, %v2592_v22  ;;  %v3029_v43 = vpop.f32.mrf.mxu1  ;;  %v9190_v36 = vmax.f32 %v3248_v50, %v3382_v51  ;;  %v9196_v24 = vmax.f32 %v3247_v31, %v3380_v20  ;;  %v10499_v20 = vld [vmem:[#allocation29_spill] sm:$0xff] }
 0x34b   : > { %v3385_v28 = vrot.slane %v3252_v3, 1  ;;  %v3253_v45 = vmax.f32 %v3197_v9, 0.0  ;;  %v3131_v35 = vadd.f32 %v3029_v43, %v2594_v26  ;;  %v3384_v0 = vsel %vm1294_vm3, %v3379_v44, %v3383_v7 }
 0x34c   : > { %v3198_v32 = vadd.f32 %v9017_v56, %v3130_v60  ;;  %v3031_v1 = vpop.f32.mrf.mxu1  ;;  %v9198_v2 = vmax.f32 %v3249_v46, %v3384_v0  ;;  %v10500_v46 = vld [vmem:[#allocation50_spill] sm:$0xff]  ;;  %v10502_v0 = vld [vmem:[#allocation27_spill] sm:$0xff] }
 0x34d   : > { %v3386_v50 = vsel %vm1294_vm3, %v3381_v37, %v3385_v28  ;;  %v3387_v22 = vrot.slane %v3253_v45, 1  ;;  %v9204_v5 = vadd.f32 %v9021_v29, %v3131_v35  ;;  %v3132_v51 = vadd.f32 %v3031_v1, %v2596_v23  ;;  %v10501_v35 = vld [vmem:[#allocation60_spill] sm:$0xff] }
 0x34e   : > { %v3254_v26 = vmax.f32 %v3198_v32, 0.0  ;;  %v3033_v9 = vpop.f32.mrf.mxu1  ;;  %v9206_v44 = vmax.f32 %v3250_v63, %v3386_v50  ;;  %v2602_v59 = vadd.f32 %v10500_v46, %v10499_v20  ;;  %v2604_v23 = vadd.f32 %v10502_v0, %v10501_v35  ;;  %v10503_v20 = vld [vmem:[#allocation31_spill] sm:$0xff]  ;;  %v10504_v46 = vld [vmem:[#allocation53_spill] sm:$0xff] }
 0x34f   : > { %v3255_v60 = vmax.f32 %v9204_v5, 0.0  ;;  %v3200_v37 = vadd.f32 %v9017_v56, %v3132_v51  ;;  %v3133_v43 = vadd.f32 %v3033_v9, %v2598_v39  ;;  %v3388_v63 = vsel %vm1294_vm3, %v3383_v7, %v3387_v22  ;;  %v9223_v51 = vpop.f32.mrf.mxu0  ;;  %v10506_v7 = vld [vmem:[#allocation56_spill] sm:$0xff] }
 0x350   : > { %v3389_v32 = vrot.slane %v3254_v26, 1  ;;  %v3037_v1 = vpop.f32.mrf.mxu1  ;;  %v2606_v42 = vadd.f32 %v10504_v46, %v10503_v20  ;;  %v2608_v34 = vadd.f32 %v10506_v7, %v10505_v55  ;;  %v10510_v7 = vld [vmem:[#allocation33_spill] sm:$0xff] }
 0x351   : > { %v3391_v50 = vrot.slane %v3255_v60, 1  ;;  %v3256_v21 = vmax.f32 %v3200_v37, 0.0  ;;  %v3201_v10 = vadd.f32 %v9021_v29, %v3133_v43  ;;  %v3134_v54 = vadd.f32 %v3037_v1, %v2602_v59  ;;  %v10511_v55 = vld [vmem:[#allocation37_spill] sm:$0xff] }
 0x352   : > { %v3390_v5 = vsel %vm1294_vm3, %v3385_v28, %v3389_v32  ;;  %v3039_v15 = vpop.f32.mrf.mxu1  ;;  %v9229_v59 = vmax.f32 %v3251_v16, %v3388_v63  ;;  %v10507_v16 = vld [vmem:[#allocation34_spill] sm:$0xff]  ;;  %v9245_v63 = vpop.f32.mrf.mxu0 }
 0x353   : > { %v3393_v39 = vrot.slane %v3256_v21, 1  ;;  %v3257_v9 = vmax.f32 %v3201_v10, 0.0  ;;  %v3202_v35 = vadd.f32 %v9017_v56, %v3134_v54  ;;  %v3135_v0 = vadd.f32 %v3039_v15, %v2604_v23 }
 0x354   : > { %v3041_v37 = vpop.f32.mrf.mxu1  ;;  %v3392_v43 = vsel %vm1294_vm3, %v3387_v22, %v3391_v50  ;;  %v9231_v1 = vmax.f32 %v3252_v3, %v3390_v5  ;;  %v10508_v22 = vld [vmem:[#allocation30_spill] sm:$0xff] }
 0x355   : > { %v3394_v28 = vsel %vm1294_vm3, %v3389_v32, %v3393_v39  ;;  %v3395_v20 = vrot.slane %v3257_v9, 1  ;;  %v3258_v46 = vmax.f32 %v3202_v35, 0.0  ;;  %v9235_v14 = vadd.f32 %v9021_v29, %v3135_v0  ;;  %v10509_v0 = vld [vmem:[#allocation35_spill] sm:$0xff] }
 0x356   : > { %v3136_v10 = vadd.f32 %v3041_v37, %v2606_v42  ;;  %v3043_v54 = vpop.f32.mrf.mxu1  ;;  %v9237_v15 = vmax.f32 %v3254_v26, %v3394_v28  ;;  %v9239_v23 = vmax.f32 %v3253_v45, %v3392_v43  ;;  %v2612_v3 = vadd.f32 %v10508_v22, %v10507_v16 }
 0x357   : > { %v3397_v32 = vrot.slane %v3258_v46, 1  ;;  %v3259_v5 = vmax.f32 %v9235_v14, 0.0  ;;  %v3137_v35 = vadd.f32 %v3043_v54, %v2608_v34  ;;  %v2614_v42 = vadd.f32 %v10510_v7, %v10509_v0 }
 0x358   : > { %v3204_v26 = vadd.f32 %v9017_v56, %v3136_v10  ;;  %v3047_v37 = vpop.f32.mrf.mxu1  ;;  %v3396_v45 = vsel %vm1294_vm3, %v3391_v50, %v3395_v20  ;;  %v2618_v34 = vadd.f32 %v9087_v19, %v10511_v55  ;;  %v9260_v10 = vpop.f32.mrf.mxu0 }
 0x359   : > { %v3398_v28 = vsel %vm1294_vm3, %v3393_v39, %v3397_v32  ;;  %v3399_v16 = vrot.slane %v3259_v5, 1  ;;  %v3205_v22 = vadd.f32 %v9021_v29, %v3137_v35  ;;  %v3138_v31 = vadd.f32 %v3047_v37, %v2612_v3 }
 0x35a   : > { %v3260_v14 = vmax.f32 %v3204_v26, 0.0  ;;  %v3049_v54 = vpop.f32.mrf.mxu1  ;;  %v9258_v0 = vmax.f32 %v3256_v21, %v3398_v28  ;;  %v9264_v52 = vmax.f32 %v3255_v60, %v3396_v45  ;;  %v10512_v26 = vld [vmem:[#allocation36_spill] sm:$0xff]  ;;  %v9275_v28 = vpop.f32.mrf.mxu0 }
 0x35b   : > { %v3261_v7 = vmax.f32 %v3205_v22, 0.0  ;;  %v3206_v50 = vadd.f32 %v9017_v56, %v3138_v31  ;;  %v3139_v49 = vadd.f32 %v3049_v54, %v2614_v42  ;;  %v3400_v43 = vsel %vm1294_vm3, %v3395_v20, %v3399_v16  ;;  %v10513_v22 = vld [vmem:[#allocation38_spill] sm:$0xff] }
 0x35c   : > { %v3401_v39 = vrot.slane %v3260_v14, 1  ;;  %v3051_v13 = vpop.f32.mrf.mxu1  ;;  %v9266_v3 = vmax.f32 %v3257_v9, %v3400_v43  ;;  %v2622_v54 = vadd.f32 %v9107_v33, %v10513_v22  ;;  %v9294_v4 = vpop.f32.mrf.mxu0 }
 0x35d   : > { %v3403_v55 = vrot.slane %v3261_v7, 1  ;;  %v3262_v21 = vmax.f32 %v3206_v50, 0.0  ;;  %v3207_v35 = vadd.f32 %v9021_v29, %v3139_v49  ;;  %v3140_v37 = vadd.f32 %v3051_v13, %v10512_v26  ;;  %v10514_v49 = vld [vmem:[#allocation39_spill] sm:$0xff] }
 0x35e   : > { %v3402_v31 = vsel %vm1294_vm3, %v3397_v32, %v3401_v39  ;;  %v3053_v42 = vpop.f32.mrf.mxu1  ;;  %v3590_v20 = vpack.c.bf16 %v9266_v3, %v9264_v52  ;;  %v2624_v13 = vadd.f32 %v9118_v47, %v10514_v49 }
 0x35f   : > { %v3405_v60 = vrot.slane %v3262_v21, 1  ;;  %v3263_v9 = vmax.f32 %v3207_v35, 0.0  ;;  %v9278_v45 = vadd.f32 %v9017_v56, %v3140_v37  ;;  %v3141_v43 = vadd.f32 %v3053_v42, %v2618_v34  ;;  %v10515_v37 = vld [vmem:[#allocation40_spill] sm:$0xff]  ;;  %v10516_v42 = vld [vmem:[#allocation41_spill] sm:$0xff] }
 0x360   : > { %v3057_v50 = vpop.f32.mrf.mxu1  ;;  %v3404_v32 = vsel %vm1294_vm3, %v3399_v16, %v3403_v55  ;;  %v3537_v26 = vmax.f32 %v3258_v46, %v3402_v31  ;;  %v2626_v34 = vadd.f32 %v9140_v27, %v10515_v37  ;;  %v2628_v33 = vadd.f32 %v9157_v25, %v10516_v42 }
 0x361   : > { %v3406_v52 = vsel %vm1294_vm3, %v3401_v39, %v3405_v60  ;;  %v3407_v3 = vrot.slane %v3263_v9, 1  ;;  %v3264_v19 = vmax.f32 %v9278_v45, 0.0  ;;  %v9288_v35 = vadd.f32 %v9021_v29, %v3141_v43 }
 0x362   : > { %v3142_v22 = vadd.f32 %v3057_v50, %v2622_v54  ;;  %v3059_v47 = vpop.f32.mrf.mxu1  ;;  %v3539_v49 = vmax.f32 %v3260_v14, %v3406_v52  ;;  %v3538_v12 = vmax.f32 %v3259_v5, %v3404_v32  ;;  %v10517_v50 = vld [vmem:[#allocation42_spill] sm:$0xff] }
 0x363   : > { %v3409_v46 = vrot.slane %v3264_v19, 1  ;;  %v3265_v16 = vmax.f32 %v9288_v35, 0.0  ;;  %v3143_v39 = vadd.f32 %v3059_v47, %v2624_v13  ;;  %v3408_v31 = vsel %vm1294_vm3, %v3403_v55, %v3407_v3 }
 0x364   : > { %v3210_v45 = vadd.f32 %v9017_v56, %v3142_v22  ;;  %v3061_v43 = vpop.f32.mrf.mxu1  ;;  %v3540_v6 = vmax.f32 %v3261_v7, %v3408_v31  ;;  %v3591_v27 = vpack.c.bf16 %v3539_v49, %v3537_v26  ;;  %v2632_v52 = vadd.f32 %v9173_v53, %v10517_v50  ;;  %v9307_v22 = vpop.f32.mrf.mxu0  ;;  %v10518_v26 = vld [vmem:[#allocation43_spill] sm:$0xff]  ;;  %v10520_v50 = vld [vmem:[#allocation45_spill] sm:$0xff] }
 0x365   : > { %v3410_v37 = vsel %vm1294_vm3, %v3405_v60, %v3409_v46  ;;  %v3411_v25 = vrot.slane %v3265_v16, 1  ;;  %v9301_v54 = vadd.f32 %v9021_v29, %v3143_v39  ;;  %v3144_v14 = vadd.f32 %v3061_v43, %v2626_v34 }
 0x366   : > { %v3266_v35 = vmax.f32 %v3210_v45, 0.0  ;;  %v3063_v13 = vpop.f32.mrf.mxu1  ;;  %v3592_v42 = vpack.c.bf16 %v3540_v6, %v3538_v12  ;;  %v9305_v55 = vmax.f32 %v3262_v21, %v3410_v37  ;;  %v2634_v34 = vadd.f32 %v9192_v18, %v10518_v26  ;;  %v10519_v37 = vld [vmem:[#allocation44_spill] sm:$0xff] }
 0x367   : > { %v3267_v5 = vmax.f32 %v9301_v54, 0.0  ;;  %v3212_v7 = vadd.f32 %v9017_v56, %v3144_v14  ;;  %v3145_v60 = vadd.f32 %v3063_v13, %v2628_v33  ;;  %v3412_v32 = vsel %vm1294_vm3, %v3407_v3, %v3411_v25  ;;  %v9320_v3 = vpop.f32.mrf.mxu0 }
 0x368   : > { %v3413_v47 = vrot.slane %v3266_v35, 1  ;;  %v3067_v49 = vpop.f32.mrf.mxu1  ;;  %3687 = vmatprep.subr.bf16.mxu0 %v3592_v42  ;;  %v9314_v53 = vmax.f32 %v3263_v9, %v3412_v32  ;;  %v2636_v14 = vadd.f32 %v9212_v11, %v10519_v37  ;;  %v2638_v13 = vadd.f32 %v9223_v51, %v10520_v50 }
 0x369   : > { %v3415_v12 = vrot.slane %v3267_v5, 1  ;;  %v3268_v6 = vmax.f32 %v3212_v7, 0.0  ;;  %v3213_v21 = vadd.f32 %v9021_v29, %v3145_v60  ;;  %v3146_v39 = vadd.f32 %v3067_v49, %v2632_v52  ;;  %3688 = vmatpush1.bf16.msra.mxu0 %v3591_v27  ;;  %v10523_v49 = vld [vmem:[#allocation46_spill] sm:$0xff] }
 0x36a   : > { %v3414_v33 = vsel %vm1294_vm3, %v3409_v46, %v3413_v47  ;;  %v3069_v31 = vpop.f32.mrf.mxu1  ;;  %3689 = vmatprep.subr.bf16.mxu0 %v3590_v20  ;;  %v10521_v32 = vpack.c.bf16 %v9258_v0, %v9237_v15  ;;  %v10522_v51 = vpack.c.bf16 %v9239_v23, %v9229_v59 }
 0x36b   : > { %v3417_v18 = vrot.slane %v3268_v6, 1  ;;  %v3269_v45 = vmax.f32 %v3213_v21, 0.0  ;;  %v9323_v43 = vadd.f32 %v9017_v56, %v3146_v39  ;;  %v3147_v9 = vadd.f32 %v3069_v31, %v2634_v34 }
 0x36c   : > { %v3071_v52 = vpop.f32.mrf.mxu1  ;;  %v3416_v27 = vsel %vm1294_vm3, %v3411_v25, %v3415_v12  ;;  %v9330_v46 = vmax.f32 %v3264_v19, %v3414_v33  ;;  %v2642_v21 = vadd.f32 %v9245_v63, %v10523_v49  ;;  %v10524_v33 = vld [vmem:[#allocation47_spill] sm:$0xff] }
 0x36d   : > { %v3418_v20 = vsel %vm1294_vm3, %v3413_v47, %v3417_v18  ;;  %v3419_v42 = vrot.slane %v3269_v45, 1  ;;  %v3270_v7 = vmax.f32 %v9323_v43, 0.0  ;;  %v9335_v60 = vadd.f32 %v9021_v29, %v3147_v9  ;;  %3690 = vmatpush1.bf16.msra.mxu0 %v10521_v32  ;;  %v2655_v47 = vpop.f32.mrf.mxu0 }
 0x36e   : > { %v3148_v11 = vadd.f32 %v3071_v52, %v2636_v14  ;;  %v3073_v26 = vpop.f32.mrf.mxu1  ;;  %3691 = vmatprep.subr.bf16.mxu0 %v10522_v51  ;;  %v9343_v19 = vmax.f32 %v3266_v35, %v3418_v20  ;;  %v9345_v25 = vmax.f32 %v3265_v16, %v3416_v27  ;;  %v3593_v34 = vpack.c.bf16 %v9330_v46, %v9305_v55  ;;  %v7000_v55 = vld [vmem:[#allocation7 + $0x40] ss:$8 sps:$4 sm:$0xff]   ;;  %v7001_v46 = vld [vmem:[#allocation7 + $0x54] ss:$8 sps:$4 sm:$0xff]  }
 0x36f   : > { %v3421_v39 = vrot.slane %v3270_v7, 1  ;;  %v3271_v15 = vmax.f32 %v9335_v60, 0.0  ;;  %v3149_v0 = vadd.f32 %v3073_v26, %v2638_v13  ;;  %v2644_v31 = vadd.f32 %v9260_v10, %v10524_v33  ;;  %v10526_v10 = vld [vmem:[#allocation48_spill] sm:$0xff]  ;;  %v10527_v13 = vld [vmem:[#allocation49_spill] sm:$0xff]  ;;  %v2657_v32 = vpop.f32.mrf.mxu0 }
 0x370   : > { %v3216_v59 = vadd.f32 %v9017_v56, %v3148_v11  ;;  %v3077_v23 = vpop.f32.mrf.mxu1  ;;  %v3420_v16 = vsel %vm1294_vm3, %v3415_v12, %v3419_v42  ;;  %v3594_v35 = vpack.c.bf16 %v9345_v25, %v9314_v53  ;;  %v10525_v14 = vpack.c.bf16 %v9231_v1, %v9206_v44  ;;  %v6997_v53 = vld [vmem:[#allocation7 + $0x30] ss:$8 sps:$4 sm:$0xff]   ;;  %v6998_v25 = vld [vmem:[#allocation7 + $0x44] ss:$8 sps:$4 sm:$0xff]  }
 0x371   : > { %v3422_v43 = vsel %vm1294_vm3, %v3417_v18, %v3421_v39  ;;  %v3423_v63 = vrot.slane %v3271_v15, 1  ;;  %v3217_v9 = vadd.f32 %v9021_v29, %v3149_v0  ;;  %v3150_v37 = vadd.f32 %v3077_v23, %v2642_v21 }
 0x372   : > { %3692 = vmatpush1.bf16.msra.mxu0 %v10525_v14  ;;  %v2646_v50 = vadd.f32 %v9275_v28, %v10526_v10  ;;  %v2648_v12 = vadd.f32 %v9294_v4, %v10527_v13  ;;  %v3272_v52 = vmax.f32 %v3216_v59, 0.0  ;;  %v3079_v27 = vpop.f32.mrf.mxu1  ;;  %v10528_v18 = vpack.c.bf16 %v9198_v2, %v9196_v24 }
 0x373   : > { %v9372_v20 = vmax.f32 %v3268_v6, %v3422_v43  ;;  %v3273_v11 = vmax.f32 %v3217_v9, 0.0  ;;  %v3218_v26 = vadd.f32 %v9017_v56, %v3150_v37  ;;  %v3151_v44 = vadd.f32 %v3079_v27, %v2644_v31  ;;  %v2661_v31 = vpop.f32.mrf.mxu0  ;;  %v10535_v27 = vld [vmem:[#allocation55_spill] sm:$0xff] }
 0x374   : > { %3693 = vmatprep.subr.bf16.mxu0 %v10528_v18  ;;  %v3424_v1 = vsel %vm1294_vm3, %v3419_v42, %v3423_v63  ;;  %v3425_v51 = vrot.slane %v3272_v52, 1  ;;  %v3081_v28 = vpop.f32.mrf.mxu1  ;;  %v9378_v4 = vmax.f32 %v3267_v5, %v3420_v16  ;;  %v10529_v42 = vpack.c.bf16 %v9190_v36, %v9182_v41  ;;  %v10531_v41 = vld [vmem:[#allocation51_spill] sm:$0xff] }
 0x375   : > { %v9380_v49 = vmax.f32 %v3269_v45, %v3424_v1  ;;  %v3595_v24 = vpack.c.bf16 %v9372_v20, %v9343_v19  ;;  %v3427_v2 = vrot.slane %v3273_v11, 1  ;;  %v3274_v6 = vmax.f32 %v3218_v26, 0.0  ;;  %v2663_v1 = vpop.f32.mrf.mxu0  ;;  %v6994_v19 = vld [vmem:[#allocation7 + $0x20] ss:$8 sps:$4 sm:$0xff]   ;;  %v6995_v20 = vld [vmem:[#allocation7 + $0x34] ss:$8 sps:$4 sm:$0xff]  }
 0x376   : > { %v9385_v21 = vadd.f32 %v9021_v29, %v3151_v44  ;;  %v3152_v0 = vadd.f32 %v3081_v28, %v2646_v50  ;;  %3694 = vmatpush1.bf16.msra.mxu0 %v10529_v42  ;;  %v3426_v33 = vsel %vm1294_vm3, %v3421_v39, %v3425_v51  ;;  %v3083_v54 = vpop.f32.mrf.mxu1  ;;  %v10530_v5 = vpack.c.bf16 %v9163_v61, %v9161_v48  ;;  %v10532_v39 = vld [vmem:[#allocation52_spill] sm:$0xff] }
 0x377   : > { %v3596_v45 = vpack.c.bf16 %v9380_v49, %v9378_v4  ;;  %v3429_v59 = vrot.slane %v3274_v6, 1  ;;  %v3153_v43 = vadd.f32 %v3083_v54, %v2648_v12  ;;  %v2652_v36 = vadd.f32 %v9307_v22, %v10531_v41  ;;  %v6992_v4 = vld [vmem:[#allocation7 + $0x24] ss:$8 sps:$4 sm:$0xff]   ;;  %v7004_v49 = vld [vmem:[#allocation8 + $0x38] sm:$0xff]  }
 0x378   : > { %3695 = vmatprep.subr.bf16.mxu0 %v10530_v5  ;;  %v3275_v23 = vmax.f32 %v9385_v21, 0.0  ;;  %v9398_v16 = vadd.f32 %v9017_v56, %v3152_v0  ;;  %v2654_v9 = vadd.f32 %v9320_v3, %v10532_v39  ;;  %v3087_v37 = vpop.f32.mrf.mxu1  ;;  %v3428_v48 = vsel %vm1294_vm3, %v3423_v63, %v3427_v2  ;;  %v10534_v3 = vld [vmem:[#allocation54_spill] sm:$0xff]  ;;  %4019 = vmatpush1.bf16.msra.mxu1 %v7004_v49 }
 0x379   : > { %v9405_v61 = vmax.f32 %v3270_v7, %v3426_v33  ;;  %v3430_v14 = vsel %vm1294_vm3, %v3425_v51, %v3429_v59  ;;  %v9412_v13 = vadd.f32 %v9021_v29, %v3153_v43  ;;  %v10533_v22 = vpack.c.bf16 %v9155_v38, %v9132_v62  ;;  %v10539_v43 = vld [vmem:[#allocation57_spill] sm:$0xff] }
 0x37a   : > { %v3431_v10 = vrot.slane %v3275_v23, 1  ;;  %v3276_v50 = vmax.f32 %v9398_v16, 0.0  ;;  %v2656_v12 = vadd.f32 %v2655_v47, %v10534_v3  ;;  %v2658_v63 = vadd.f32 %v2657_v32, %v10535_v27  ;;  %v3089_v18 = vpop.f32.mrf.mxu1  ;;  %v10542_v3 = vld [vmem:[#allocation68_spill] sm:$0xff] }
 0x37b   : > { %3696 = vmatpush1.bf16.msra.mxu0 %v10533_v22  ;;  %v3154_v7 = vadd.f32 %v3087_v37, %v2652_v36  ;;  %v10536_v26 = vpack.c.bf16 %v9134_v17, %v9124_v58  ;;  %v9422_v44 = vmax.f32 %v3272_v52, %v3430_v14  ;;  %v3277_v28 = vmax.f32 %v9412_v13, 0.0  ;;  %v10541_v22 = vld [vmem:[#allocation69_spill] sm:$0xff] }
 0x37c   : > { %v3433_v51 = vrot.slane %v3276_v50, 1  ;;  %v3155_v0 = vadd.f32 %v3089_v18, %v2654_v9  ;;  %v3432_v62 = vsel %vm1294_vm3, %v3427_v2, %v3431_v10  ;;  %v3091_v47 = vpop.f32.mrf.mxu1  ;;  %v9429_v32 = vmax.f32 %v3271_v15, %v3428_v48  ;;  %v10545_v18 = vld [vmem:[#allocation67_spill] sm:$0xff] }
 0x37d   : > { %3697 = vmatprep.subr.bf16.mxu0 %v10536_v26  ;;  %v3222_v38 = vadd.f32 %v9017_v56, %v3154_v7  ;;  %v9431_v42 = vmax.f32 %v3273_v11, %v3432_v62  ;;  %v3597_v58 = vpack.c.bf16 %v9422_v44, %v9405_v61  ;;  %v3435_v52 = vrot.slane %v3277_v28, 1  ;;  %v10546_v26 = vld [vmem:[#allocation65_spill] sm:$0xff]  ;;  %v7007_v44 = vld [vmem:[#allocation8 + $0x20] sm:$0xff]  }
 0x37e   : > { %v3434_v17 = vsel %vm1294_vm3, %v3429_v59, %v3433_v51  ;;  %v3223_v33 = vadd.f32 %v9021_v29, %v3155_v0  ;;  %v3156_v54 = vadd.f32 %v3091_v47, %v2656_v12  ;;  %v10537_v2 = vpack.c.bf16 %v9126_v57, %v9101_v8  ;;  %v3093_v16 = vpop.f32.mrf.mxu1  ;;  %v2665_v59 = vpop.f32.mrf.mxu0  ;;  %v10540_v8 = vld [vmem:[#allocation58_spill] sm:$0xff]  ;;  %v6991_v61 = vld [vmem:[#allocation7 + $0x10] ss:$8 sps:$4 sm:$0xff]  }
 0x37f   : > { %v3278_v5 = vmax.f32 %v3222_v38, 0.0  ;;  %v10538_v60 = vpack.c.bf16 %v9093_v40, %v9091_v30  ;;  %v9443_v15 = vmax.f32 %v3274_v6, %v3434_v17  ;;  %v3598_v11 = vpack.c.bf16 %v9431_v42, %v9429_v32  ;;  %v10548_v17 = vld [vmem:[#allocation63_spill] sm:$0xff]  ;;  %v6989_v32 = vld [vmem:[#allocation7 + $0x14] ss:$8 sps:$4 sm:$0xff]  }
 0x380   : > { %3698 = vmatpush1.bf16.msra.mxu0 %v10537_v2  ;;  %v2662_v41 = vadd.f32 %v2661_v31, %v10539_v43  ;;  %v3279_v36 = vmax.f32 %v3223_v33, 0.0  ;;  %v3224_v39 = vadd.f32 %v9017_v56, %v3156_v54  ;;  %v3157_v9 = vadd.f32 %v3093_v16, %v2658_v63  ;;  %v3097_v48 = vpop.f32.mrf.mxu1  ;;  %v10544_v31 = vld [vmem:[#allocation61_spill] sm:$0xff]  ;;  %v2667_v0 = vpop.f32.mrf.mxu0 }
 0x381   : > { %3699 = vmatprep.subr.bf16.mxu0 %v10538_v60  ;;  %v2664_v57 = vadd.f32 %v2663_v1, %v10540_v8  ;;  %v3437_v37 = vrot.slane %v3278_v5, 1  ;;  %v3436_v14 = vsel %vm1294_vm3, %v3431_v10, %v3435_v52  ;;  %v10543_v12 = vpack.c.bf16 %v10541_v22, %v10542_v3  ;;  %v7008_v42 = vld [vmem:[#allocation8 + $0x18] sm:$0xff]  }
 0x382   : > { %v3439_v30 = vrot.slane %v3279_v36, 1  ;;  %v3280_v40 = vmax.f32 %v3224_v39, 0.0  ;;  %v3225_v6 = vadd.f32 %v9021_v29, %v3157_v9  ;;  %v3158_v13 = vadd.f32 %v3097_v48, %v2662_v41  ;;  %v3099_v63 = vpop.f32.mrf.mxu1  ;;  %v10549_v39 = vld [vmem:[#allocation66_spill] sm:$0xff]  ;;  %v10550_v9 = vld [vmem:[#allocation64_spill] sm:$0xff] }
 0x383   : > { %v2666_v27 = vadd.f32 %v2665_v59, %v10544_v31  ;;  %v3438_v7 = vsel %vm1294_vm3, %v3433_v51, %v3437_v37  ;;  %v10547_v1 = vpack.c.bf16 %v10545_v18, %v10546_v26  ;;  %v3159_v47 = vadd.f32 %v3099_v63, %v2664_v57 }
 0x384   : > { %3700 = vmatpush1.bf16.msra.mxu0 %v10543_v12  ;;  %v3441_v10 = vrot.slane %v3280_v40, 1  ;;  %v3281_v62 = vmax.f32 %v3225_v6, 0.0  ;;  %v3226_v38 = vadd.f32 %v9017_v56, %v3158_v13  ;;  %v2668_v33 = vadd.f32 %v2667_v0, %v10548_v17  ;;  %v3101_v54 = vpop.f32.mrf.mxu1 }
 0x385   : > { %3701 = vmatprep.subr.bf16.mxu0 %v10547_v1  ;;  %v3440_v2 = vsel %vm1294_vm3, %v3435_v52, %v3439_v30  ;;  %v3554_v16 = vmax.f32 %v3275_v23, %v3436_v14  ;;  %v3555_v51 = vmax.f32 %v3276_v50, %v3438_v7  ;;  %v3227_v41 = vadd.f32 %v9021_v29, %v3159_v47 }
 0x386   : > { %v3442_v60 = vsel %vm1294_vm3, %v3437_v37, %v3441_v10  ;;  %v3443_v59 = vrot.slane %v3281_v62, 1  ;;  %v3282_v43 = vmax.f32 %v3226_v38, 0.0  ;;  %v10551_v8 = vpack.c.bf16 %v10549_v39, %v10550_v9  ;;  %v3103_v48 = vpop.f32.mrf.mxu1 }
 0x387   : > { %v3160_v57 = vadd.f32 %v3101_v54, %v2666_v27  ;;  %v3557_v6 = vmax.f32 %v3278_v5, %v3442_v60  ;;  %v3556_v13 = vmax.f32 %v3277_v28, %v3440_v2  ;;  %v3599_v52 = vpack.c.bf16 %v3555_v51, %v9443_v15  ;;  %v7011_v51 = vld [vmem:[#allocation8] sm:$0xff]  }
 0x388   : > { %3702 = vmatpush1.bf16.msra.mxu0 %v10551_v8  ;;  %v3445_v22 = vrot.slane %v3282_v43, 1  ;;  %v3283_v21 = vmax.f32 %v3227_v41, 0.0  ;;  %v3161_v23 = vadd.f32 %v3103_v48, %v2668_v33  ;;  %v3444_v31 = vsel %vm1294_vm3, %v3439_v30, %v3443_v59  ;;  %v7012_v60 = vld [vmem:[#allocation8 + $0x40] sm:$0x1f]  }
 0x389   : > { %v3228_v50 = vadd.f32 %v9017_v56, %v3160_v57  ;;  %v3600_v37 = vpack.c.bf16 %v3556_v13, %v3554_v16  ;;  %v3558_v15 = vmax.f32 %v3279_v36, %v3444_v31  ;;  %v7438_v30 = vmov 65535   ;;  %v6986_v16 = vld [vmem:[#allocation7] ss:$8 sps:$4 sm:$0xff]  }
 0x38a   : > { %v3446_v14 = vsel %vm1294_vm3, %v3441_v10, %v3445_v22  ;;  %v3447_v3 = vrot.slane %v3283_v21, 1  ;;  %v3229_v12 = vadd.f32 %v9021_v29, %v3161_v23 }
 0x38b   : > { %v3284_v7 = vmax.f32 %v3228_v50, 0.0  ;;  %v3559_v27 = vmax.f32 %v3280_v40, %v3446_v14  ;;  %v3679_v40 = vsel %vm3678_vm5, 4294967295, %v7438_v30 }
 0x38c   : > { %v3285_v63 = vmax.f32 %v3229_v12, 0.0  ;;  %v3448_v28 = vsel %vm1294_vm3, %v3443_v59, %v3447_v3  ;;  %v3680_v36 = vsel %vm870_vm0, %v3679_v40, 0 }
 0x38d   : > { %v3449_v5 = vrot.slane %v3284_v7, 1  ;;  %v3560_v18 = vmax.f32 %v3281_v62, %v3448_v28  ;;  %v3601_v26 = vpack.c.bf16 %v3559_v27, %v3557_v6 }
 0x38e   : > { %v3451_v1 = vrot.slane %v3285_v63, 1 }
 0x38f   : > { %v3450_v56 = vsel %vm1294_vm3, %v3445_v22, %v3449_v5  ;;  %v3563_v0 = vmax.f32 %v3284_v7, %v3449_v5  ;;  %v3602_v10 = vpack.c.bf16 %v3560_v18, %v3558_v15 }
 0x390   : > { %v3561_v38 = vmax.f32 %v3282_v43, %v3450_v56  ;;  %v3564_v47 = vmax.f32 %v3285_v63, %v3451_v1  ;;  %v3452_v29 = vsel %vm1294_vm3, %v3447_v3, %v3451_v1  ;;  %v4016_v43 = vsel %vm3678_vm5, %v7012_v60, 0 }
 0x391   : > { %v3562_v17 = vmax.f32 %v3283_v21, %v3452_v29  ;;  %v4113_v29 = vld [vmem:[%s10315_s7 + $0x40] sm:$0xff] }
 0x392   : > { %v3603_v33 = vpack.c.bf16 %v3563_v0, %v3561_v38 }
 0x393   : > { %v3604_v54 = vpack.c.bf16 %v3564_v47, %v3562_v17  ;;  %v6482_v17 = vcombine.high %v4113_v29, %v4113_v29 }
 0x394   : > { %v3682_v2 = vand.u32 %v3680_v36, %v3603_v33 }
 0x395   : > { %v3685_v62 = vand.u32 %v3680_v36, %v3604_v54 }
 0x397   : > { %3707 = vmatprep.subr.bf16.mxu0 %v3685_v62 }
 0x398   : > { %3708 = vmatpush2.bf16.msra.mxu0 %v3682_v2 }
 0x399   : > { %3709 = vmatprep.subr.bf16.mxu0 %v3602_v10 }
 0x39c   : > { %3710 = vmatpush2.bf16.msra.mxu0 %v3601_v26 }
 0x39d   : > { %3711 = vmatprep.subr.bf16.mxu0 %v3600_v37 }
 0x3a0   : > { %3712 = vmatpush2.bf16.msra.mxu0 %v3599_v52 }
 0x3a1   : > { %3713 = vmatprep.subr.bf16.mxu0 %v3598_v11  ;;  %v7010_v11 = vld [vmem:[#allocation8 + $0x8] sm:$0xff]  }
 0x3a4   : > { %3714 = vmatpush2.bf16.msra.mxu0 %v3597_v58  ;;  %v7009_v58 = vld [vmem:[#allocation8 + $0x10] sm:$0xff]  }
 0x3a5   : > { %3715 = vmatprep.subr.bf16.mxu0 %v3596_v45  ;;  %v7006_v45 = vld [vmem:[#allocation8 + $0x28] sm:$0xff]  }
 0x3a8   : > { %3716 = vmatpush2.bf16.msra.mxu0 %v3595_v24  ;;  %v7005_v24 = vld [vmem:[#allocation8 + $0x30] sm:$0xff]  }
 0x3a9   : > { %3717 = vmatprep.subr.bf16.mxu0 %v3594_v35  ;;  %v10552_v35 = vmov 0  }
 0x3aa   : > { %4020 = vmatprep.subr.bf16.mxu1 %v10552_v35 }
 0x3ab   : > { %4021 = vmatpush1.bf16.msra.mxu1 %v7005_v24 }
 0x3ac   : > { %3718 = vmatpush2.bf16.msra.mxu0 %v3593_v34  ;;  %v7003_v34 = vld [vmem:[#allocation7 + $0x50] ss:$8 sps:$4 sm:$0xff]   ;;  %4022 = vmatprep.subr.bf16.mxu1 %v10552_v35 }
 0x3af   : > { %3720 = vmatmul.mubr.bf16.vlgmr.msra.gmra.mxu0 %v6986_v16  ;;  %4023 = vmatpush1.bf16.msra.mxu1 %v7006_v45 }
 0x3b0   : > { %6427 = vmatprep.mubr.msk.bf16.mxu0 %vm3659_vm4, %v6989_v32  ;;  %4024 = vmatprep.subr.bf16.mxu1 %v10552_v35 }
 0x3b3   : > { %4025 = vmatpush1.bf16.msra.mxu1 %v7007_v44 }
 0x3b4   : > { %4026 = vmatprep.subr.bf16.mxu1 %v10552_v35 }
 0x3b7   : > { %3730 = vmatmul.mubr.bf16.gmra.mxu0 %v6991_v61  ;;  %4027 = vmatpush1.bf16.msra.mxu1 %v7008_v42 }
 0x3b8   : > { %6428 = vmatprep.mubr.msk.bf16.mxu0 %vm3659_vm4, %v6992_v4  ;;  %4028 = vmatprep.subr.bf16.mxu1 %v10552_v35 }
 0x3bb   : > { %4029 = vmatpush1.bf16.msra.mxu1 %v7009_v58  ;;  %v7017_v58 = vld [vmem:[%s10315_s7 + $0x34] ss:$8 sps:$4 sm:$0xff]  }
 0x3bc   : > { %4030 = vmatprep.subr.bf16.mxu1 %v10552_v35 }
 0x3bf   : > { %3740 = vmatmul.mubr.bf16.gmra.mxu0 %v6994_v19  ;;  %4031 = vmatpush1.bf16.msra.mxu1 %v7010_v11  ;;  %v6481_v19 = vcombine.low %v4113_v29, %v4113_v29 }
 0x3c0   : > { %6429 = vmatprep.mubr.msk.bf16.mxu0 %vm3659_vm4, %v6995_v20  ;;  %4032 = vmatprep.subr.bf16.mxu1 %v10552_v35 }
 0x3c1   : > { %v4393_v42 = vsel %vm4235_vm6, %v6481_v19, 0 }
 0x3c3   : > { %4033 = vmatpush1.bf16.msra.mxu1 %v7011_v51 }
 0x3c4   : > { %4048 = vmatprep.subr.bf16.mxu1 %v10552_v35 }
 0x3c7   : > { %3750 = vmatmul.mubr.bf16.gmra.mxu0 %v6997_v53  ;;  %4049 = vmatpush2.bf16.msra.mxu1 %v4016_v43  ;;  %v7015_v43 = vld [vmem:[%s10315_s7 + $0x30] ss:$8 sps:$4 sm:$0xff]  }
 0x3c8   : > { %6430 = vmatprep.mubr.msk.bf16.mxu0 %vm3659_vm4, %v6998_v25  ;;  %6483 = vmatprep.subr.msk.bf16.mxu1 %vm4235_vm6, %v6482_v17 }
 0x3cf   : > { %3760 = vmatmul.mubr.bf16.gmra.mxu0 %v7000_v55 }
 0x3d0   : > { %6431 = vmatprep.mubr.msk.bf16.mxu0 %vm3659_vm4, %v7001_v46 }
 0x3d7   : > { %3770 = vmatmul.mubr.bf16.gmra.mxu0 %v7003_v34 }
 0x3d8   : > { %4274 = vmatprep.mubr.bf16.mxu0 %v10552_v35 }
 0x46f   : > { %v9513_v59 = vpop.f32.mrf.mxu0 }
 0x471   : > { %v3723_v41 = vpop.f32.mrf.mxu0 }
 0x472   : > { %v6793_v39 = vpack.i.bf16 %v3723_v41, %v9513_v59 }
 0x473   : > { %v9517_v9 = vpop.f32.mrf.mxu0 }
 0x474   : > { %6794 = vrot.lane.b32.xlu0 %v6793_v39, %s7439_s30 }
 0x475   : > { %v3727_v8 = vpop.f32.mrf.mxu0 }
 0x476   : > { %v6798_v57 = vpack.i.bf16 %v3727_v8, %v9517_v9 }
 0x477   : > { %v9521_v48 = vpop.f32.mrf.mxu0 }
 0x478   : > { %6799 = vrot.lane.b32.xlu0 %v6798_v57, %s7439_s30 }
 0x479   : > { %v9524_v6 = vpop.f32.mrf.mxu0 }
 0x47a   : > { %v6803_v13 = vpack.i.bf16 %v9524_v6, %v9521_v48 }
 0x47b   : > { %v9528_v52 = vpop.f32.mrf.mxu0 }
 0x47c   : > { %6804 = vrot.lane.b32.xlu1 %v6803_v13, %s7439_s30 }
 0x47d   : > { %v9531_v22 = vpop.f32.mrf.mxu0 }
 0x47e   : > { %v6808_v21 = vpack.i.bf16 %v9531_v22, %v9528_v52 }
 0x47f   : > { %v9535_v23 = vpop.f32.mrf.mxu0 }
 0x480   : > { %6809 = vrot.lane.b32.xlu1 %v6808_v21, %s7439_s30 }
 0x481   : > { %v9538_v50 = vpop.f32.mrf.mxu0 }
 0x482   : > { %v6813_v37 = vpack.i.bf16 %v9538_v50, %v9535_v23 }
 0x483   : > { %v9542_v14 = vpop.f32.mrf.mxu0 }
 0x484   : > { %6814 = vrot.lane.b32.xlu0 %v6813_v37, %s7439_s30 }
 0x485   : > { %v9545_v3 = vpop.f32.mrf.mxu0 }
 0x486   : > { %v6818_v12 = vpack.i.bf16 %v9545_v3, %v9542_v14 }
 0x487   : > { %v9549_v31 = vpop.f32.mrf.mxu0 }
 0x488   : > { %6819 = vrot.lane.b32.xlu1 %v6818_v12, %s7439_s30 }
 0x489   : > { %v9552_v7 = vpop.f32.mrf.mxu0 }
 0x48a   : > { %v6823_v27 = vpack.i.bf16 %v9552_v7, %v9549_v31 }
 0x48b   : > { %v9556_v63 = vpop.f32.mrf.mxu0 }
 0x48c   : > { %6824 = vrot.lane.b32.xlu0 %v6823_v27, %s7439_s30 }
 0x48d   : > { %v9559_v28 = vpop.f32.mrf.mxu0 }
 0x48e   : > { %v6828_v5 = vpack.i.bf16 %v9559_v28, %v9556_v63 }
 0x48f   : > { %v9563_v15 = vpop.f32.mrf.mxu0 }
 0x490   : > { %6829 = vrot.lane.b32.xlu1 %v6828_v5, %s7439_s30  ;;  %v7018_v5 = vld [vmem:[%s10315_s7 + $0x20] ss:$8 sps:$4 sm:$0xff]  }
 0x491   : > { %v9566_v18 = vpop.f32.mrf.mxu0 }
 0x492   : > { %v6833_v26 = vpack.i.bf16 %v9566_v18, %v9563_v15 }
 0x493   : > { %v9570_v1 = vpop.f32.mrf.mxu0 }
 0x494   : > { %6834 = vrot.lane.b32.xlu0 %v6833_v26, %s7439_s30 }
 0x495   : > { %v9573_v56 = vpop.f32.mrf.mxu0 }
 0x496   : > { %v6838_v0 = vpack.i.bf16 %v9573_v56, %v9570_v1 }
 0x497   : > { %v9577_v10 = vpop.f32.mrf.mxu0 }
 0x498   : > { %6839 = vrot.lane.b32.xlu1 %v6838_v0, %s7439_s30 }
 0x499   : > { %v9580_v38 = vpop.f32.mrf.mxu0 }
 0x49a   : > { %v6843_v47 = vpack.i.bf16 %v9580_v38, %v9577_v10 }
 0x49b   : > { %v9587_v40 = vpop.f32.mrf.mxu0 }
 0x49c   : > { %6844 = vrot.lane.b32.xlu0 %v6843_v47, %s7439_s30  ;;  %v7021_v47 = vld [vmem:[%s10315_s7 + $0x10] ss:$8 sps:$4 sm:$0xff]  }
 0x49d   : > { %v9590_v33 = vpop.f32.mrf.mxu0 }
 0x49e   : > { %v6848_v54 = vpack.i.bf16 %v9590_v33, %v9587_v40 }
 0x4a0   : > { %6849 = vrot.lane.b32.xlu1 %v6848_v54, %s7439_s30  ;;  %s6043_s30 = scalar_lea.sflag [#allocation4], %s636_s27 }
 0x4e6   : > { %v6795_v36 = vpop.permute.xlu0 %6794 }
 0x4e7   : > { %v6797_v62 = vunpack.i.h.bf16 %v6795_v36  ;;  %v6796_v2 = vunpack.i.l.bf16 %v6795_v36 }
 0x4e9   : > { %v3853_v32 = vsel %vm3852_vm7, %v6796_v2, %v6797_v62  ;;  %v3890_v20 = vmax.f32 %v3723_v41, %v6797_v62  ;;  %v7020_v41 = vld [vmem:[%s10315_s7 + $0x24] ss:$8 sps:$4 sm:$0xff]  }
 0x4ea   : > { %v6800_v16 = vpop.permute.xlu0 %6799  ;;  %v3889_v55 = vmax.f32 %v9513_v59, %v3853_v32 }
 0x4eb   : > { %v6802_v61 = vunpack.i.h.bf16 %v6800_v16  ;;  %v6801_v4 = vunpack.i.l.bf16 %v6800_v16 }
 0x4ed   : > { %v3892_v53 = vmax.f32 %v3727_v8, %v6802_v61  ;;  %v3854_v25 = vsel %vm3852_vm7, %v6801_v4, %v6802_v61 }
 0x4ee   : > { %v3891_v46 = vmax.f32 %v9517_v9, %v3854_v25  ;;  %v6805_v34 = vpop.permute.xlu1 %6804 }
 0x4ef   : > { %v3914_v49 = vpack.c.bf16 %v3892_v53, %v3890_v20  ;;  %v6807_v24 = vunpack.i.h.bf16 %v6805_v34  ;;  %v6806_v45 = vunpack.i.l.bf16 %v6805_v34 }
 0x4f0   : > { %v3913_v44 = vpack.c.bf16 %v3891_v46, %v3889_v55 }
 0x4f1   : > { %6441 = vmatprep.mubr.msk.bf16.mxu1 %vm3996_vm8, %v3914_v49  ;;  %v3855_v51 = vsel %vm3852_vm7, %v6806_v45, %v6807_v24  ;;  %v3894_v39 = vmax.f32 %v9524_v6, %v6807_v24  ;;  %v7023_v6 = vld [vmem:[%s10315_s7 + $0x14] ss:$8 sps:$4 sm:$0xff]  }
 0x4f2   : > { %4051 = vmatmul.mubr.bf16.vlgmr.msra.gmra.mxu1 %v3913_v44  ;;  %v6810_v11 = vpop.permute.xlu1 %6809  ;;  %v3893_v57 = vmax.f32 %v9521_v48, %v3855_v51 }
 0x4f3   : > { %v6812_v60 = vunpack.i.h.bf16 %v6810_v11  ;;  %v6811_v59 = vunpack.i.l.bf16 %v6810_v11  ;;  %4405 = vmatpush1.bf16.msra.mxu1 %v4393_v42 }
 0x4f4   : > { %4406 = vmatprep.subr.bf16.mxu1 %v7017_v58 }
 0x4f5   : > { %v3896_v9 = vmax.f32 %v9531_v22, %v6812_v60  ;;  %v3856_v8 = vsel %vm3852_vm7, %v6811_v59, %v6812_v60 }
 0x4f6   : > { %v3895_v13 = vmax.f32 %v9528_v52, %v3856_v8  ;;  %v6815_v21 = vpop.permute.xlu0 %6814 }
 0x4f7   : > { %v3916_v37 = vpack.c.bf16 %v3896_v9, %v3894_v39  ;;  %v6817_v12 = vunpack.i.h.bf16 %v6815_v21  ;;  %v6816_v27 = vunpack.i.l.bf16 %v6815_v21  ;;  %4407 = vmatpush1.bf16.msra.mxu1 %v7015_v43 }
 0x4f8   : > { %v3915_v26 = vpack.c.bf16 %v3895_v13, %v3893_v57  ;;  %4408 = vmatprep.subr.bf16.mxu1 %v7020_v41 }
 0x4f9   : > { %6442 = vmatprep.mubr.msk.bf16.mxu1 %vm3996_vm8, %v3916_v37  ;;  %v3857_v52 = vsel %vm3852_vm7, %v6816_v27, %v6817_v12  ;;  %v3898_v29 = vmax.f32 %v9538_v50, %v6817_v12  ;;  %v6455_v27 = vld [vmem:[%s10315_s7 + $0x88] sm:$0xff] }
 0x4fa   : > { %4059 = vmatmul.mubr.bf16.gmra.mxu1 %v3915_v26  ;;  %v6820_v48 = vpop.permute.xlu1 %6819  ;;  %v3897_v36 = vmax.f32 %v9535_v23, %v3857_v52  ;;  %v7031_v26 = vld [vmem:[%s10315_s7 + $0x7c] ss:$8 sps:$4 sm:$0xff]   ;;  %v7032_v52 = vld [vmem:[%s10315_s7 + $0x68] ss:$8 sps:$4 sm:$0xff]  }
 0x4fb   : > { %v6822_v22 = vunpack.i.h.bf16 %v6820_v48  ;;  %v6821_v0 = vunpack.i.l.bf16 %v6820_v48  ;;  %4409 = vmatpush1.bf16.msra.mxu1 %v7018_v5  ;;  %v6464_v5 = vcombine.low %v6455_v27, %v6455_v27  ;;  %v7034_v48 = vld [vmem:[%s10315_s7 + $0x6c] ss:$8 sps:$4 sm:$0xff]  }
 0x4fc   : > { %4410 = vmatprep.subr.bf16.mxu1 %v7023_v6  ;;  %v7029_v6 = vld [vmem:[%s10315_s7 + $0x78] ss:$8 sps:$4 sm:$0xff]  }
 0x4fd   : > { %v3900_v17 = vmax.f32 %v9545_v3, %v6822_v22  ;;  %v3858_v54 = vsel %vm3852_vm7, %v6821_v0, %v6822_v22  ;;  %v7037_v22 = vld [vmem:[%s10315_s7 + $0x5c] ss:$8 sps:$4 sm:$0xff]   ;;  %v7035_v0 = vld [vmem:[%s10315_s7 + $0x58] ss:$8 sps:$4 sm:$0xff]  }
 0x4fe   : > { %v3899_v62 = vmax.f32 %v9542_v14, %v3858_v54  ;;  %v6825_v2 = vpop.permute.xlu0 %6824 }
 0x4ff   : > { %v3918_v16 = vpack.c.bf16 %v3900_v17, %v3898_v29  ;;  %v6827_v32 = vunpack.i.h.bf16 %v6825_v2  ;;  %v6826_v61 = vunpack.i.l.bf16 %v6825_v2  ;;  %4411 = vmatpush1.bf16.msra.mxu1 %v7021_v47  ;;  %v7040_v47 = vld [vmem:[%s10315_s7 + $0x4c] ss:$8 sps:$4 sm:$0xff]   ;;  %v7038_v29 = vld [vmem:[%s10315_s7 + $0x48] ss:$8 sps:$4 sm:$0xff]  }
 0x500   : > { %v3917_v4 = vpack.c.bf16 %v3899_v62, %v3897_v36  ;;  %v6498_v17 = vld [vmem:[%s10315_s7 + $0xd0] sm:$0xff] }
 0x501   : > { %6443 = vmatprep.mubr.msk.bf16.mxu1 %vm3996_vm8, %v3918_v16  ;;  %v3859_v50 = vsel %vm3852_vm7, %v6826_v61, %v6827_v32  ;;  %v3902_v53 = vmax.f32 %v9552_v7, %v6827_v32  ;;  %v6508_v54 = vcombine.high %v6498_v17, %v6498_v17 }
 0x502   : > { %4067 = vmatmul.mubr.bf16.gmra.mxu1 %v3917_v4  ;;  %v6830_v19 = vpop.permute.xlu1 %6829  ;;  %v3901_v25 = vmax.f32 %v9549_v31, %v3859_v50 }
 0x503   : > { %v6832_v20 = vunpack.i.h.bf16 %v6830_v19  ;;  %v6831_v3 = vunpack.i.l.bf16 %v6830_v19 }
 0x505   : > { %v3904_v23 = vmax.f32 %v9559_v28, %v6832_v20  ;;  %v3860_v14 = vsel %vm3852_vm7, %v6831_v3, %v6832_v20 }
 0x506   : > { %v3903_v55 = vmax.f32 %v9556_v63, %v3860_v14  ;;  %v6835_v46 = vpop.permute.xlu0 %6834 }
 0x507   : > { %v3920_v34 = vpack.c.bf16 %v3904_v23, %v3902_v53  ;;  %v6837_v49 = vunpack.i.h.bf16 %v6835_v46  ;;  %v6836_v24 = vunpack.i.l.bf16 %v6835_v46  ;;  %v6507_v23 = vcombine.low %v6498_v17, %v6498_v17 }
 0x508   : > { %v3919_v45 = vpack.c.bf16 %v3903_v55, %v3901_v25 }
 0x509   : > { %6444 = vmatprep.mubr.msk.bf16.mxu1 %vm3996_vm8, %v3920_v34  ;;  %v3861_v42 = vsel %vm3852_vm7, %v6836_v24, %v6837_v49  ;;  %v3906_v28 = vmax.f32 %v9566_v18, %v6837_v49  ;;  %v4582_v24 = vsel %vm4235_vm6, %v6507_v23, 0 }
 0x50a   : > { %4075 = vmatmul.mubr.bf16.gmra.mxu1 %v3919_v45  ;;  %v6840_v44 = vpop.permute.xlu1 %6839  ;;  %v3905_v63 = vmax.f32 %v9563_v15, %v3861_v42  ;;  %v7045_v45 = vld [vmem:[%s10315_s7 + $0xc4] ss:$8 sps:$4 sm:$0xff]  }
 0x50b   : > { %v6842_v7 = vunpack.i.h.bf16 %v6840_v44  ;;  %v6841_v58 = vunpack.i.l.bf16 %v6840_v44 }
 0x50d   : > { %v3908_v11 = vmax.f32 %v9573_v56, %v6842_v7  ;;  %v3862_v31 = vsel %vm3852_vm7, %v6841_v58, %v6842_v7  ;;  %v7043_v58 = vld [vmem:[%s10315_s7 + $0xc0] ss:$8 sps:$4 sm:$0xff]  }
 0x50e   : > { %v3907_v51 = vmax.f32 %v9570_v1, %v3862_v31  ;;  %v6845_v60 = vpop.permute.xlu0 %6844 }
 0x50f   : > { %v3922_v59 = vpack.c.bf16 %v3908_v11, %v3906_v28  ;;  %v6847_v43 = vunpack.i.h.bf16 %v6845_v60  ;;  %v6846_v41 = vunpack.i.l.bf16 %v6845_v60  ;;  %v7048_v11 = vld [vmem:[%s10315_s7 + $0xb4] ss:$8 sps:$4 sm:$0xff]  }
 0x510   : > { %v3921_v39 = vpack.c.bf16 %v3907_v51, %v3905_v63 }
 0x511   : > { %6445 = vmatprep.mubr.msk.bf16.mxu1 %vm3996_vm8, %v3922_v59  ;;  %v3863_v8 = vsel %vm3852_vm7, %v6846_v41, %v6847_v43  ;;  %v3910_v56 = vmax.f32 %v9580_v38, %v6847_v43  ;;  %v6465_v38 = vcombine.high %v6455_v27, %v6455_v27  ;;  %v7046_v43 = vld [vmem:[%s10315_s7 + $0xb0] ss:$8 sps:$4 sm:$0xff]  }
 0x512   : > { %4083 = vmatmul.mubr.bf16.gmra.mxu1 %v3921_v39  ;;  %v6850_v9 = vpop.permute.xlu1 %6849  ;;  %v3909_v1 = vmax.f32 %v9577_v10, %v3863_v8  ;;  %v7026_v10 = vld [vmem:[%s10315_s7] ss:$8 sps:$4 sm:$0xff]   ;;  %v7051_v39 = vld [vmem:[%s10315_s7 + $0xa4] ss:$8 sps:$4 sm:$0xff]   ;;  %v7052_v27 = vld [vmem:[%s10315_s7 + $0x90] ss:$8 sps:$4 sm:$0xff]  }
 0x513   : > { %v6852_v18 = vunpack.i.h.bf16 %v6850_v9  ;;  %v6851_v57 = vunpack.i.l.bf16 %v6850_v9  ;;  %6466 = vmatprep.subr.msk.bf16.mxu0 %vm4235_vm6, %v6465_v38 }
 0x515   : > { %v3912_v13 = vmax.f32 %v9590_v33, %v6852_v18  ;;  %v3864_v15 = vsel %vm3852_vm7, %v6851_v57, %v6852_v18  ;;  %v4237_v33 = vsel %vm4235_vm6, %v6464_v5, 0  ;;  %v7049_v57 = vld [vmem:[%s10315_s7 + $0xa0] ss:$8 sps:$4 sm:$0xff]  }
 0x516   : > { %v3911_v21 = vmax.f32 %v9587_v40, %v3864_v15  ;;  %v7028_v40 = vld [vmem:[%s10315_s7 + $0x4] ss:$8 sps:$4 sm:$0xff]   ;;  %4249 = vmatpush1.bf16.msra.mxu0 %v4237_v33 }
 0x517   : > { %v3924_v37 = vpack.c.bf16 %v3912_v13, %v3910_v56  ;;  %4412 = vmatprep.subr.bf16.mxu1 %v7028_v40  ;;  %4250 = vmatprep.subr.bf16.mxu0 %v7031_v26  ;;  %v7054_v13 = vld [vmem:[%s10315_s7 + $0x94] ss:$8 sps:$4 sm:$0xff]  }
 0x518   : > { %v3923_v12 = vpack.c.bf16 %v3911_v21, %v3909_v1  ;;  %4413 = vmatpush1.bf16.msra.mxu1 %v7026_v10 }
 0x519   : > { %6446 = vmatprep.mubr.msk.bf16.mxu1 %vm3996_vm8, %v3924_v37 }
 0x51a   : > { %4091 = vmatmul.mubr.bf16.gmra.mxu1 %v3923_v12  ;;  %4251 = vmatpush1.bf16.msra.mxu0 %v7029_v6 }
 0x51b   : > { %4430 = vmatprep.mubr.bf16.mxu1 %v10552_v35  ;;  %4252 = vmatprep.subr.bf16.mxu0 %v7034_v48 }
 0x51e   : > { %4253 = vmatpush1.bf16.msra.mxu0 %v7032_v52 }
 0x51f   : > { %4254 = vmatprep.subr.bf16.mxu0 %v7037_v22 }
 0x522   : > { %4255 = vmatpush1.bf16.msra.mxu0 %v7035_v0 }
 0x523   : > { %4256 = vmatprep.subr.bf16.mxu0 %v7040_v47 }
 0x526   : > { %4257 = vmatpush1.bf16.msra.mxu0 %v7038_v29 }
 0x527   : > { %6509 = vmatprep.subr.msk.bf16.mxu0 %vm4235_vm6, %v6508_v54 }
 0x5b2   : > { %v4052_v36 = vpop.f32.mrf.mxu1 }
 0x5b4   : > { %v4054_v62 = vpop.f32.mrf.mxu1 }
 0x5b6   : > { %v4055_v2 = vpop.f32.mrf.mxu1 }
 0x5b7   : > { %v9695_v16 = vpack.c.bf16 %v4055_v2, %v4052_v36 }
 0x5b8   : > { %v4057_v32 = vpop.f32.mrf.mxu1 }
 0x5b9   : > { %6484 = vmatmul.mubr.msk.bf16.vlgmr.msra.gmra.mxu1 %vm4216_vm9, %v9695_v16  ;;  %v4127_v4 = vshll.u32 %v9695_v16, 16  ;;  %v4125_v14 = vshrl.u32 %v9695_v16, 16 }
 0x5ba   : > { %v4060_v61 = vpop.f32.mrf.mxu1  ;;  %4440 = vmatprep.mubr.bf16.mxu1 %v10552_v35 }
 0x5bb   : > { %v4129_v20 = vrot.slane %v4127_v4, 1 }
 0x5bc   : > { %v4062_v19 = vpop.f32.mrf.mxu1 }
 0x5bd   : > { %v4130_v46 = vor.u32 %v4129_v20, %v4125_v14  ;;  %v4507_v20 = vrot.slane %v9695_v16, 1 }
 0x5be   : > { %v4063_v50 = vpop.f32.mrf.mxu1 }
 0x5bf   : > { %v9701_v3 = vpack.c.bf16 %v4063_v50, %v4060_v61 }
 0x5c0   : > { %v4065_v53 = vpop.f32.mrf.mxu1 }
 0x5c1   : > { %v4132_v25 = vshll.u32 %v9701_v3, 16  ;;  %6485 = vmatmul.mubr.msk.bf16.gmra.mxu1 %vm4216_vm9, %v9701_v3  ;;  %v4136_v31 = vshrl.u32 %v9701_v3, 16  ;;  %v4508_v50 = vrot.slane %v9701_v3, 1 }
 0x5c2   : > { %v4068_v55 = vpop.f32.mrf.mxu1  ;;  %4450 = vmatprep.mubr.bf16.mxu1 %v10552_v35 }
 0x5c3   : > { %v4134_v34 = vrot.slane %v4132_v25, 1  ;;  %v4509_v53 = vsel %vm1294_vm3, %v4507_v20, %v4508_v50 }
 0x5c4   : > { %v4070_v49 = vpop.f32.mrf.mxu1 }
 0x5c5   : > { %v4135_v44 = vsel %vm697_vm2, %v4130_v46, %v4134_v34  ;;  %v4138_v59 = vor.u32 %v4136_v31, %v4134_v34 }
 0x5c6   : > { %v4071_v42 = vpop.f32.mrf.mxu1  ;;  %6467 = vmatmul.mubr.msk.bf16.vlgmr.msra.gmra.mxu0 %vm4216_vm9, %v4135_v44 }
 0x5c7   : > { %v9714_v7 = vpack.c.bf16 %v4071_v42, %v4068_v55  ;;  %4284 = vmatprep.mubr.bf16.mxu0 %v10552_v35  ;;  %4594 = vmatpush1.bf16.msra.mxu0 %v4582_v24 }
 0x5c8   : > { %v4073_v28 = vpop.f32.mrf.mxu1  ;;  %4595 = vmatprep.subr.bf16.mxu0 %v7045_v45 }
 0x5c9   : > { %v4140_v63 = vshll.u32 %v9714_v7, 16  ;;  %6486 = vmatmul.mubr.msk.bf16.gmra.mxu1 %vm4216_vm9, %v9714_v7  ;;  %v4144_v15 = vshrl.u32 %v9714_v7, 16  ;;  %v4510_v23 = vrot.slane %v9714_v7, 1 }
 0x5ca   : > { %v4076_v51 = vpop.f32.mrf.mxu1  ;;  %4460 = vmatprep.mubr.bf16.mxu1 %v10552_v35 }
 0x5cb   : > { %v4142_v60 = vrot.slane %v4140_v63, 1  ;;  %4596 = vmatpush1.bf16.msra.mxu0 %v7043_v58  ;;  %v4511_v14 = vsel %vm1294_vm3, %v4508_v50, %v4510_v23 }
 0x5cc   : > { %v4078_v41 = vpop.f32.mrf.mxu1  ;;  %4597 = vmatprep.subr.bf16.mxu0 %v7048_v11 }
 0x5cd   : > { %v4143_v9 = vsel %vm697_vm2, %v4138_v59, %v4142_v60  ;;  %v4146_v12 = vor.u32 %v4144_v15, %v4142_v60 }
 0x5ce   : > { %v4079_v8 = vpop.f32.mrf.mxu1  ;;  %6468 = vmatmul.mubr.msk.bf16.gmra.mxu0 %vm4216_vm9, %v4143_v9 }
 0x5cf   : > { %v9736_v18 = vpack.c.bf16 %v4079_v8, %v4076_v51  ;;  %4294 = vmatprep.mubr.bf16.mxu0 %v10552_v35  ;;  %4598 = vmatpush1.bf16.msra.mxu0 %v7046_v43 }
 0x5d0   : > { %v4081_v56 = vpop.f32.mrf.mxu1  ;;  %4599 = vmatprep.subr.bf16.mxu0 %v7051_v39 }
 0x5d1   : > { %v4148_v1 = vshll.u32 %v9736_v18, 16  ;;  %6487 = vmatmul.mubr.msk.bf16.gmra.mxu1 %vm4216_vm9, %v9736_v18  ;;  %v4152_v26 = vshrl.u32 %v9736_v18, 16  ;;  %v4512_v25 = vrot.slane %v9736_v18, 1 }
 0x5d2   : > { %v4084_v21 = vpop.f32.mrf.mxu1  ;;  %4470 = vmatprep.mubr.bf16.mxu1 %v10552_v35 }
 0x5d3   : > { %v4150_v37 = vrot.slane %v4148_v1, 1  ;;  %4600 = vmatpush1.bf16.msra.mxu0 %v7049_v57  ;;  %v4513_v3 = vsel %vm1294_vm3, %v4510_v23, %v4512_v25 }
 0x5d4   : > { %v4086_v38 = vpop.f32.mrf.mxu1  ;;  %4601 = vmatprep.subr.bf16.mxu0 %v7054_v13 }
 0x5d5   : > { %v4151_v5 = vsel %vm697_vm2, %v4146_v12, %v4150_v37  ;;  %v4154_v22 = vor.u32 %v4152_v26, %v4150_v37 }
 0x5d6   : > { %v4087_v33 = vpop.f32.mrf.mxu1  ;;  %6469 = vmatmul.mubr.msk.bf16.gmra.mxu0 %vm4216_vm9, %v4151_v5 }
 0x5d7   : > { %v4103_v10 = vpack.c.bf16 %v4087_v33, %v4084_v21  ;;  %4304 = vmatprep.mubr.bf16.mxu0 %v10552_v35  ;;  %4602 = vmatpush1.bf16.msra.mxu0 %v7052_v27 }
 0x5d8   : > { %v4089_v40 = vpop.f32.mrf.mxu1 }
 0x5d9   : > { %v4156_v6 = vshll.u32 %v4103_v10, 16  ;;  %6488 = vmatmul.mubr.msk.bf16.gmra.mxu1 %vm4216_vm9, %v4103_v10  ;;  %v4160_v36 = vshrl.u32 %v4103_v10, 16  ;;  %v4514_v16 = vrot.slane %v4103_v10, 1 }
 0x5da   : > { %v4092_v48 = vpop.f32.mrf.mxu1  ;;  %4480 = vmatprep.mubr.bf16.mxu1 %v10552_v35 }
 0x5db   : > { %v4158_v52 = vrot.slane %v4156_v6, 1  ;;  %v4515_v55 = vsel %vm1294_vm3, %v4512_v25, %v4514_v16 }
 0x5dc   : > { %v4094_v0 = vpop.f32.mrf.mxu1 }
 0x5dd   : > { %v4159_v47 = vsel %vm697_vm2, %v4154_v22, %v4158_v52  ;;  %v4162_v32 = vor.u32 %v4160_v36, %v4158_v52  ;;  %v4704_v22 = vld [vmem:[#allocation10] sm:$0x3] }
 0x5de   : > { %v4095_v29 = vpop.f32.mrf.mxu1  ;;  %6470 = vmatmul.mubr.msk.bf16.gmra.mxu0 %vm4216_vm9, %v4159_v47  ;;  %v10553_v47 = vld [vmem:[#allocation59_spill] sm:$0xff] }
 0x5df   : > { %v4104_v17 = vpack.c.bf16 %v4095_v29, %v4092_v48  ;;  %4314 = vmatprep.mubr.bf16.mxu0 %v10552_v35  ;;  %v9827_v29 = vrot.slane %v4704_v22, %v10553_v47 }
 0x5e0   : > { %v4097_v54 = vpop.f32.mrf.mxu1 }
 0x5e1   : > { %v4164_v62 = vshll.u32 %v4104_v17, 16  ;;  %6489 = vmatmul.mubr.msk.bf16.gmra.mxu1 %vm4216_vm9, %v4104_v17  ;;  %v4168_v4 = vshrl.u32 %v4104_v17, 16  ;;  %v4516_v46 = vrot.slane %v4104_v17, 1 }
 0x5e2   : > { %4962 = vmatprep.mubr.bf16.mxu1 %v10552_v35 }
 0x5e3   : > { %v4166_v2 = vrot.slane %v4164_v62, 1  ;;  %v4517_v34 = vsel %vm1294_vm3, %v4514_v16, %v4516_v46  ;;  %v10554_v62 = vld [vmem:[#allocation62_spill] sm:$0xff] }
 0x5e5   : > { %v4167_v61 = vsel %vm697_vm2, %v4162_v32, %v4166_v2  ;;  %v4170_v19 = vor.u32 %v4168_v4, %v4166_v2  ;;  %v9832_v2 = vrot.slane %v4704_v22, %v10554_v62 }
 0x5e6   : > { %6471 = vmatmul.mubr.msk.bf16.gmra.mxu0 %vm4216_vm9, %v4167_v61 }
 0x5e7   : > { %4324 = vmatprep.mubr.bf16.mxu0 %v10552_v35 }
 0x5ee   : > { %6472 = vmatmul.mubr.msk.bf16.gmra.mxu0 %vm4216_vm9, %v4170_v19 }
 0x5ef   : > { %4619 = vmatprep.mubr.bf16.mxu0 %v10552_v35 }
 0x5f6   : > { %6510 = vmatmul.mubr.msk.bf16.vlgmr.msra.gmra.mxu0 %vm4216_vm9, %v4509_v53 }
 0x5f7   : > { %4629 = vmatprep.mubr.bf16.mxu0 %v10552_v35 }
 0x5fe   : > { %6511 = vmatmul.mubr.msk.bf16.gmra.mxu0 %vm4216_vm9, %v4511_v14 }
 0x5ff   : > { %4639 = vmatprep.mubr.bf16.mxu0 %v10552_v35 }
 0x606   : > { %6512 = vmatmul.mubr.msk.bf16.gmra.mxu0 %vm4216_vm9, %v4513_v3 }
 0x607   : > { %4649 = vmatprep.mubr.bf16.mxu0 %v10552_v35 }
 0x60e   : > { %6513 = vmatmul.mubr.msk.bf16.gmra.mxu0 %vm4216_vm9, %v4515_v55 }
 0x60f   : > { %4659 = vmatprep.mubr.bf16.mxu0 %v10552_v35 }
 0x616   : > { %6514 = vmatmul.mubr.msk.bf16.gmra.mxu0 %vm4216_vm9, %v4517_v34 }
 0x617   : > { %4669 = vmatprep.mubr.bf16.mxu0 %v10552_v35 }
 0x61e   : > { %6515 = vmatmul.mubr.msk.bf16.gmra.mxu0 %vm4216_vm9, %v4516_v46 }
 0x61f   : > { %5291 = vmatprep.mubr.bf16.mxu0 %v10552_v35 }
 0x679   : > { %v4432_v49 = vpop.f32.mrf.mxu1 }
 0x67b   : > { %v4434_v24 = vpop.f32.mrf.mxu1 }
 0x67d   : > { %v4436_v58 = vpop.f32.mrf.mxu1 }
 0x67f   : > { %v4438_v60 = vpop.f32.mrf.mxu1 }
 0x681   : > { %v4442_v41 = vpop.f32.mrf.mxu1 }
 0x683   : > { %v4444_v8 = vpop.f32.mrf.mxu1 }
 0x685   : > { %v4446_v56 = vpop.f32.mrf.mxu1 }
 0x686   : > { %v4276_v45 = vpop.f32.mrf.mxu0 }
 0x687   : > { %v4433_v44 = vadd.f32 %v4432_v49, %v4276_v45  ;;  %v4448_v1 = vpop.f32.mrf.mxu1 }
 0x688   : > { %v4278_v42 = vpop.f32.mrf.mxu0 }
 0x689   : > { %v4435_v7 = vadd.f32 %v4434_v24, %v4278_v42  ;;  %v4452_v12 = vpop.f32.mrf.mxu1 }
 0x68a   : > { %v4280_v28 = vpop.f32.mrf.mxu0 }
 0x68b   : > { %v4437_v11 = vadd.f32 %v4436_v58, %v4280_v28  ;;  %v4454_v5 = vpop.f32.mrf.mxu1 }
 0x68c   : > { %v4282_v31 = vpop.f32.mrf.mxu0 }
 0x68d   : > { %v9814_v40 = vpop.f32.mrf.mxu1  ;;  %v4439_v20 = vadd.f32 %v4438_v60, %v4282_v31 }
 0x68e   : > { %v4286_v63 = vpop.f32.mrf.mxu0 }
 0x68f   : > { %v9820_v48 = vpop.f32.mrf.mxu1  ;;  %v4443_v3 = vadd.f32 %v4442_v41, %v4286_v63 }
 0x690   : > { %v4288_v51 = vpop.f32.mrf.mxu0 }
 0x691   : > { %v9829_v17 = vpop.f32.mrf.mxu1  ;;  %v4445_v24 = vadd.f32 %v4444_v8, %v4288_v51 }
 0x692   : > { %v4290_v59 = vpop.f32.mrf.mxu0 }
 0x693   : > { %v9835_v19 = vpop.f32.mrf.mxu1  ;;  %v4447_v63 = vadd.f32 %v4446_v56, %v4290_v59 }
 0x694   : > { %v4292_v43 = vpop.f32.mrf.mxu0 }
 0x695   : > { %v9839_v46 = vpop.f32.mrf.mxu1  ;;  %v4449_v41 = vadd.f32 %v4448_v1, %v4292_v43 }
 0x696   : > { %v9790_v39 = vpop.f32.mrf.mxu0 }
 0x697   : > { %v9843_v22 = vpop.f32.mrf.mxu1 }
 0x698   : > { %v9792_v9 = vpop.f32.mrf.mxu0 }
 0x699   : > { %v4455_v56 = vadd.f32 %v4454_v5, %v9792_v9  ;;  %v4472_v1 = vpop.f32.mrf.mxu1 }
 0x69a   : > { %v9794_v18 = vpop.f32.mrf.mxu0 }
 0x69c   : > { %v9796_v57 = vpop.f32.mrf.mxu0 }
 0x69e   : > { %v9798_v13 = vpop.f32.mrf.mxu0 }
 0x6a0   : > { %v9800_v15 = vpop.f32.mrf.mxu0 }
 0x6a2   : > { %v9802_v21 = vpop.f32.mrf.mxu0 }
 0x6a4   : > { %v9804_v37 = vpop.f32.mrf.mxu0 }
 0x6a6   : > { %v9806_v27 = vpop.f32.mrf.mxu0 }
 0x6a8   : > { %v9808_v38 = vpop.f32.mrf.mxu0 }
 0x6aa   : > { %v9810_v33 = vpop.f32.mrf.mxu0 }
 0x6ac   : > { %v9812_v10 = vpop.f32.mrf.mxu0 }
 0x6ae   : > { %v9816_v26 = vpop.f32.mrf.mxu0 }
 0x6b0   : > { %v9818_v6 = vpop.f32.mrf.mxu0 }
 0x6b2   : > { %v9822_v52 = vpop.f32.mrf.mxu0 }
 0x6b4   : > { %v9824_v0 = vpop.f32.mrf.mxu0 }
 0x6b6   : > { %v4621_v54 = vpop.f32.mrf.mxu0 }
 0x6b7   : > { %v4680_v36 = vadd.f32 %v4621_v54, %v4433_v44 }
 0x6b8   : > { %v4623_v32 = vpop.f32.mrf.mxu0 }
 0x6b9   : > { %v4716_v61 = vadd.f32 %v9827_v29, %v4680_v36  ;;  %v4681_v4 = vadd.f32 %v4623_v32, %v4435_v7 }
 0x6ba   : > { %v4625_v50 = vpop.f32.mrf.mxu0 }
 0x6bb   : > { %v4717_v53 = vadd.f32 %v9832_v2, %v4681_v4  ;;  %v4682_v23 = vadd.f32 %v4625_v50, %v4437_v11  ;;  %v4740_v14 = vmax.f32 %v4716_v61, 0.0  ;;  %v4453_v4 = vadd.f32 %v4452_v12, %v9790_v39 }
 0x6bc   : > { %v4627_v25 = vpop.f32.mrf.mxu0 }
 0x6bd   : > { %v4718_v16 = vadd.f32 %v9827_v29, %v4682_v23  ;;  %v4683_v55 = vadd.f32 %v4627_v25, %v4439_v20  ;;  %v4741_v34 = vmax.f32 %v4717_v53, 0.0  ;;  %v4788_v7 = vrot.slane %v4740_v14, 1 }
 0x6be   : > { %v4631_v49 = vpop.f32.mrf.mxu0 }
 0x6bf   : > { %v4742_v45 = vmax.f32 %v4718_v16, 0.0  ;;  %v4719_v44 = vadd.f32 %v9832_v2, %v4683_v55  ;;  %v4684_v42 = vadd.f32 %v4631_v49, %v4443_v3  ;;  %v4791_v54 = vrot.slane %v4741_v34, 1 }
 0x6c0   : > { %v4633_v58 = vpop.f32.mrf.mxu0 }
 0x6c1   : > { %v4789_v28 = vrot.slane %v4742_v45, 1  ;;  %v4743_v31 = vmax.f32 %v4719_v44, 0.0  ;;  %v4720_v11 = vadd.f32 %v9827_v29, %v4684_v42  ;;  %v4685_v60 = vadd.f32 %v4633_v58, %v4445_v24 }
 0x6c2   : > { %v4635_v36 = vpop.f32.mrf.mxu0  ;;  %v4457_v24 = vadd.f32 %v9814_v40, %v9794_v18 }
 0x6c3   : > { %v4790_v32 = vsel %vm1294_vm3, %v4788_v7, %v4789_v28  ;;  %v4792_v51 = vrot.slane %v4743_v31, 1  ;;  %v4744_v8 = vmax.f32 %v4720_v11, 0.0  ;;  %v4721_v61 = vadd.f32 %v9832_v2, %v4685_v60  ;;  %v4474_v11 = vpop.f32.mrf.mxu1 }
 0x6c4   : > { %v4686_v50 = vadd.f32 %v4635_v36, %v4447_v63  ;;  %v4637_v20 = vpop.f32.mrf.mxu0  ;;  %v9848_v53 = vmax.f32 %v4740_v14, %v4790_v32 }
 0x6c5   : > { %v4794_v23 = vrot.slane %v4744_v8, 1  ;;  %v4745_v25 = vmax.f32 %v4721_v61, 0.0  ;;  %v4687_v59 = vadd.f32 %v4637_v20, %v4449_v41  ;;  %v4793_v43 = vsel %vm1294_vm3, %v4791_v54, %v4792_v51 }
 0x6c6   : > { %v4722_v3 = vadd.f32 %v9827_v29, %v4686_v50  ;;  %v4641_v16 = vpop.f32.mrf.mxu0  ;;  %v9853_v55 = vmax.f32 %v4741_v34, %v4793_v43  ;;  %v9874_v50 = vpop.f32.mrf.mxu1  ;;  %v4463_v20 = vadd.f32 %v9829_v17, %v9798_v13 }
 0x6c7   : > { %v4795_v49 = vsel %vm1294_vm3, %v4789_v28, %v4794_v23  ;;  %v4796_v39 = vrot.slane %v4745_v25, 1  ;;  %v4723_v12 = vadd.f32 %v9832_v2, %v4687_v59  ;;  %v4688_v14 = vadd.f32 %v4641_v16, %v4453_v4 }
 0x6c8   : > { %v4746_v44 = vmax.f32 %v4722_v3, 0.0  ;;  %v4643_v42 = vpop.f32.mrf.mxu0  ;;  %v9859_v7 = vmax.f32 %v4742_v45, %v4795_v49  ;;  %v4459_v28 = vadd.f32 %v9820_v48, %v9796_v57  ;;  %v4465_v59 = vadd.f32 %v9835_v19, %v9800_v15 }
 0x6c9   : > { %v4747_v9 = vmax.f32 %v4723_v12, 0.0  ;;  %v4724_v5 = vadd.f32 %v9827_v29, %v4688_v14  ;;  %v4689_v58 = vadd.f32 %v4643_v42, %v4455_v56  ;;  %v4797_v34 = vsel %vm1294_vm3, %v4792_v51, %v4796_v39 }
 0x6ca   : > { %v4798_v60 = vrot.slane %v4746_v44, 1  ;;  %v4645_v63 = vpop.f32.mrf.mxu0  ;;  %v9865_v41 = vmax.f32 %v4743_v31, %v4797_v34  ;;  %v4887_v18 = vpack.c.bf16 %v9859_v7, %v9848_v53  ;;  %v4467_v14 = vadd.f32 %v9839_v46, %v9802_v21  ;;  %v7058_v53 = vld [vmem:[#allocation11 + $0x38] sm:$0xff]   ;;  %v7059_v7 = vld [vmem:[#allocation11 + $0x30] sm:$0xff]  }
 0x6cb   : > { %v4800_v40 = vrot.slane %v4747_v9, 1  ;;  %v4748_v45 = vmax.f32 %v4724_v5, 0.0  ;;  %v4725_v54 = vadd.f32 %v9832_v2, %v4689_v58  ;;  %v4690_v36 = vadd.f32 %v4645_v63, %v4457_v24  ;;  %v4478_v5 = vpop.f32.mrf.mxu1 }
 0x6cc   : > { %v4799_v32 = vsel %vm1294_vm3, %v4794_v23, %v4798_v60  ;;  %v4647_v61 = vpop.f32.mrf.mxu0  ;;  %v4888_v51 = vpack.c.bf16 %v9865_v41, %v9853_v55  ;;  %v4469_v58 = vadd.f32 %v9843_v22, %v9804_v37  ;;  %v7057_v55 = vld [vmem:[%s10317_s9 + $0x10] ss:$0 sps:$4 sm:$0xff]   ;;  %v7060_v41 = vld [vmem:[#allocation11 + $0x28] sm:$0xff]  }
 0x6cd   : > { %v4802_v4 = vrot.slane %v4748_v45, 1  ;;  %v4749_v57 = vmax.f32 %v4725_v54, 0.0  ;;  %v4726_v48 = vadd.f32 %v9827_v29, %v4690_v36  ;;  %v4691_v31 = vadd.f32 %v4647_v61, %v4459_v28 }
 0x6ce   : > { %v4651_v43 = vpop.f32.mrf.mxu0  ;;  %v4801_v23 = vsel %vm1294_vm3, %v4796_v39, %v4800_v40  ;;  %v9881_v56 = vmax.f32 %v4744_v8, %v4799_v32 }
 0x6cf   : > { %v4803_v3 = vsel %vm1294_vm3, %v4798_v60, %v4802_v4  ;;  %v4804_v16 = vrot.slane %v4749_v57, 1  ;;  %v4750_v49 = vmax.f32 %v4726_v48, 0.0  ;;  %v4727_v12 = vadd.f32 %v9832_v2, %v4691_v31 }
 0x6d0   : > { %v4692_v24 = vadd.f32 %v4651_v43, %v4463_v20  ;;  %v4653_v42 = vpop.f32.mrf.mxu0  ;;  %v9887_v13 = vmax.f32 %v4745_v25, %v4801_v23  ;;  %v9889_v17 = vmax.f32 %v4746_v44, %v4803_v3  ;;  %v4475_v31 = vadd.f32 %v4474_v11, %v9808_v38 }
 0x6d1   : > { %v4806_v15 = vrot.slane %v4750_v49, 1  ;;  %v4751_v19 = vmax.f32 %v4727_v12, 0.0  ;;  %v4693_v39 = vadd.f32 %v4653_v42, %v4465_v59  ;;  %v4805_v8 = vsel %vm1294_vm3, %v4800_v40, %v4804_v16 }
 0x6d2   : > { %v4728_v34 = vadd.f32 %v9827_v29, %v4692_v24  ;;  %v4655_v28 = vpop.f32.mrf.mxu0  ;;  %v9895_v60 = vmax.f32 %v4747_v9, %v4805_v8  ;;  %v4889_v21 = vpack.c.bf16 %v9889_v17, %v9881_v56  ;;  %v4473_v40 = vadd.f32 %v4472_v1, %v9806_v27  ;;  %v7056_v56 = vld [vmem:[%s10317_s9 + $0x8] sm:$0xff]   ;;  %v7064_v17 = vld [vmem:[#allocation11 + $0x8] sm:$0xff]  }
 0x6d3   : > { %v4807_v46 = vsel %vm1294_vm3, %v4802_v4, %v4806_v15  ;;  %v4808_v25 = vrot.slane %v4751_v19, 1  ;;  %v4729_v44 = vadd.f32 %v9832_v2, %v4693_v39  ;;  %v4694_v63 = vadd.f32 %v4655_v28, %v4467_v14  ;;  %v4482_v4 = vpop.f32.mrf.mxu1 }
 0x6d4   : > { %v4752_v54 = vmax.f32 %v4728_v34, 0.0  ;;  %v4657_v36 = vpop.f32.mrf.mxu0  ;;  %v9902_v32 = vmax.f32 %v4748_v45, %v4807_v46  ;;  %v4890_v37 = vpack.c.bf16 %v9895_v60, %v9887_v13  ;;  %v4479_v28 = vadd.f32 %v4478_v5, %v9812_v10  ;;  %v7063_v13 = vld [vmem:[#allocation11 + $0x10] sm:$0xff]   ;;  %v7065_v60 = vld [vmem:[#allocation11] sm:$0xff]  }
 0x6d5   : > { %v4753_v22 = vmax.f32 %v4729_v44, 0.0  ;;  %v4730_v9 = vadd.f32 %v9827_v29, %v4694_v63  ;;  %v4695_v61 = vadd.f32 %v4657_v36, %v4469_v58  ;;  %v4809_v48 = vsel %vm1294_vm3, %v4804_v16, %v4808_v25  ;;  %v4484_v39 = vpop.f32.mrf.mxu1 }
 0x6d6   : > { %v4810_v20 = vrot.slane %v4752_v54, 1  ;;  %v4661_v59 = vpop.f32.mrf.mxu0  ;;  %v9909_v43 = vmax.f32 %v4749_v57, %v4809_v48  ;;  %v4485_v10 = vadd.f32 %v4484_v39, %v9818_v6 }
 0x6d7   : > { %v4812_v27 = vrot.slane %v4753_v22, 1  ;;  %v4754_v1 = vmax.f32 %v4730_v9, 0.0  ;;  %v4731_v45 = vadd.f32 %v9832_v2, %v4695_v61  ;;  %v4696_v23 = vadd.f32 %v4661_v59, %v4473_v40  ;;  %v4486_v61 = vpop.f32.mrf.mxu1 }
 0x6d8   : > { %v4811_v3 = vsel %vm1294_vm3, %v4806_v15, %v4810_v20  ;;  %v4663_v12 = vpop.f32.mrf.mxu0 }
 0x6d9   : > { %v4814_v14 = vrot.slane %v4754_v1, 1  ;;  %v4755_v24 = vmax.f32 %v4731_v45, 0.0  ;;  %v9914_v42 = vadd.f32 %v9827_v29, %v4696_v23  ;;  %v4697_v16 = vadd.f32 %v4663_v12, %v4475_v31 }
 0x6da   : > { %v4665_v38 = vpop.f32.mrf.mxu0  ;;  %v4813_v11 = vsel %vm1294_vm3, %v4808_v25, %v4812_v27  ;;  %v9917_v57 = vmax.f32 %v4750_v49, %v4811_v3  ;;  %v4483_v49 = vadd.f32 %v4482_v4, %v9816_v26  ;;  %v4488_v3 = vpop.f32.mrf.mxu1 }
 0x6db   : > { %v4815_v8 = vsel %vm1294_vm3, %v4810_v20, %v4814_v14  ;;  %v4816_v58 = vrot.slane %v4755_v24, 1  ;;  %v4756_v34 = vmax.f32 %v9914_v42, 0.0  ;;  %v9922_v15 = vadd.f32 %v9832_v2, %v4697_v16 }
 0x6dc   : > { %v4667_v46 = vpop.f32.mrf.mxu0  ;;  %v9925_v44 = vmax.f32 %v4752_v54, %v4815_v8  ;;  %v9927_v63 = vmax.f32 %v4751_v19, %v4813_v11  ;;  %v4891_v25 = vpack.c.bf16 %v9917_v57, %v9902_v32  ;;  %v4477_v20 = vadd.f32 %v9874_v50, %v9810_v33  ;;  %v7066_v32 = vld [vmem:[#allocation11 + $0x40] sm:$0xff]  }
 0x6dd   : > { %v4818_v40 = vrot.slane %v4756_v34, 1  ;;  %v4757_v36 = vmax.f32 %v9922_v15, 0.0  ;;  %v4817_v9 = vsel %vm1294_vm3, %v4812_v27, %v4816_v58  ;;  %v4699_v26 = vadd.f32 %v4667_v46, %v4479_v28 }
 0x6de   : > { %v4671_v5 = vpop.f32.mrf.mxu0  ;;  %v9937_v54 = vmax.f32 %v4753_v22, %v4817_v9  ;;  %v4892_v19 = vpack.c.bf16 %v9927_v63, %v9909_v43  ;;  %v4487_v27 = vadd.f32 %v4486_v61, %v9822_v52  ;;  %v4698_v12 = vadd.f32 %v4665_v38, %v4477_v20  ;;  %v7055_v43 = vld [vmem:[%s10317_s9] sm:$0xff]  }
 0x6df   : > { %v4819_v48 = vsel %vm1294_vm3, %v4814_v14, %v4818_v40  ;;  %v4820_v31 = vrot.slane %v4757_v36, 1  ;;  %v4700_v4 = vadd.f32 %v4671_v5, %v4483_v49  ;;  %v4489_v11 = vadd.f32 %v4488_v3, %v9824_v0 }
 0x6e0   : > { %v4673_v59 = vpop.f32.mrf.mxu0  ;;  %v4872_v45 = vmax.f32 %v4754_v1, %v4819_v48  ;;  %v4735_v8 = vadd.f32 %v9832_v2, %v4699_v26  ;;  %v4734_v38 = vadd.f32 %v9827_v29, %v4698_v12 }
 0x6e1   : > { %v4736_v6 = vadd.f32 %v9827_v29, %v4700_v4  ;;  %v4701_v23 = vadd.f32 %v4673_v59, %v4485_v10  ;;  %v4821_v22 = vsel %vm1294_vm3, %v4816_v58, %v4820_v31 }
 0x6e2   : > { %v4675_v16 = vpop.f32.mrf.mxu0  ;;  %v4873_v39 = vmax.f32 %v4755_v24, %v4821_v22  ;;  %v4893_v14 = vpack.c.bf16 %v4872_v45, %v9925_v44  ;;  %v4759_v24 = vmax.f32 %v4735_v8, 0.0  ;;  %v4758_v5 = vmax.f32 %v4734_v38, 0.0  ;;  %v7067_v38 = vld [vmem:[%s10319_s11 + $0x40] ss:$8 sps:$4 sm:$0xff]  }
 0x6e3   : > { %v4737_v33 = vadd.f32 %v9832_v2, %v4701_v23  ;;  %v4702_v50 = vadd.f32 %v4675_v16, %v4487_v27  ;;  %v4760_v15 = vmax.f32 %v4736_v6, 0.0 }
 0x6e4   : > { %v4677_v1 = vpop.f32.mrf.mxu0  ;;  %v4894_v52 = vpack.c.bf16 %v4873_v39, %v9937_v54  ;;  %v4824_v48 = vrot.slane %v4759_v24, 1 }
 0x6e5   : > { %v4761_v28 = vmax.f32 %v4737_v33, 0.0  ;;  %v4738_v58 = vadd.f32 %v9827_v29, %v4702_v50  ;;  %v4703_v46 = vadd.f32 %v4677_v1, %v4489_v11  ;;  %v4826_v0 = vrot.slane %v4760_v15, 1 }
 0x6e6   : > { %v4922_v29 = vsel %vm870_vm0, 4294967295, %v7438_v30  ;;  %v4825_v22 = vsel %vm1294_vm3, %v4820_v31, %v4824_v48 }
 0x6e7   : > { %v4762_v49 = vmax.f32 %v4738_v58, 0.0  ;;  %v4739_v44 = vadd.f32 %v9832_v2, %v4703_v46  ;;  %v4828_v9 = vrot.slane %v4761_v28, 1  ;;  %v4822_v2 = vrot.slane %v4758_v5, 1 }
 0x6e8   : > { %v4923_v16 = vsel %vm1294_vm3, %v4922_v29, 0  ;;  %v4875_v33 = vmax.f32 %v4757_v36, %v4825_v22 }
 0x6e9   : > { %v4830_v61 = vrot.slane %v4762_v49, 1  ;;  %v4763_v10 = vmax.f32 %v4739_v44, 0.0  ;;  %v4829_v27 = vsel %vm1294_vm3, %v4824_v48, %v4828_v9  ;;  %v4827_v3 = vsel %vm1294_vm3, %v4822_v2, %v4826_v0  ;;  %v7072_v44 = vld [vmem:[%s10319_s11 + $0x94] ss:$8 sps:$4 sm:$0xff]  }
 0x6ea   : > { %v4877_v39 = vmax.f32 %v4759_v24, %v4829_v27  ;;  %v4823_v11 = vsel %vm1294_vm3, %v4818_v40, %v4822_v2  ;;  %v4876_v1 = vmax.f32 %v4758_v5, %v4827_v3  ;;  %v7069_v24 = vld [vmem:[%s10319_s11 + $0x44] ss:$8 sps:$4 sm:$0xff]   ;;  %v7079_v5 = vld [vmem:[%s10319_s11 + $0x20] ss:$8 sps:$4 sm:$0xff]   ;;  %v7087_v48 = vld [vmem:[%s10319_s11 + $0x14] ss:$8 sps:$4 sm:$0xff]  }
 0x6eb   : > { %v4831_v26 = vsel %vm1294_vm3, %v4826_v0, %v4830_v61  ;;  %v4880_v54 = vmax.f32 %v4762_v49, %v4830_v61  ;;  %v4832_v4 = vrot.slane %v4763_v10, 1  ;;  %v7075_v0 = vld [vmem:[%s10319_s11 + $0x34] ss:$8 sps:$4 sm:$0xff]   ;;  %5265 = vmatprep.subr.bf16.mxu0 %v7069_v24  ;;  %v7073_v61 = vld [vmem:[%s10319_s11 + $0x30] ss:$8 sps:$4 sm:$0xff]  }
 0x6ec   : > { %v4878_v20 = vmax.f32 %v4760_v15, %v4831_v26  ;;  %v4896_v30 = vpack.c.bf16 %v4877_v39, %v4875_v33  ;;  %v4874_v15 = vmax.f32 %v4756_v34, %v4823_v11  ;;  %5266 = vmatpush1.bf16.msra.mxu0 %v7067_v38  ;;  %v7085_v26 = vld [vmem:[%s10319_s11 + $0x10] ss:$8 sps:$4 sm:$0xff]  }
 0x6ed   : > { %v4881_v59 = vmax.f32 %v4763_v10, %v4832_v4  ;;  %v4833_v45 = vsel %vm1294_vm3, %v4828_v9, %v4832_v4  ;;  %5267 = vmatprep.subr.bf16.mxu0 %v7075_v0  ;;  %v7081_v10 = vld [vmem:[%s10319_s11 + $0x24] ss:$8 sps:$4 sm:$0xff]   ;;  %v7105_v0 = vld [vmem:[%s10319_s11 + $0xd4] ss:$8 sps:$4 sm:$0xff]  }
 0x6ee   : > { %v4879_v6 = vmax.f32 %v4761_v28, %v4833_v45  ;;  %v4897_v23 = vpack.c.bf16 %v4880_v54, %v4878_v20  ;;  %v4895_v31 = vpack.c.bf16 %v4876_v1, %v4874_v15 }
 0x6f0   : > { %v4898_v12 = vpack.c.bf16 %v4881_v59, %v4879_v6  ;;  %v4925_v50 = vand.u32 %v4923_v16, %v4897_v23  ;;  %5268 = vmatpush1.bf16.msra.mxu0 %v7073_v61  ;;  %v7100_v61 = vld [vmem:[%s10319_s11 + $0x130] ss:$8 sps:$4 sm:$0xff]  }
 0x6f1   : > { %5269 = vmatprep.subr.bf16.mxu0 %v7081_v10 }
 0x6f2   : > { %v4928_v8 = vand.u32 %v4923_v16, %v4898_v12 }
 0x6f4   : > { %4934 = vmatprep.subr.bf16.mxu1 %v4928_v8  ;;  %5270 = vmatpush1.bf16.msra.mxu0 %v7079_v5  ;;  %v7070_v8 = vld [vmem:[%s10319_s11 + $0x90] ss:$8 sps:$4 sm:$0xff]   ;;  %v7108_v5 = vld [vmem:[%s10319_s11 + $0x124] ss:$8 sps:$4 sm:$0xff]  }
 0x6f5   : > { %4935 = vmatpush1.bf16.msra.mxu1 %v4925_v50  ;;  %5271 = vmatprep.subr.bf16.mxu0 %v7087_v48  ;;  %v7078_v50 = vld [vmem:[%s10319_s11 + $0x84] ss:$8 sps:$4 sm:$0xff]  }
 0x6f6   : > { %4936 = vmatprep.subr.bf16.mxu1 %v4896_v30 }
 0x6f8   : > { %5272 = vmatpush1.bf16.msra.mxu0 %v7085_v26  ;;  %v7103_v26 = vld [vmem:[%s10319_s11 + $0xd0] ss:$8 sps:$4 sm:$0xff]  }
 0x6f9   : > { %4937 = vmatpush1.bf16.msra.mxu1 %v4895_v31 }
 0x6fa   : > { %4938 = vmatprep.subr.bf16.mxu1 %v4894_v52 }
 0x6fd   : > { %4939 = vmatpush1.bf16.msra.mxu1 %v4893_v14 }
 0x6fe   : > { %4940 = vmatprep.subr.bf16.mxu1 %v4892_v19 }
 0x701   : > { %4941 = vmatpush1.bf16.msra.mxu1 %v4891_v25 }
 0x702   : > { %4942 = vmatprep.subr.bf16.mxu1 %v4890_v37 }
 0x705   : > { %4943 = vmatpush1.bf16.msra.mxu1 %v4889_v21 }
 0x706   : > { %4944 = vmatprep.subr.bf16.mxu1 %v4888_v51  ;;  %v7062_v51 = vld [vmem:[#allocation11 + $0x18] sm:$0xff]  }
 0x709   : > { %4945 = vmatpush1.bf16.msra.mxu1 %v4887_v18  ;;  %v7061_v18 = vld [vmem:[#allocation11 + $0x20] sm:$0xff]  }
 0x70a   : > { %5135 = vmatprep.subr.bf16.mxu1 %v10552_v35 }
 0x70c   : > { %6519 = vmatmul.mubr.msk.bf16.vlgmr.msra.gmra.mxu1 %vm4912_vm10, %v7055_v43  ;;  %v7076_v43 = vld [vmem:[%s10319_s11 + $0x80] ss:$8 sps:$4 sm:$0xff]  }
 0x70d   : > { %4972 = vmatprep.mubr.bf16.mxu1 %v10552_v35  ;;  %5136 = vmatpush1.bf16.msra.mxu1 %v7058_v53 }
 0x70e   : > { %5137 = vmatprep.subr.bf16.mxu1 %v10552_v35 }
 0x711   : > { %5138 = vmatpush1.bf16.msra.mxu1 %v7059_v7 }
 0x712   : > { %5139 = vmatprep.subr.bf16.mxu1 %v10552_v35 }
 0x714   : > { %6520 = vmatmul.mubr.msk.bf16.gmra.mxu1 %vm4912_vm10, %v7056_v56  ;;  %v7084_v56 = vld [vmem:[%s10319_s11 + $0x74] ss:$8 sps:$4 sm:$0xff]  }
 0x715   : > { %4982 = vmatprep.mubr.bf16.mxu1 %v10552_v35  ;;  %5140 = vmatpush1.bf16.msra.mxu1 %v7060_v41 }
 0x716   : > { %5141 = vmatprep.subr.bf16.mxu1 %v10552_v35 }
 0x719   : > { %5142 = vmatpush1.bf16.msra.mxu1 %v7061_v18 }
 0x71a   : > { %5143 = vmatprep.subr.bf16.mxu1 %v10552_v35 }
 0x71c   : > { %6521 = vmatmul.mubr.msk.bf16.gmra.mxu1 %vm4912_vm10, %v7057_v55 }
 0x71d   : > { %5144 = vmatpush1.bf16.msra.mxu1 %v7062_v51 }
 0x71e   : > { %5145 = vmatprep.subr.bf16.mxu1 %v10552_v35 }
 0x721   : > { %5146 = vmatpush1.bf16.msra.mxu1 %v7063_v13 }
 0x722   : > { %5147 = vmatprep.subr.bf16.mxu1 %v10552_v35 }
 0x725   : > { %5148 = vmatpush1.bf16.msra.mxu1 %v7064_v17 }
 0x726   : > { %5149 = vmatprep.subr.bf16.mxu1 %v10552_v35 }
 0x729   : > { %5150 = vmatpush1.bf16.msra.mxu1 %v7065_v60 }
 0x72a   : > { %5165 = vmatprep.subr.bf16.mxu1 %v10552_v35 }
 0x72d   : > { %5166 = vmatpush2.bf16.msra.mxu1 %v7066_v32 }
 0x72e   : > { %5384 = vmatprep.subr.bf16.mxu1 %v7072_v44 }
 0x7cc   : > { %v10004_v21 = vpop.f32.mrf.mxu1 }
 0x7ce   : > { %v4966_v37 = vpop.f32.mrf.mxu1 }
 0x7cf   : > { %v6853_v42 = vpack.i.bf16 %v4966_v37, %v10004_v21 }
 0x7d0   : > { %v4968_v57 = vpop.f32.mrf.mxu1 }
 0x7d1   : > { %6854 = vrot.lane.b32.xlu0 %v6853_v42, %s7440_s19 }
 0x7d2   : > { %v4970_v34 = vpop.f32.mrf.mxu1 }
 0x7d3   : > { %v6858_v63 = vpack.i.bf16 %v4970_v34, %v4968_v57 }
 0x7d4   : > { %v10007_v25 = vpop.f32.mrf.mxu1 }
 0x7d5   : > { %6859 = vrot.lane.b32.xlu1 %v6858_v63, %s7440_s19 }
 0x7d6   : > { %v4976_v40 = vpop.f32.mrf.mxu1 }
 0x7d7   : > { %v6863_v36 = vpack.i.bf16 %v4976_v40, %v10007_v25 }
 0x7d8   : > { %v10010_v19 = vpop.f32.mrf.mxu1 }
 0x7d9   : > { %6864 = vrot.lane.b32.xlu0 %v6863_v36, %s7440_s19  ;;  %v7091_v36 = vld [vmem:[%s10319_s11] ss:$8 sps:$4 sm:$0xff]  }
 0x7da   : > { %v4980_v14 = vpop.f32.mrf.mxu1 }
 0x7db   : > { %v6868_v52 = vpack.i.bf16 %v4980_v14, %v10010_v19 }
 0x7dc   : > { %v10013_v28 = vpop.f32.mrf.mxu1 }
 0x7dd   : > { %6869 = vrot.lane.b32.xlu1 %v6868_v52, %s7440_s19  ;;  %v7094_v52 = vld [vmem:[%s10319_s11 + $0x50] ss:$8 sps:$4 sm:$0xff]  }
 0x7de   : > { %v10015_v58 = vpop.f32.mrf.mxu1 }
 0x7df   : > { %v6873_v46 = vpack.i.bf16 %v10015_v58, %v10013_v28 }
 0x7e0   : > { %v4988_v49 = vpop.f32.mrf.mxu1 }
 0x7e1   : > { %6874 = vrot.lane.b32.xlu0 %v6873_v46, %s7440_s19  ;;  %v7097_v49 = vld [vmem:[%s10319_s11 + $0xe0] ss:$8 sps:$4 sm:$0xff]  }
 0x7e2   : > { %v4989_v9 = vpop.f32.mrf.mxu1 }
 0x843   : > { %v6855_v54 = vpop.permute.xlu0 %6854 }
 0x844   : > { %v6857_v4 = vunpack.i.h.bf16 %v6855_v54  ;;  %v6856_v20 = vunpack.i.l.bf16 %v6855_v54  ;;  %v7111_v54 = vld [vmem:[%s10319_s11 + $0xc4] ss:$8 sps:$4 sm:$0xff]  }
 0x846   : > { %v5022_v45 = vsel %vm5021_vm11, %v6856_v20, %v6857_v4  ;;  %v5038_v2 = vmax.f32 %v4966_v37, %v6857_v4  ;;  %v7106_v20 = vld [vmem:[%s10319_s11 + $0x120] ss:$8 sps:$4 sm:$0xff]  }
 0x847   : > { %v6860_v59 = vpop.permute.xlu1 %6859  ;;  %v5037_v22 = vmax.f32 %v10004_v21, %v5022_v45  ;;  %v7082_v21 = vld [vmem:[%s10319_s11 + $0x70] ss:$8 sps:$4 sm:$0xff]  }
 0x848   : > { %v6862_v29 = vunpack.i.h.bf16 %v6860_v59  ;;  %v6861_v27 = vunpack.i.l.bf16 %v6860_v59  ;;  %v7114_v59 = vld [vmem:[%s10319_s11 + $0x114] ss:$8 sps:$4 sm:$0xff]  }
 0x84a   : > { %v5040_v6 = vmax.f32 %v4970_v34, %v6862_v29  ;;  %v5023_v23 = vsel %vm5021_vm11, %v6861_v27, %v6862_v29  ;;  %v7109_v29 = vld [vmem:[%s10319_s11 + $0xc0] ss:$8 sps:$4 sm:$0xff]   ;;  %v7117_v27 = vld [vmem:[%s10319_s11 + $0xb4] ss:$8 sps:$4 sm:$0xff]  }
 0x84b   : > { %v5039_v3 = vmax.f32 %v4968_v57, %v5023_v23  ;;  %v6865_v12 = vpop.permute.xlu0 %6864  ;;  %v7120_v23 = vld [vmem:[%s10319_s11 + $0x104] ss:$8 sps:$4 sm:$0xff]  }
 0x84c   : > { %v5048_v16 = vpack.c.bf16 %v5040_v6, %v5038_v2  ;;  %v6867_v39 = vunpack.i.h.bf16 %v6865_v12  ;;  %v6866_v11 = vunpack.i.l.bf16 %v6865_v12  ;;  %v7112_v6 = vld [vmem:[%s10319_s11 + $0x110] ss:$8 sps:$4 sm:$0xff]   ;;  %v7123_v12 = vld [vmem:[%s10319_s11 + $0xa4] ss:$8 sps:$4 sm:$0xff]  }
 0x84d   : > { %v5047_v33 = vpack.c.bf16 %v5039_v3, %v5037_v22  ;;  %v7115_v3 = vld [vmem:[%s10319_s11 + $0xb0] ss:$8 sps:$4 sm:$0xff]  }
 0x84e   : > { %6531 = vmatprep.mubr.msk.bf16.mxu1 %vm5125_vm12, %v5048_v16  ;;  %v5024_v30 = vsel %vm5021_vm11, %v6866_v11, %v6867_v39  ;;  %v5042_v55 = vmax.f32 %v4976_v40, %v6867_v39  ;;  %v7090_v40 = vld [vmem:[%s10319_s11 + $0x64] ss:$8 sps:$4 sm:$0xff]   ;;  %v7118_v39 = vld [vmem:[%s10319_s11 + $0x100] ss:$8 sps:$4 sm:$0xff]   ;;  %v7126_v11 = vld [vmem:[%s10319_s11 + $0xf4] ss:$8 sps:$4 sm:$0xff]  }
 0x84f   : > { %5168 = vmatmul.mubr.bf16.vlgmr.msra.gmra.mxu1 %v5047_v33  ;;  %v6870_v1 = vpop.permute.xlu1 %6869  ;;  %v5041_v41 = vmax.f32 %v10007_v25, %v5024_v30  ;;  %v7088_v25 = vld [vmem:[%s10319_s11 + $0x60] ss:$8 sps:$4 sm:$0xff]   ;;  %v7124_v30 = vld [vmem:[%s10319_s11 + $0xf0] ss:$8 sps:$4 sm:$0xff]  }
 0x850   : > { %v6872_v15 = vunpack.i.h.bf16 %v6870_v1  ;;  %v6871_v31 = vunpack.i.l.bf16 %v6870_v1  ;;  %5385 = vmatpush1.bf16.msra.mxu1 %v7070_v8  ;;  %v7121_v33 = vld [vmem:[%s10319_s11 + $0xa0] ss:$8 sps:$4 sm:$0xff]  }
 0x851   : > { %5386 = vmatprep.subr.bf16.mxu1 %v7078_v50  ;;  %v7129_v50 = vld [vmem:[%s10319_s11 + $0x184] ss:$8 sps:$4 sm:$0xff]  }
 0x852   : > { %v5044_v53 = vmax.f32 %v4980_v14, %v6872_v15  ;;  %v5025_v7 = vsel %vm5021_vm11, %v6871_v31, %v6872_v15  ;;  %v7096_v14 = vld [vmem:[%s10319_s11 + $0x54] ss:$8 sps:$4 sm:$0xff]   ;;  %v7127_v31 = vld [vmem:[%s10319_s11 + $0x180] ss:$8 sps:$4 sm:$0xff]  }
 0x853   : > { %v5043_v18 = vmax.f32 %v10010_v19, %v5025_v7  ;;  %v6875_v51 = vpop.permute.xlu0 %6874  ;;  %v7093_v19 = vld [vmem:[%s10319_s11 + $0x4] ss:$8 sps:$4 sm:$0xff]   ;;  %v7133_v7 = vld [vmem:[%s10319_s11 + $0x160] ss:$8 sps:$4 sm:$0xff]  }
 0x854   : > { %v5050_v13 = vpack.c.bf16 %v5044_v53, %v5042_v55  ;;  %v6877_v17 = vunpack.i.h.bf16 %v6875_v51  ;;  %v6876_v60 = vunpack.i.l.bf16 %v6875_v51  ;;  %5387 = vmatpush1.bf16.msra.mxu1 %v7076_v43  ;;  %5273 = vmatprep.subr.bf16.mxu0 %v7093_v19  ;;  %v7132_v43 = vld [vmem:[%s10319_s11 + $0x174] ss:$8 sps:$4 sm:$0xff]   ;;  %v7130_v55 = vld [vmem:[%s10319_s11 + $0x170] ss:$8 sps:$4 sm:$0xff]   ;;  %v7135_v53 = vld [vmem:[%s10319_s11 + $0x164] ss:$8 sps:$4 sm:$0xff]  }
 0x855   : > { %v5049_v32 = vpack.c.bf16 %v5043_v18, %v5041_v41  ;;  %5388 = vmatprep.subr.bf16.mxu1 %v7084_v56  ;;  %5274 = vmatpush1.bf16.msra.mxu0 %v7091_v36  ;;  %v7138_v41 = vld [vmem:[%s10319_s11 + $0x154] ss:$8 sps:$4 sm:$0xff]   ;;  %v7141_v18 = vld [vmem:[%s10319_s11 + $0x144] ss:$8 sps:$4 sm:$0xff]   ;;  %v7139_v51 = vld [vmem:[%s10319_s11 + $0x140] ss:$8 sps:$4 sm:$0xff]  }
 0x856   : > { %v5046_v37 = vmax.f32 %v10015_v58, %v6877_v17  ;;  %v5026_v42 = vsel %vm5021_vm11, %v6876_v60, %v6877_v17  ;;  %6532 = vmatprep.mubr.msk.bf16.mxu1 %vm5125_vm12, %v5050_v13  ;;  %v7102_v58 = vld [vmem:[%s10319_s11 + $0x134] ss:$8 sps:$4 sm:$0xff]   ;;  %v7154_v19 = vld [vmem:[%s10321_s13 + $0x48] sm:$0xff]  }
 0x857   : > { %5176 = vmatmul.mubr.bf16.gmra.mxu1 %v5049_v32  ;;  %v5045_v34 = vmax.f32 %v10013_v28, %v5026_v42  ;;  %v7099_v28 = vld [vmem:[%s10319_s11 + $0xe4] ss:$8 sps:$4 sm:$0xff]   ;;  %v7142_v17 = vld [vmem:[%s10321_s13 + $0x78] sm:$0x1f]   ;;  %v7145_v32 = vld [vmem:[%s10321_s13 + $0x30] sm:$0xff]  }
 0x858   : > { %v5052_v57 = vpack.c.bf16 %v5046_v37, %v5046_v37  ;;  %5389 = vmatpush1.bf16.msra.mxu1 %v7082_v21  ;;  %5490 = vmatprep.subr.bf16.mxu0 %v7099_v28  ;;  %v7143_v60 = vld [vmem:[%s10321_s13 + $0x38] sm:$0xff]   ;;  %v7144_v21 = vld [vmem:[%s10321_s13 + $0x70] sm:$0xff]   ;;  %v7146_v37 = vld [vmem:[%s10321_s13 + $0x68] sm:$0xff]  }
 0x859   : > { %v5051_v63 = vpack.c.bf16 %v5045_v34, %v5045_v34  ;;  %5390 = vmatprep.subr.bf16.mxu1 %v7090_v40  ;;  %v7147_v42 = vld [vmem:[%s10321_s13 + $0x28] sm:$0xff]   ;;  %v7149_v34 = vld [vmem:[%s10321_s13 + $0x20] sm:$0xff]   ;;  %v7152_v40 = vld [vmem:[%s10321_s13 + $0x50] sm:$0xff]  }
 0x85a   : > { %6533 = vmatprep.mubr.msk.bf16.mxu1 %vm5125_vm12, %v5052_v57  ;;  %v7148_v57 = vld [vmem:[%s10321_s13 + $0x60] sm:$0xff]   ;;  %v7153_v36 = vld [vmem:[%s10321_s13 + $0x10] sm:$0xff]  }
 0x85b   : > { %v7157_v28 = vld [vmem:[%s10321_s13] sm:$0xff]  }
 0x85c   : > { %5391 = vmatpush1.bf16.msra.mxu1 %v7088_v25  ;;  %v7151_v25 = vld [vmem:[%s10321_s13 + $0x18] sm:$0xff]  }
 0x85d   : > { %5392 = vmatprep.subr.bf16.mxu1 %v7096_v14  ;;  %v7155_v14 = vld [vmem:[%s10321_s13 + $0x8] sm:$0xff]  }
 0x85f   : > { %5184 = vmatmul.mubr.bf16.gmra.mxu1 %v5051_v63  ;;  %v7150_v63 = vld [vmem:[%s10321_s13 + $0x58] sm:$0xff]  }
 0x860   : > { %5410 = vmatprep.mubr.bf16.mxu1 %v10552_v35  ;;  %5393 = vmatpush1.bf16.msra.mxu1 %v7094_v52  ;;  %v7156_v52 = vld [vmem:[%s10321_s13 + $0x40] sm:$0xff]  }
 0x861   : > { %5598 = vmatprep.subr.bf16.mxu1 %v7102_v58  ;;  %v7158_v58 = vld [vmem:[#allocation13 + $0x38] ss:$0 sps:$4 sm:$0xff]  }
 0x90f   : > { %v5169_v46 = vpop.f32.mrf.mxu1 }
 0x911   : > { %v5171_v38 = vpop.f32.mrf.mxu1 }
 0x912   : > { %v5999_v38 = vsel %vm4235_vm6, %v7158_v58, 0 }
 0x913   : > { %v5172_v24 = vpop.f32.mrf.mxu1 }
 0x914   : > { %v5191_v44 = vpack.c.bf16 %v5172_v24, %v5169_v46  ;;  %v7441_v46 = vmov 0.0   ;;  %v7159_v24 = vld [vmem:[#allocation13 + $0x30] sm:$0xff]  }
 0x915   : > { %v5174_v9 = vpop.f32.mrf.mxu1 }
 0x916   : > { %v5324_v10 = vrot.slane %v5191_v44, 4  ;;  %6544 = vmatmul.mubr.msk.bf16.vlgmr.msra.gmra.mxu0 %vm5255_vm13, %v5191_v44  ;;  %v7161_v44 = vld [vmem:[#allocation13 + $0x20] sm:$0xff]  }
 0x917   : > { %5491 = vmatpush1.bf16.msra.mxu0 %v7097_v49  ;;  %v5177_v48 = vpop.f32.mrf.mxu1  ;;  %5516 = vmatprep.mubr.bf16.mxu0 %v10552_v35  ;;  %v7160_v49 = vld [vmem:[#allocation13 + $0x28] sm:$0xff]  }
 0x918   : > { %6555 = vmatmul.mubr.msk.bf16.vlgmr.msra.gmra.mxu1 %vm5255_vm13, %v5324_v10  ;;  %5492 = vmatprep.subr.bf16.mxu0 %v7105_v0  ;;  %v7162_v0 = vld [vmem:[#allocation13 + $0x18] sm:$0xff]  }
 0x919   : > { %5599 = vmatpush1.bf16.msra.mxu1 %v7100_v61  ;;  %v5179_v4 = vpop.f32.mrf.mxu1  ;;  %5624 = vmatprep.mubr.bf16.mxu1 %v10552_v35 }
 0x91a   : > { %5600 = vmatprep.subr.bf16.mxu1 %v7108_v5 }
 0x91b   : > { %5493 = vmatpush1.bf16.msra.mxu0 %v7103_v26  ;;  %v5180_v45 = vpop.f32.mrf.mxu1 }
 0x91c   : > { %5494 = vmatprep.subr.bf16.mxu0 %v7111_v54  ;;  %v5192_v15 = vpack.c.bf16 %v5180_v45, %v5177_v48 }
 0x91d   : > { %5601 = vmatpush1.bf16.msra.mxu1 %v7106_v20  ;;  %v5182_v2 = vpop.f32.mrf.mxu1 }
 0x91e   : > { %5602 = vmatprep.subr.bf16.mxu1 %v7114_v59  ;;  %v5538_v56 = vrot.slane %v5192_v15, 4  ;;  %v5194_v59 = vld [vmem:[%s10320_s12] sm:$0x3] }
 0x91f   : > { %5495 = vmatpush1.bf16.msra.mxu0 %v7109_v29  ;;  %v5185_v22 = vpop.f32.mrf.mxu1 }
 0x920   : > { %5496 = vmatprep.subr.bf16.mxu0 %v7117_v27  ;;  %v5193_v13 = vpack.c.bf16 %v5185_v22, %v5185_v22 }
 0x921   : > { %5603 = vmatpush1.bf16.msra.mxu1 %v7112_v6  ;;  %v5187_v16 = vpop.f32.mrf.mxu1  ;;  %v5304_v6 = vrot.slane %v5194_v59, %v10553_v47 }
 0x922   : > { %5604 = vmatprep.subr.bf16.mxu1 %v7120_v23 }
 0x923   : > { %5497 = vmatpush1.bf16.msra.mxu0 %v7115_v3  ;;  %v5188_v8 = vpop.f32.mrf.mxu1  ;;  %v5308_v3 = vrot.slane %v5194_v59, %v10554_v62  ;;  %v7163_v62 = vld [vmem:[#allocation13 + $0x10] sm:$0xff]  }
 0x924   : > { %5498 = vmatprep.subr.bf16.mxu0 %v7123_v12 }
 0x925   : > { %5605 = vmatpush1.bf16.msra.mxu1 %v7118_v39  ;;  %v5189_v1 = vpop.f32.mrf.mxu1 }
 0x926   : > { %5606 = vmatprep.subr.bf16.mxu1 %v7126_v11 }
 0x927   : > { %5499 = vmatpush1.bf16.msra.mxu0 %v7121_v33 }
 0x928   : > { %5704 = vmatprep.subr.bf16.mxu0 %v7129_v50 }
 0x929   : > { %5607 = vmatpush1.bf16.msra.mxu1 %v7124_v30 }
 0x92a   : > { %6566 = vmatmul.mubr.msk.bf16.vlgmr.msra.gmra.mxu0 %vm5255_vm13, %v5192_v15  ;;  %6672 = vmatprep.subr.msk.bf16.mxu1 %vm3678_vm5, %v7142_v17  ;;  %v6589_v17 = vld [vmem:[%s10322_s14] ss:$0 sm:$0xff] }
 0x92b   : > { %5705 = vmatpush1.bf16.msra.mxu0 %v7127_v31  ;;  %5730 = vmatprep.mubr.bf16.mxu0 %v10552_v35  ;;  %v7136_v35 = vld [vmem:[%s10319_s11 + $0x150] ss:$8 sps:$4 sm:$0xff]  }
 0x92c   : > { %6577 = vmatmul.mubr.msk.bf16.vlgmr.msra.gmra.mxu1 %vm5255_vm13, %v5538_v56  ;;  %5706 = vmatprep.subr.bf16.mxu0 %v7132_v43 }
 0x92d   : > { %6622 = vmatpush3.bf16.msra.mxu1 %v7143_v60 }
 0x92e   : > { %6623 = vmatprep.subr.bf16.mxu1 %v7144_v21 }
 0x92f   : > { %5707 = vmatpush1.bf16.msra.mxu0 %v7130_v55 }
 0x930   : > { %5708 = vmatprep.subr.bf16.mxu0 %v7135_v53 }
 0x931   : > { %6624 = vmatpush3.bf16.msra.mxu1 %v7145_v32 }
 0x932   : > { %6625 = vmatprep.subr.bf16.mxu1 %v7146_v37 }
 0x933   : > { %5709 = vmatpush1.bf16.msra.mxu0 %v7133_v7 }
 0x934   : > { %5710 = vmatprep.subr.bf16.mxu0 %v7138_v41 }
 0x935   : > { %6626 = vmatpush3.bf16.msra.mxu1 %v7147_v42 }
 0x936   : > { %6627 = vmatprep.subr.bf16.mxu1 %v7148_v57 }
 0x937   : > { %5711 = vmatpush1.bf16.msra.mxu0 %v7136_v35 }
 0x938   : > { %5712 = vmatprep.subr.bf16.mxu0 %v7141_v18  ;;  %v7164_v18 = vld [vmem:[#allocation13 + $0x8] sm:$0xff]  }
 0x939   : > { %6628 = vmatpush3.bf16.msra.mxu1 %v7149_v34 }
 0x93a   : > { %6629 = vmatprep.subr.bf16.mxu1 %v7150_v63  ;;  %v6607_v63 = vld [vmem:[%s10324_s16] ss:$0 sm:$0xff] }
 0x93b   : > { %5713 = vmatpush1.bf16.msra.mxu0 %v7139_v51  ;;  %v7165_v51 = vld [vmem:[#allocation13] sm:$0xff]  }
 0x93c   : > { %6652 = vmatprep.subr.bf16.mxu0 %v7441_v46 }
 0x93d   : > { %6630 = vmatpush3.bf16.msra.mxu1 %v7151_v25 }
 0x93e   : > { %6588 = vmatmul.mubr.msk.bf16.vlgmr.msra.gmra.mxu0 %vm5255_vm13, %v5193_v13  ;;  %6631 = vmatprep.subr.bf16.mxu1 %v7152_v40 }
 0x93f   : > { %6653 = vmatpush3.bf16.msra.mxu0 %v5999_v38  ;;  %6668 = vmatprep.mubr.msk.bf16.mxu0 %vm7442_vm14, %v7441_v46 }
 0x940   : > { %6654 = vmatprep.subr.bf16.mxu0 %v7441_v46 }
 0x941   : > { %6632 = vmatpush3.bf16.msra.mxu1 %v7153_v36 }
 0x942   : > { %6633 = vmatprep.subr.bf16.mxu1 %v7154_v19 }
 0x943   : > { %6655 = vmatpush3.bf16.msra.mxu0 %v7159_v24 }
 0x944   : > { %6656 = vmatprep.subr.bf16.mxu0 %v7441_v46 }
 0x945   : > { %6634 = vmatpush3.bf16.msra.mxu1 %v7155_v14 }
 0x946   : > { %6635 = vmatprep.subr.bf16.mxu1 %v7156_v52 }
 0x947   : > { %6657 = vmatpush3.bf16.msra.mxu0 %v7160_v49 }
 0x948   : > { %6658 = vmatprep.subr.bf16.mxu0 %v7441_v46 }
 0x949   : > { %6636 = vmatpush3.bf16.msra.mxu1 %v7157_v28 }
 0x94b   : > { %6659 = vmatpush3.bf16.msra.mxu0 %v7161_v44 }
 0x94c   : > { %6660 = vmatprep.subr.bf16.mxu0 %v7441_v46 }
 0x94f   : > { %6661 = vmatpush3.bf16.msra.mxu0 %v7162_v0 }
 0x950   : > { %6662 = vmatprep.subr.bf16.mxu0 %v7441_v46 }
 0x953   : > { %6663 = vmatpush3.bf16.msra.mxu0 %v7163_v62 }
 0x954   : > { %6664 = vmatprep.subr.bf16.mxu0 %v7441_v46 }
 0x957   : > { %6665 = vmatpush3.bf16.msra.mxu0 %v7164_v18 }
 0x958   : > { %6666 = vmatprep.subr.bf16.mxu0 %v7441_v46 }
 0x95b   : > { %6667 = vmatpush3.bf16.msra.mxu0 %v7165_v51 }
 0x9d6   : > { %v5293_v9 = vpop.f32.mrf.mxu0 }
 0x9d7   : > { %v5311_v16 = vadd.f32 %v5304_v6, %v5293_v9 }
 0x9d8   : > { %v5295_v61 = vpop.f32.mrf.mxu0  ;;  %v5412_v10 = vpop.f32.mrf.mxu1 }
 0x9d9   : > { %v5312_v39 = vadd.f32 %v5308_v3, %v5295_v61  ;;  %v5419_v11 = vadd.f32 %v5412_v10, %v5311_v16 }
 0x9da   : > { %v5297_v5 = vpop.f32.mrf.mxu0  ;;  %v5414_v48 = vpop.f32.mrf.mxu1 }
 0x9db   : > { %v5420_v8 = vadd.f32 %v5414_v48, %v5312_v39 }
 0x9dc   : > { %v5298_v26 = vpop.f32.mrf.mxu0  ;;  %v5416_v54 = vpop.f32.mrf.mxu1 }
 0x9de   : > { %v5417_v4 = vpop.f32.mrf.mxu1 }
 0x9ea   : > { %v5518_v20 = vpop.f32.mrf.mxu0 }
 0x9eb   : > { %v5525_v33 = vadd.f32 %v5518_v20, %v5419_v11 }
 0x9ec   : > { %v5520_v45 = vpop.f32.mrf.mxu0  ;;  %v5626_v29 = vpop.f32.mrf.mxu1 }
 0x9ed   : > { %v5526_v50 = vadd.f32 %v5520_v45, %v5420_v8  ;;  %v5633_v1 = vadd.f32 %v5626_v29, %v5525_v33 }
 0x9ee   : > { %v5522_v27 = vpop.f32.mrf.mxu0  ;;  %v5628_v2 = vpop.f32.mrf.mxu1 }
 0x9ef   : > { %v5634_v15 = vadd.f32 %v5628_v2, %v5526_v50 }
 0x9f0   : > { %v5523_v23 = vpop.f32.mrf.mxu0  ;;  %v5630_v22 = vpop.f32.mrf.mxu1 }
 0x9f2   : > { %v5631_v12 = vpop.f32.mrf.mxu1 }
 0x9fe   : > { %v5732_v30 = vpop.f32.mrf.mxu0 }
 0x9ff   : > { %v5739_v31 = vadd.f32 %v5732_v30, %v5633_v1 }
 0xa00   : > { %v5734_v43 = vpop.f32.mrf.mxu0 }
 0xa01   : > { %v5740_v56 = vadd.f32 %v5734_v43, %v5634_v15  ;;  %v5741_v55 = vmax.f32 %v5739_v31, 0.0 }
 0xa02   : > { %v5736_v53 = vpop.f32.mrf.mxu0 }
 0xa03   : > { %v5742_v47 = vmax.f32 %v5740_v56, 0.0  ;;  %v5743_v35 = vpack.c.bf16 %v5741_v55, %v5741_v55 }
 0xa04   : > { %v5737_v7 = vpop.f32.mrf.mxu0 }
 0xa05   : > { %v5744_v41 = vpack.c.bf16 %v5742_v47, %v5742_v47 }
 0xa07   : > { %6606 = vmatprep.mubr.msk.bf16.mxu1 %vm3852_vm7, %v5744_v41 }
 0xa08   : > { %5918 = vmatmul.mubr.bf16.vlgmr.msra.gmra.mxu1 %v5743_v35 }
 0xac8   : > { %v6637_v13 = vpop.f32.mrf.mxu1 }
 0xaca   : > { %v6638_v60 = vpop.f32.mrf.mxu1 }
 0xacb   : > { %v6639_v21 = vadd.f32 %v6638_v60, %v6637_v13 }
 0xacc   : > { %v6640_v32 = vpop.f32.mrf.mxu1 }
 0xacd   : > { %v5920_v37 = vadd.f32 %v6639_v21, %v6589_v17 }
 0xace   : > { %v6641_v42 = vpop.f32.mrf.mxu1 }
 0xacf   : > { %v5925_v57 = vmax.f32 %v5920_v37, 0.0 }
 0xad1   : > { %v5926_v34 = vpack.c.bf16 %v5925_v57, %v5925_v57 }
 0xad3   : > { %6669 = vmatmul.mubr.msk.bf16.vlgmr.msra.gmra.mxu0 %vm5994_vm15, %v5926_v34 }
 0xb93   : > { %v6035_v25 = vpop.f32.mrf.mxu0 }
 0xb94   : > { %v6036_v40 = vadd.f32 %v6607_v63, %v6035_v25 }
 0xb95   : > { %v6670_v36 = vpop.f32.mrf.mxu0 }
 0xb96   : > { %6041 = vst [vmem:[%s638_s4] sm:$0xff] %v6036_v40 }
 0xb97   : > { %v6038_v19 = vpop.f32.mrf.mxu0 }
 0xb98   : > { %7361 = shalt.err (!%p7358_p2)
}
 0xb99   : > { %s7362_s23 = scalar_lea.hbm %s10267_s26, 128  ;;  %s7366_s22 = scalar_lea.hbm %s10325_s17, 256 }
 0xb9a   : > { %p7363_p5 = scmp.ne.s32.totalorder %s10267_s26, %s7362_s23  ;;  %p7367_p10 = scmp.lt.s32.totalorder %s10267_s26, %s10325_s17 }
 0xb9b   : > { %p7368_p3 = scmp.lt.s32.totalorder %s7366_s22, %s7362_s23 }
 0xb9c   : > { %p7364_p6 = pnand %p7363_p5, %p10555_p8 }
 0xb9d   : > { %p7369_p4 = por %p7368_p3, %p7367_p10 }
 0xb9e   : > { %p7365_p12 = pneg %p7364_p6 }
 0xba0   : > { %p7370_p7 = pnand %p7369_p4, %p7365_p12 }
 0xba2   : > { %7373 = shalt.err (!%p7370_p7)
}
 0xba3   : > { %6701 = dma.vmem_to_hbm [thread:$0]  (%p10555_p8), %s10269_s0, 128, %s10267_s26, %s6043_s30   ;;  %v6671_v14 = vpop.f32.mrf.mxu0 }
 0xba4 PF: > { %s10556_s19 = sld [smem:[#allocation22_spill]] }
 0xba5   : > { %s10557_s6 = sld [smem:[#allocation20_spill]] }
 0xba6   : > { %s10558_s28 = sld [smem:[#allocation25_spill]] }
 0xbaa   : > { %p6743_p11 = scmp.ge.s32.totalorder %s10556_s19, 2 }
 0xbab   : > { %s6068_s24 = sand.u32 1, %s10557_s6  }
 0xbac   : > { %p10559_p0 = scmp.ne.s32.totalorder %s10558_s28, 0  ;;  %s6069_s20 = scalar_lea.sflag [#allocation4], %s6068_s24 }
 0xbae   : > { %p6726_p1 = pnand %p6743_p11, %p10559_p0 }
 0xbb0   : > { %p6727_p13 = pneg %p6726_p1 }
 0xbb2   : > { %7407 = dma.done.wait (%p6727_p13), %s6069_s20, 128  }
 0xbb3   : > { %7409 = vsyncadd (%p6727_p13), %s6069_s20, 4294967168  ;;  %s10560_s27 = sld [smem:[#allocation23_spill]]  ;;  %s10563_s24 = smov %s7416_s25 }
 0xbb4   : > { %s10561_s23 = sld [smem:[#allocation21_spill]] }
 0xbb5   : > { %s10562_s26 = sld [smem:[#allocation24_spill]] }
 0xbb9   : > { %p31_p9 = scmp.ge.s32.totalorder %s10560_s27, 4  }
 0xbba   : > { %s10564_s25 = smov %s10561_s23 }
 0xbbb   :  { %33 = sbr.rel (!%p31_p9) target bundleno = 12 (0xc), region = 158 }
 0xbc0   :  { %6074 = vsyncpa [#allocation3], 1 }
 0xbc1   :  { %6076 = vsyncpa [#allocation3 + $0x1], 1 }
 0xbc2   :  { %6077 = vsyncpa [#allocation6], 1 }
 0xbc3   :  { %6078 = vsyncpa [#allocation9], 1 }
 0xbc4   :  { %6079 = vsyncpa [#allocation12], 1 }
 0xbc5   :  { %6080 = vsyncpa [#allocation4], 1 }
 0xbc6   :  { %6082 = vsyncpa [#allocation4 + $0x1], 1 }

</bundles_post_ra>
